<compile_context>
chip_gen: v5e
topology: v5e:2x2
jax: 0.10.0
libtpu: 0.0.40
codegen_flags: <defaults>
</compile_context>

<pallas_src>
import jax
import jax.numpy as jnp
from jax.experimental import pallas as pl
from jax.experimental.pallas import tpu as pltpu


N_FEATURES = 784
HIDDEN = (1024, 512, 256)
DEFAULT_TILE = 512  # 512 => ~1.75 us of MXU work per step on v6e (overhead <20%);
                    # 1024 also fits VMEM (~22 MiB est.) for very large batches.


def _round_up(x, m):
    return (x + m - 1) // m * m


def _pick_batch_tile(B, target=DEFAULT_TILE):
    """Batch tile: multiple of 16 (bf16 sublanes), big enough to amortize the
    per-grid-step overhead, and guaranteeing >= 2 grid steps when the batch
    allows so ("parallel",) can shard across v7x's two TensorCores."""
    b16 = _round_up(max(B, 1), 16)
    if b16 <= 32:                       # tiny batch: one step, no core split
        return b16
    return min(target, _round_up(pl.cdiv(b16, 2), 16))


def _leaky_relu(x, slope=0.2):
    return jnp.where(x > 0, x, slope * x)


def discriminator_kernel(x_ref,
                         w0_ref, b0_ref,
                         w1_ref, b1_ref,
                         w2_ref, b2_ref,
                         w3_ref, b3_ref,
                         o_ref):
    # Cast x to bf16 in-kernel (VPU work hidden under MXU slack; avoids a
    # separate wrapper-side HBM pass over x).
    x = x_ref[...].astype(jnp.bfloat16)

    # hidden0: Linear(784->1024) + LeakyReLU(0.2) + Dropout [eval: identity]
    h = jnp.dot(x, w0_ref[...], preferred_element_type=jnp.float32)
    h = _leaky_relu(h + b0_ref[...])                 # f32 elementwise (v5e-safe)

    # hidden1: Linear(1024->512) + LeakyReLU(0.2) + Dropout [eval: identity]
    h = jnp.dot(h.astype(jnp.bfloat16), w1_ref[...],
                preferred_element_type=jnp.float32)
    h = _leaky_relu(h + b1_ref[...])

    # hidden2: Linear(512->256) + LeakyReLU(0.2) + Dropout [eval: identity]
    h = jnp.dot(h.astype(jnp.bfloat16), w2_ref[...],
                preferred_element_type=jnp.float32)
    h = _leaky_relu(h + b2_ref[...])

    # out: Linear(256->1) + Sigmoid.  N=1 would waste a full MXU pass, so do it
    # as an f32 broadcast-multiply + lane reduction on the (otherwise idle)
    # VPU/XLU.
    logits = jnp.sum(h * w3_ref[...], axis=-1, keepdims=True) + b3_ref[...]
    o_ref[...] = jax.nn.sigmoid(logits).astype(o_ref.dtype)


def prepare_params(params):
    """One-time conversion of f32 (in, out) params into kernel-ready arrays.

    Called at parameter load/update time so the per-forward path performs no
    weight casting / padding HBM passes.
    """
    return dict(
        w0=params["w0"].astype(jnp.bfloat16),            # (784, 1024)
        w1=params["w1"].astype(jnp.bfloat16),            # (1024, 512)
        w2=params["w2"].astype(jnp.bfloat16),            # (512, 256)
        w3=params["w3"].reshape(1, -1).astype(jnp.float32),  # (1, 256) row, f32 head
        b0=params["b0"].reshape(1, -1).astype(jnp.float32),
        b1=params["b1"].reshape(1, -1).astype(jnp.float32),
        b2=params["b2"].reshape(1, -1).astype(jnp.float32),
        b3=params["b3"].reshape(1, -1).astype(jnp.float32),
    )


def discriminator_forward(x, kparams, *, tb=None):
    """x: (B, 784) float32. kparams: output of prepare_params. Returns (B, 1) f32."""
    B, F = x.shape
    assert F == N_FEATURES

    tb = _pick_batch_tile(B) if tb is None else _round_up(tb, 16)
    Bp = _round_up(B, tb)
    if Bp != B:
        # Zero rows -> outputs sigmoid(bias), finite, and sliced off below.
        x = jnp.pad(x, ((0, Bp - B), (0, 0)))

    grid = (Bp // tb,)

    stream = lambda shape: pl.BlockSpec(shape, lambda i: (i, 0))    # batch-tiled
    resident = lambda arr: pl.BlockSpec(arr.shape, lambda i: (0, 0))  # VMEM-resident

    w0, w1, w2, w3 = kparams["w0"], kparams["w1"], kparams["w2"], kparams["w3"]
    b0, b1, b2, b3 = kparams["b0"], kparams["b1"], kparams["b2"], kparams["b3"]

    flops = 2 * Bp * (N_FEATURES * 1024 + 1024 * 512 + 512 * 256 + 256)
    bytes_accessed = (
        int(x.size) * x.dtype.itemsize
        + sum(int(a.size) * a.dtype.itemsize
              for a in (w0, b0, w1, b1, w2, b2, w3, b3))
        + Bp * 4)

    out = pl.pallas_call(
        discriminator_kernel,
        out_shape=jax.ShapeDtypeStruct((Bp, 1), jnp.float32),
        grid=grid,
        in_specs=[
            stream((tb, N_FEATURES)),
            resident(w0), resident(b0),
            resident(w1), resident(b1),
            resident(w2), resident(b2),
            resident(w3), resident(b3),
        ],
        out_specs=stream((tb, 1)),
        compiler_params=pltpu.CompilerParams(
            dimension_semantics=("parallel",),
            vmem_limit_bytes=32 << 20,
        ),
        cost_estimate=pl.CostEstimate(
            flops=flops,
            transcendentals=Bp,
            bytes_accessed=bytes_accessed,
        ),
    )(x, w0, b0, w1, b1, w2, b2, w3, b3)

    return out[:B]


def init_params(key):
    """Deterministic init mimicking nn.Linear's U(-1/sqrt(fan_in), 1/sqrt(fan_in))."""
    dims = [(N_FEATURES, 1024), (1024, 512), (512, 256), (256, 1)]
    params = {}
    for i, (fan_in, fan_out) in enumerate(dims):
        key, kw, kb = jax.random.split(key, 3)
        bound = 1.0 / jnp.sqrt(fan_in)
        params[f"w{i}"] = jax.random.uniform(
            kw, (fan_in, fan_out), jnp.float32, -bound, bound)
        # biases kept 2D (1, fan_out) for TPU-friendly broadcasting in-kernel
        params[f"b{i}"] = jax.random.uniform(
            kb, (1, fan_out), jnp.float32, -bound, bound)
    return params


def reference_forward(x, params):
    """Pure-JAX reference replicating the kernel's bf16-weight / f32-accum math.
    (Against true f32 PyTorch math, differences would be at bf16 precision.)"""
    def layer(h_bf16, w, b):
        a = jnp.dot(h_bf16, w.astype(jnp.bfloat16),
                    preferred_element_type=jnp.float32) + b
        return jnp.where(a > 0, a, 0.2 * a)

    h = layer(x.astype(jnp.bfloat16), params["w0"], params["b0"])
    h = layer(h.astype(jnp.bfloat16), params["w1"], params["b1"])
    h = layer(h.astype(jnp.bfloat16), params["w2"], params["b2"])
    logits = h @ params["w3"] + params["b3"]          # f32 head, matches kernel
    return jax.nn.sigmoid(logits)


if __name__ == "__main__":
    key = jax.random.PRNGKey(0)
    kp, kx1, kx2 = jax.random.split(key, 3)
    params = init_params(kp)
    kparams = prepare_params(params)   # one-time weight conversion (off hot path)

    # Small single-step case.
    B1 = 2
    x1 = jax.random.normal(kx1, (B1, N_FEATURES), jnp.float32)
    out1 = jax.block_until_ready(discriminator_forward(x1, kparams))
    ref1 = reference_forward(x1, params)
    assert out1.shape == (B1, 1), out1.shape
    assert jnp.all(jnp.isfinite(out1))
    assert jnp.allclose(out1, ref1, atol=1e-4, rtol=1e-4), (out1, ref1)

    # Non-multiple batch exercising batch padding and a 2-step ("parallel") grid.
    B2 = 40
    x2 = jax.random.normal(kx2, (B2, N_FEATURES), jnp.float32)
    out2 = jax.block_until_ready(discriminator_forward(x2, kparams))
    ref2 = reference_forward(x2, params)
    assert out2.shape == (B2, 1), out2.shape
    assert jnp.all(jnp.isfinite(out2))
    assert jnp.allclose(out2, ref2, atol=1e-4, rtol=1e-4)

    print("KERNEL_OK")
</pallas_src>

<mosaic_0001>
module attributes {stable_mosaic.version = 11 : i64} {
  func.func @discriminator_kernel(%arg0: i32, %arg1: memref<16x784xf32, #tpu.memory_space<vmem>>, %arg2: memref<784x1024xbf16, #tpu.memory_space<vmem>>, %arg3: memref<1x1024xf32, #tpu.memory_space<vmem>>, %arg4: memref<1024x512xbf16, #tpu.memory_space<vmem>>, %arg5: memref<1x512xf32, #tpu.memory_space<vmem>>, %arg6: memref<512x256xbf16, #tpu.memory_space<vmem>>, %arg7: memref<1x256xf32, #tpu.memory_space<vmem>>, %arg8: memref<1x256xf32, #tpu.memory_space<vmem>>, %arg9: memref<1x1xf32, #tpu.memory_space<vmem>>, %arg10: memref<16x1xf32, #tpu.memory_space<vmem>>) attributes {dimension_semantics = [#tpu.dimension_semantics<parallel>], iteration_bounds = array<i64: 1>, scalar_prefetch = 0 : i64, scratch_operands = 0 : i64, tpu.core_type = #tpu.core_type<tc>, window_params = [{transform_indices = @transform_0, window_bounds = array<i64: 16, 784>}, {pipeline_mode = #tpu.pipeline_mode<synchronous>, transform_indices = @transform_1, window_bounds = array<i64: 784, 1024>}, {pipeline_mode = #tpu.pipeline_mode<synchronous>, transform_indices = @transform_2, window_bounds = array<i64: 1, 1024>}, {pipeline_mode = #tpu.pipeline_mode<synchronous>, transform_indices = @transform_3, window_bounds = array<i64: 1024, 512>}, {pipeline_mode = #tpu.pipeline_mode<synchronous>, transform_indices = @transform_4, window_bounds = array<i64: 1, 512>}, {pipeline_mode = #tpu.pipeline_mode<synchronous>, transform_indices = @transform_5, window_bounds = array<i64: 512, 256>}, {pipeline_mode = #tpu.pipeline_mode<synchronous>, transform_indices = @transform_6, window_bounds = array<i64: 1, 256>}, {pipeline_mode = #tpu.pipeline_mode<synchronous>, transform_indices = @transform_7, window_bounds = array<i64: 1, 256>}, {pipeline_mode = #tpu.pipeline_mode<synchronous>, transform_indices = @transform_8, window_bounds = array<i64: 1, 1>}, {transform_indices = @transform_9, window_bounds = array<i64: 16, 1>}]} {
    %c0 = arith.constant 0 : index
    %c0_0 = arith.constant 0 : index
    %0 = vector.load %arg1[%c0, %c0_0] : memref<16x784xf32, #tpu.memory_space<vmem>>, vector<16x784xf32>
    %1 = arith.truncf %0 : vector<16x784xf32> to vector<16x784xbf16>
    %c0_1 = arith.constant 0 : index
    %c0_2 = arith.constant 0 : index
    %2 = vector.load %arg2[%c0_1, %c0_2] : memref<784x1024xbf16, #tpu.memory_space<vmem>>, vector<784x1024xbf16>
    %cst = arith.constant dense<0.000000e+00> : vector<16x1024xf32>
    %3 = tpu.matmul %1, %2, %cst {dimension_numbers = #tpu.dot_dimension_numbers<[1], [0], [0], [1], [0, 0, 1, 1], [], []>} : vector<16x784xbf16>, vector<784x1024xbf16>, vector<16x1024xf32> -> vector<16x1024xf32>
    %c0_3 = arith.constant 0 : index
    %c0_4 = arith.constant 0 : index
    %4 = vector.load %arg3[%c0_3, %c0_4] : memref<1x1024xf32, #tpu.memory_space<vmem>>, vector<1x1024xf32>
    %5 = vector.broadcast %4 : vector<1x1024xf32> to vector<16x1024xf32>
    %6 = arith.addf %3, %5 : vector<16x1024xf32>
    %cst_5 = arith.constant 0.000000e+00 : f32
    %7 = vector.broadcast %cst_5 : f32 to vector<16x1024xf32>
    %8 = arith.cmpf ogt, %6, %7 : vector<16x1024xf32>
    %cst_6 = arith.constant 2.000000e-01 : f32
    %9 = vector.broadcast %cst_6 : f32 to vector<16x1024xf32>
    %10 = arith.mulf %9, %6 : vector<16x1024xf32>
    %11 = arith.select %8, %6, %10 : vector<16x1024xi1>, vector<16x1024xf32>
    %12 = arith.truncf %11 : vector<16x1024xf32> to vector<16x1024xbf16>
    %c0_7 = arith.constant 0 : index
    %c0_8 = arith.constant 0 : index
    %13 = vector.load %arg4[%c0_7, %c0_8] : memref<1024x512xbf16, #tpu.memory_space<vmem>>, vector<1024x512xbf16>
    %cst_9 = arith.constant dense<0.000000e+00> : vector<16x512xf32>
    %14 = tpu.matmul %12, %13, %cst_9 {dimension_numbers = #tpu.dot_dimension_numbers<[1], [0], [0], [1], [0, 0, 1, 1], [], []>} : vector<16x1024xbf16>, vector<1024x512xbf16>, vector<16x512xf32> -> vector<16x512xf32>
    %c0_10 = arith.constant 0 : index
    %c0_11 = arith.constant 0 : index
    %15 = vector.load %arg5[%c0_10, %c0_11] : memref<1x512xf32, #tpu.memory_space<vmem>>, vector<1x512xf32>
    %16 = vector.broadcast %15 : vector<1x512xf32> to vector<16x512xf32>
    %17 = arith.addf %14, %16 : vector<16x512xf32>
    %cst_12 = arith.constant 0.000000e+00 : f32
    %18 = vector.broadcast %cst_12 : f32 to vector<16x512xf32>
    %19 = arith.cmpf ogt, %17, %18 : vector<16x512xf32>
    %cst_13 = arith.constant 2.000000e-01 : f32
    %20 = vector.broadcast %cst_13 : f32 to vector<16x512xf32>
    %21 = arith.mulf %20, %17 : vector<16x512xf32>
    %22 = arith.select %19, %17, %21 : vector<16x512xi1>, vector<16x512xf32>
    %23 = arith.truncf %22 : vector<16x512xf32> to vector<16x512xbf16>
    %c0_14 = arith.constant 0 : index
    %c0_15 = arith.constant 0 : index
    %24 = vector.load %arg6[%c0_14, %c0_15] : memref<512x256xbf16, #tpu.memory_space<vmem>>, vector<512x256xbf16>
    %cst_16 = arith.constant dense<0.000000e+00> : vector<16x256xf32>
    %25 = tpu.matmul %23, %24, %cst_16 {dimension_numbers = #tpu.dot_dimension_numbers<[1], [0], [0], [1], [0, 0, 1, 1], [], []>} : vector<16x512xbf16>, vector<512x256xbf16>, vector<16x256xf32> -> vector<16x256xf32>
    %c0_17 = arith.constant 0 : index
    %c0_18 = arith.constant 0 : index
    %26 = vector.load %arg7[%c0_17, %c0_18] : memref<1x256xf32, #tpu.memory_space<vmem>>, vector<1x256xf32>
    %27 = vector.broadcast %26 : vector<1x256xf32> to vector<16x256xf32>
    %28 = arith.addf %25, %27 : vector<16x256xf32>
    %cst_19 = arith.constant 0.000000e+00 : f32
    %29 = vector.broadcast %cst_19 : f32 to vector<16x256xf32>
    %30 = arith.cmpf ogt, %28, %29 : vector<16x256xf32>
    %cst_20 = arith.constant 2.000000e-01 : f32
    %31 = vector.broadcast %cst_20 : f32 to vector<16x256xf32>
    %32 = arith.mulf %31, %28 : vector<16x256xf32>
    %33 = arith.select %30, %28, %32 : vector<16x256xi1>, vector<16x256xf32>
    %c0_21 = arith.constant 0 : index
    %c0_22 = arith.constant 0 : index
    %34 = vector.load %arg8[%c0_21, %c0_22] : memref<1x256xf32, #tpu.memory_space<vmem>>, vector<1x256xf32>
    %35 = vector.broadcast %34 : vector<1x256xf32> to vector<16x256xf32>
    %36 = arith.mulf %33, %35 : vector<16x256xf32>
    %cst_23 = arith.constant dense<0.000000e+00> : vector<16xf32>
    %37 = vector.multi_reduction <add>, %36, %cst_23 [1] : vector<16x256xf32> to vector<16xf32>
    %38 = vector.shape_cast %37 : vector<16xf32> to vector<16x1xf32>
    %c0_24 = arith.constant 0 : index
    %c0_25 = arith.constant 0 : index
    %39 = vector.load %arg9[%c0_24, %c0_25] : memref<1x1xf32, #tpu.memory_space<vmem>>, vector<1x1xf32>
    %40 = vector.broadcast %39 : vector<1x1xf32> to vector<16x1xf32>
    %41 = arith.addf %38, %40 : vector<16x1xf32>
    %42 = arith.negf %41 : vector<16x1xf32>
    %43 = math.exp %42 : vector<16x1xf32>
    %cst_26 = arith.constant 1.000000e+00 : f32
    %44 = vector.broadcast %cst_26 : f32 to vector<16x1xf32>
    %45 = arith.addf %44, %43 : vector<16x1xf32>
    %46 = arith.divf %44, %45 : vector<16x1xf32>
    %c0_27 = arith.constant 0 : index
    %c0_28 = arith.constant 0 : index
    %47 = vector.load %arg10[%c0_27, %c0_28] : memref<16x1xf32, #tpu.memory_space<vmem>>, vector<16x1xf32>
    tpu.vector_store %arg10[%c0_27, %c0_28], %46 {strides = array<i32>} : memref<16x1xf32, #tpu.memory_space<vmem>>, vector<16x1xf32>,
    return
  }
  func.func @transform_0(%arg0: i32) -> (i32, i32) {
    %c0_i32 = arith.constant 0 : i32
    %c0_i32_0 = arith.constant 0 : i32
    return %arg0, %c0_i32 : i32, i32
  }
  func.func @transform_1(%arg0: i32) -> (i32, i32) {
    %c0_i32 = arith.constant 0 : i32
    %c0_i32_0 = arith.constant 0 : i32
    %c0_i32_1 = arith.constant 0 : i32
    return %c0_i32, %c0_i32_0 : i32, i32
  }
  func.func @transform_2(%arg0: i32) -> (i32, i32) {
    %c0_i32 = arith.constant 0 : i32
    %c0_i32_0 = arith.constant 0 : i32
    %c0_i32_1 = arith.constant 0 : i32
    return %c0_i32, %c0_i32_0 : i32, i32
  }
  func.func @transform_3(%arg0: i32) -> (i32, i32) {
    %c0_i32 = arith.constant 0 : i32
    %c0_i32_0 = arith.constant 0 : i32
    %c0_i32_1 = arith.constant 0 : i32
    return %c0_i32, %c0_i32_0 : i32, i32
  }
  func.func @transform_4(%arg0: i32) -> (i32, i32) {
    %c0_i32 = arith.constant 0 : i32
    %c0_i32_0 = arith.constant 0 : i32
    %c0_i32_1 = arith.constant 0 : i32
    return %c0_i32, %c0_i32_0 : i32, i32
  }
  func.func @transform_5(%arg0: i32) -> (i32, i32) {
    %c0_i32 = arith.constant 0 : i32
    %c0_i32_0 = arith.constant 0 : i32
    %c0_i32_1 = arith.constant 0 : i32
    return %c0_i32, %c0_i32_0 : i32, i32
  }
  func.func @transform_6(%arg0: i32) -> (i32, i32) {
    %c0_i32 = arith.constant 0 : i32
    %c0_i32_0 = arith.constant 0 : i32
    %c0_i32_1 = arith.constant 0 : i32
    return %c0_i32, %c0_i32_0 : i32, i32
  }
  func.func @transform_7(%arg0: i32) -> (i32, i32) {
    %c0_i32 = arith.constant 0 : i32
    %c0_i32_0 = arith.constant 0 : i32
    %c0_i32_1 = arith.constant 0 : i32
    return %c0_i32, %c0_i32_0 : i32, i32
  }
  func.func @transform_8(%arg0: i32) -> (i32, i32) {
    %c0_i32 = arith.constant 0 : i32
    %c0_i32_0 = arith.constant 0 : i32
    %c0_i32_1 = arith.constant 0 : i32
    return %c0_i32, %c0_i32_0 : i32, i32
  }
  func.func @transform_9(%arg0: i32) -> (i32, i32) {
    %c0_i32 = arith.constant 0 : i32
    %c0_i32_0 = arith.constant 0 : i32
    return %arg0, %c0_i32 : i32, i32
  }
}

</mosaic_0001>

<bundles_post_ra>
// kernel: tpu_custom_call.1
= control target key start
LH: loop header
LB: loop body
LE: loop exit
PB: predicated region body
PF: predicated region fallthrough
CT: control target
= control target key end

     0   :  { %s10313_s0 = inlined_call_operand.hbm [shape: f32[16,784], index: 0, kind: input, shape index: {}]   ;;  %s10314_s1 = inlined_call_operand.hbm [shape: bf16[784,1024], index: 1, kind: input, shape index: {}]   ;;  %s10315_s2 = inlined_call_operand.hbm [shape: f32[1,1024], index: 2, kind: input, shape index: {}]   ;;  %s10316_s3 = inlined_call_operand.hbm [shape: bf16[1024,512], index: 3, kind: input, shape index: {}]   ;;  %s10317_s4 = inlined_call_operand.hbm [shape: f32[1,512], index: 4, kind: input, shape index: {}]   ;;  %s10318_s5 = inlined_call_operand.hbm [shape: bf16[512,256], index: 5, kind: input, shape index: {}]   ;;  %s10319_s6 = inlined_call_operand.hbm [shape: f32[1,256], index: 6, kind: input, shape index: {}]   ;;  %s10320_s7 = inlined_call_operand.hbm [shape: f32[1,256], index: 7, kind: input, shape index: {}]   ;;  %s10321_s8 = inlined_call_operand.<no memory space> [shape: f32[1,1], index: 8, kind: input, shape index: {}]   ;;  %s10322_s9 = inlined_call_operand.vmem [shape: f32[16,1], index: 9, kind: output, shape index: {}]  }
   0x1   :  { %v14_v0 = vstv %s10321_s8 }
   0x2   :  { %15 = vst [vmem:[#allocation2] sm:$0x1] %v14_v0 }
   0x3   :  { %16 = vsyncpa [#allocation4], 0 }
   0x4   :  { %17 = vsyncpa [#allocation6], 0 }
   0x5   :  { %18 = vsyncpa [#allocation9], 0 }
   0x6   :  { %19 = vsyncpa [#allocation12], 0  ;;  %s38_s13 = sshll.u32 %s10314_s1, 4  ;;  %s39_s13 = int_to_ptr.hbm [resolvable:$true] %s38_s13 }
   0x7   :  { %20 = vsyncpa [#allocation15], 0  ;;  %s9794_s14 = smov [#allocation5]   ;;  %s62_s18 = sshll.u32 %s10316_s3, 4  ;;  %s63_s18 = int_to_ptr.hbm [resolvable:$true] %s62_s18 }
   0x8   :  { %s40_s15 = sshll.u32 %s9794_s14, 4  ;;  %s9795_s19 = smov 512   ;;  %s41_s15 = int_to_ptr.vmem [resolvable:$true] %s40_s15 }
   0x9   :  { %s9796_s8 = smov 32   ;;  %s9797_s20 = smov [#allocation8]  }
   0xa   :  { %46 = dma.hbm_to_vmem [thread:$0]  %s39_s13, 50176, %s41_s15, [#allocation6], %s9795_s19, %s9795_s19, %s9796_s8  }
   0xb   :  { %s64_s21 = sshll.u32 %s9797_s20, 4  ;;  %s9798_s22 = smov 256   ;;  %s65_s21 = int_to_ptr.vmem [resolvable:$true] %s64_s21 }
   0xc   :  { %s9799_s23 = smov 16   ;;  %s86_s25 = sshll.u32 %s10318_s5, 4  ;;  %s87_s25 = int_to_ptr.hbm [resolvable:$true] %s86_s25 }
   0xd   :  { %70 = dma.hbm_to_vmem [thread:$0]  %s63_s18, 32768, %s65_s21, [#allocation9], %s9798_s22, %s9798_s22, %s9799_s23  }
   0xe   :  { %s9800_s26 = smov [#allocation11]   ;;  %s25_s29 = sshll.u32 %s10313_s0, 4  ;;  %s26_s29 = int_to_ptr.hbm [resolvable:$true] %s25_s29 }
   0xf   :  { %s88_s27 = sshll.u32 %s9800_s26, 4  ;;  %s9801_s30 = smov 128   ;;  %s89_s27 = int_to_ptr.vmem [resolvable:$true] %s88_s27 }
  0x10   :  { %s9802_s10 = smov 8   ;;  %s9803_s11 = smov [#allocation3]  }
  0x11   :  { %94 = dma.hbm_to_vmem [thread:$0]  %s87_s25, 8192, %s89_s27, [#allocation12], %s9801_s30, %s9801_s30, %s9802_s10  }
  0x12   :  { %s27_s12 = sshll.u32 %s9803_s11, 4  ;;  %s9804_s13 = smov 896   ;;  %s28_s12 = int_to_ptr.vmem [resolvable:$true] %s27_s12 }
  0x13   :  { %s9805_s14 = smov 56   ;;  %s52_s16 = sshll.u32 %s10315_s2, 4  ;;  %s53_s16 = int_to_ptr.hbm [resolvable:$true] %s52_s16 }
  0x14   :  { %33 = dma.hbm_to_vmem [thread:$0]  %s26_s29, 1792, %s28_s12, [#allocation4], %s9804_s13, %s9804_s13, %s9805_s14  }
  0x15   :  { %s9806_s17 = smov [#allocation7]   ;;  %s76_s8 = sshll.u32 %s10317_s4, 4  ;;  %s77_s8 = int_to_ptr.hbm [resolvable:$true] %s76_s8 }
  0x16   :  { %s54_s18 = sshll.u32 %s9806_s17, 4  ;;  %s9807_s20 = smov [#allocation10]   ;;  %s55_s18 = int_to_ptr.vmem [resolvable:$true] %s54_s18 }
  0x17   :  { %57 = dma.hbm_to_vmem [thread:$0]  %s53_s16, 128, %s55_s18, [#allocation6]  }
  0x18   :  { %s78_s21 = sshll.u32 %s9807_s20, 4  ;;  %s100_s1 = sshll.u32 %s10319_s6, 4  ;;  %s79_s21 = int_to_ptr.vmem [resolvable:$true] %s78_s21  ;;  %s101_s1 = int_to_ptr.hbm [resolvable:$true] %s100_s1 }
  0x19   :  { %81 = dma.hbm_to_vmem [thread:$0]  %s77_s8, 64, %s79_s21, [#allocation9]  }
  0x1a   :  { %s111_s25 = sshll.u32 %s10320_s7, 4  ;;  %s9808_s26 = smov [#allocation13]   ;;  %s112_s25 = int_to_ptr.hbm [resolvable:$true] %s111_s25 }
  0x1b   :  { %s102_s27 = sshll.u32 %s9808_s26, 4  ;;  %s9809_s4 = smov [#allocation14]   ;;  %s103_s27 = int_to_ptr.vmem [resolvable:$true] %s102_s27 }
  0x1c   :  { %105 = dma.hbm_to_vmem [thread:$0]  %s101_s1, 32, %s103_s27, [#allocation12]  }
  0x1d   :  { %s113_s28 = sshll.u32 %s9809_s4, 4  ;;  %s114_s28 = int_to_ptr.vmem [resolvable:$true] %s113_s28 }
  0x1e   :  { %116 = dma.hbm_to_vmem [thread:$0]  %s112_s25, 32, %s114_s28, [#allocation15]  }
  0x1f   :  { %9784 = dma.done.wait [#allocation4], 1792  }
  0x20   :  { %9785 = vsyncadd [#allocation4], 4294965504 }
  0x21   :  { %9786 = dma.done.wait [#allocation6], 50304  }
  0x22   :  { %9787 = vsyncadd [#allocation6], 4294916992 }
  0x23   :  { %9788 = dma.done.wait [#allocation9], 32832  }
  0x24   :  { %9789 = vsyncadd [#allocation9], 4294934464 }
  0x25   :  { %9790 = dma.done.wait [#allocation12], 8224  }
  0x26   :  { %9791 = vsyncadd [#allocation12], 4294959072 }
  0x27   :  { %9792 = dma.done.wait [#allocation15], 32  }
  0x28   :  { %9793 = vsyncadd [#allocation15], 4294967264  ;;  %v6221_v1 = vld [vmem:[#allocation5 + $0x1c0] sm:$0xf]  ;;  %vm2543_vm0 = vcmask 130048  }
  0x29   :  { %v8913_v2 = vld [vmem:[#allocation5 + $0x1dc] sm:$0xf0] }
  0x2a   :  { %v6477_v3 = vld [vmem:[#allocation5 + $0x3c0] sm:$0xf]  ;;  %v6222_v4 = vor.u32 %v8913_v2, %v6221_v1 }
  0x2b   :  { %v8977_v5 = vld [vmem:[#allocation5 + $0x3dc] sm:$0xf0] }
  0x2c   :  { %v6733_v6 = vld [vmem:[#allocation5 + $0x5c0] sm:$0xf]  ;;  %v6478_v8 = vor.u32 %v8977_v5, %v6477_v3  ;;  %2547 = vmatpush.bf16.msra.mxu0 %v6222_v4 }
  0x2d   :  { %v9041_v7 = vld [vmem:[#allocation5 + $0x5dc] sm:$0xf0] }
  0x2e   :  { %v6734_v9 = vor.u32 %v9041_v7, %v6733_v6  ;;  %v6989_v10 = vld [vmem:[#allocation5 + $0x7c0] sm:$0xf]  ;;  %2561 = vmatpush.bf16.msra.mxu1 %v6478_v8 }
  0x2f   :  { %v9105_v11 = vld [vmem:[#allocation5 + $0x7dc] sm:$0xf0] }
  0x30   :  { %v6189_v12 = vld [vmem:[#allocation5 + $0x180] sm:$0xf]  ;;  %v6990_v13 = vor.u32 %v9105_v11, %v6989_v10  ;;  %2575 = vmatpush.bf16.msra.mxu2 %v6734_v9 }
  0x31   :  { %v8905_v14 = vld [vmem:[#allocation5 + $0x19c] sm:$0xf0] }
  0x32   :  { %v6445_v15 = vld [vmem:[#allocation5 + $0x380] sm:$0xf]  ;;  %v6190_v17 = vor.u32 %v8905_v14, %v6189_v12  ;;  %2589 = vmatpush.bf16.msra.mxu3 %v6990_v13 }
  0x33   :  { %v8969_v16 = vld [vmem:[#allocation5 + $0x39c] sm:$0xf0] }
  0x34   :  { %v6446_v18 = vor.u32 %v8969_v16, %v6445_v15  ;;  %v6701_v19 = vld [vmem:[#allocation5 + $0x580] sm:$0xf]  ;;  %2548 = vmatpush.bf16.msra.mxu0 %v6190_v17 }
  0x35   :  { %v9033_v20 = vld [vmem:[#allocation5 + $0x59c] sm:$0xf0] }
  0x36   :  { %v6957_v21 = vld [vmem:[#allocation5 + $0x780] sm:$0xf]  ;;  %v6702_v22 = vor.u32 %v9033_v20, %v6701_v19  ;;  %2562 = vmatpush.bf16.msra.mxu1 %v6446_v18 }
  0x37   :  { %v9097_v23 = vld [vmem:[#allocation5 + $0x79c] sm:$0xf0] }
  0x38   :  { %v6157_v24 = vld [vmem:[#allocation5 + $0x140] sm:$0xf]  ;;  %v6958_v26 = vor.u32 %v9097_v23, %v6957_v21  ;;  %2576 = vmatpush.bf16.msra.mxu2 %v6702_v22 }
  0x39   :  { %v8897_v25 = vld [vmem:[#allocation5 + $0x15c] sm:$0xf0] }
  0x3a   :  { %v6413_v27 = vld [vmem:[#allocation5 + $0x340] sm:$0xf]  ;;  %v6158_v30 = vor.u32 %v8897_v25, %v6157_v24  ;;  %2590 = vmatpush.bf16.msra.mxu3 %v6958_v26 }
  0x3b   :  { %v8961_v28 = vld [vmem:[#allocation5 + $0x35c] sm:$0xf0] }
  0x3c   :  { %v6669_v29 = vld [vmem:[#allocation5 + $0x540] sm:$0xf]  ;;  %v6414_v34 = vor.u32 %v8961_v28, %v6413_v27  ;;  %2549 = vmatpush.bf16.msra.mxu0 %v6158_v30 }
  0x3d   :  { %v9025_v31 = vld [vmem:[#allocation5 + $0x55c] sm:$0xf0] }
  0x3e   :  { %v6925_v32 = vld [vmem:[#allocation5 + $0x740] sm:$0xf]  ;;  %v6670_v35 = vor.u32 %v9025_v31, %v6669_v29  ;;  %2563 = vmatpush.bf16.msra.mxu1 %v6414_v34  ;;  %v6223_v34 = vld [vmem:[#allocation5 + $0x1e0] sm:$0xf0] }
  0x3f   :  { %v9089_v33 = vld [vmem:[#allocation5 + $0x75c] sm:$0xf0] }
  0x40   :  { %v6125_v36 = vld [vmem:[#allocation5 + $0x100] sm:$0xf]  ;;  %v6926_v39 = vor.u32 %v9089_v33, %v6925_v32  ;;  %2577 = vmatpush.bf16.msra.mxu2 %v6670_v35  ;;  %v8909_v33 = vld [vmem:[#allocation5 + $0x1c4] sm:$0xf] }
  0x41   :  { %v8889_v37 = vld [vmem:[#allocation5 + $0x11c] sm:$0xf0] }
  0x42   :  { %v6381_v38 = vld [vmem:[#allocation5 + $0x300] sm:$0xf]  ;;  %v6126_v45 = vor.u32 %v8889_v37, %v6125_v36  ;;  %2591 = vmatpush.bf16.msra.mxu3 %v6926_v39  ;;  %v161_v37 = vld [vmem:[#allocation3 + $0x48] sm:$0xff] }
  0x43   :  { %v8953_v40 = vld [vmem:[#allocation5 + $0x31c] sm:$0xf0] }
  0x44   :  { %v6637_v41 = vld [vmem:[#allocation5 + $0x500] sm:$0xf]  ;;  %v6382_v46 = vor.u32 %v8953_v40, %v6381_v38  ;;  %2550 = vmatpush.bf16.msra.mxu0 %v6126_v45 }
  0x45   :  { %v9017_v42 = vld [vmem:[#allocation5 + $0x51c] sm:$0xf0] }
  0x46   :  { %v6893_v43 = vld [vmem:[#allocation5 + $0x700] sm:$0xf]  ;;  %v6638_v47 = vor.u32 %v9017_v42, %v6637_v41  ;;  %2564 = vmatpush.bf16.msra.mxu1 %v6382_v46  ;;  %v8973_v42 = vld [vmem:[#allocation5 + $0x3c4] sm:$0xf] }
  0x47   :  { %v9081_v44 = vld [vmem:[#allocation5 + $0x71c] sm:$0xf0] }
  0x48   :  { %v6093_v48 = vld [vmem:[#allocation5 + $0xc0] sm:$0xf]  ;;  %v6894_v51 = vor.u32 %v9081_v44, %v6893_v43  ;;  %2578 = vmatpush.bf16.msra.mxu2 %v6638_v47  ;;  %v152_v43 = vld [vmem:[#allocation3] sm:$0xff]  ;;  %v159_v44 = vld [vmem:[#allocation3 + $0x38] sm:$0xff] }
  0x49   :  { %v8881_v49 = vld [vmem:[#allocation5 + $0xdc] sm:$0xf0]  ;;  %v6479_v47 = vld [vmem:[#allocation5 + $0x3e0] sm:$0xf0] }
  0x4a   :  { %v6349_v50 = vld [vmem:[#allocation5 + $0x2c0] sm:$0xf]  ;;  %v6094_v57 = vor.u32 %v8881_v49, %v6093_v48  ;;  %2592 = vmatpush.bf16.msra.mxu3 %v6894_v51  ;;  %v155_v48 = vld [vmem:[#allocation3 + $0x18] sm:$0xff]  ;;  %v6226_v51 = vor.u32 %v8909_v33, %v6223_v34 }
  0x4b   :  { %v8945_v52 = vld [vmem:[#allocation5 + $0x2dc] sm:$0xf0] }
  0x4c   :  { %v6605_v53 = vld [vmem:[#allocation5 + $0x4c0] sm:$0xf]  ;;  %v6350_v58 = vor.u32 %v8945_v52, %v6349_v50  ;;  %2551 = vmatpush.bf16.msra.mxu0 %v6094_v57 }
  0x4d   :  { %v9009_v54 = vld [vmem:[#allocation5 + $0x4dc] sm:$0xf0] }
  0x4e   :  { %v6861_v55 = vld [vmem:[#allocation5 + $0x6c0] sm:$0xf]  ;;  %v6606_v59 = vor.u32 %v9009_v54, %v6605_v53  ;;  %2565 = vmatpush.bf16.msra.mxu1 %v6350_v58  ;;  %v8901_v58 = vld [vmem:[#allocation5 + $0x184] sm:$0xf] }
  0x4f   :  { %v9073_v56 = vld [vmem:[#allocation5 + $0x6dc] sm:$0xf0] }
  0x50   :  { %v6061_v60 = vld [vmem:[#allocation5 + $0x80] sm:$0xf]  ;;  %v6862_v63 = vor.u32 %v9073_v56, %v6861_v55  ;;  %2579 = vmatpush.bf16.msra.mxu2 %v6606_v59  ;;  %v9889_v56 = vpack.c.bf16 %v159_v44, %v152_v43  ;;  %v6191_v59 = vld [vmem:[#allocation5 + $0x1a0] sm:$0xf0] }
  0x51   :  { %v8873_v61 = vld [vmem:[#allocation5 + $0x9c] sm:$0xf0] }
  0x52   :  { %v6317_v62 = vld [vmem:[#allocation5 + $0x280] sm:$0xf]  ;;  %v6062_v5 = vor.u32 %v8873_v61, %v6061_v60  ;;  %2593 = vmatpush.bf16.msra.mxu3 %v6862_v63  ;;  %v160_v63 = vld [vmem:[#allocation3 + $0x40] sm:$0xff] }
  0x53   :  { %v8937_v0 = vld [vmem:[#allocation5 + $0x29c] sm:$0xf0] }
  0x54   :  { %v6573_v1 = vld [vmem:[#allocation5 + $0x480] sm:$0xf]  ;;  %v6318_v7 = vor.u32 %v8937_v0, %v6317_v62  ;;  %2552 = vmatpush.bf16.msra.mxu0 %v6062_v5  ;;  %v153_v62 = vld [vmem:[#allocation3 + $0x8] sm:$0xff]  ;;  %v6482_v0 = vor.u32 %v8973_v42, %v6479_v47  ;;  %v6194_v5 = vor.u32 %v8901_v58, %v6191_v59  ;;  %v6351_v42 = vld [vmem:[#allocation5 + $0x2e0] sm:$0xf0] }
  0x55   :  { %v9001_v2 = vld [vmem:[#allocation5 + $0x49c] sm:$0xf0] }
  0x56   :  { %v6829_v3 = vld [vmem:[#allocation5 + $0x680] sm:$0xf]  ;;  %v6574_v8 = vor.u32 %v9001_v2, %v6573_v1  ;;  %2566 = vmatpush.bf16.msra.mxu1 %v6318_v7  ;;  %v8965_v2 = vld [vmem:[#allocation5 + $0x384] sm:$0xf] }
  0x57   :  { %v9065_v4 = vld [vmem:[#allocation5 + $0x69c] sm:$0xf0] }
  0x58   :  { %v6029_v6 = vld [vmem:[#allocation5 + $0x40] sm:$0xf]  ;;  %v6830_v12 = vor.u32 %v9065_v4, %v6829_v3  ;;  %2580 = vmatpush.bf16.msra.mxu2 %v6574_v8  ;;  %v6447_v3 = vld [vmem:[#allocation5 + $0x3a0] sm:$0xf0] }
  0x59   :  { %v8865_v9 = vld [vmem:[#allocation5 + $0x5c] sm:$0xf0] }
  0x5a   :  { %v6285_v10 = vld [vmem:[#allocation5 + $0x240] sm:$0xf]  ;;  %v6030_v19 = vor.u32 %v8865_v9, %v6029_v6  ;;  %2594 = vmatpush.bf16.msra.mxu3 %v6830_v12  ;;  %v9895_v9 = vpack.c.bf16 %v160_v63, %v153_v62  ;;  %v6159_v12 = vld [vmem:[#allocation5 + $0x160] sm:$0xf0] }
  0x5b   :  { %v8929_v11 = vld [vmem:[#allocation5 + $0x25c] sm:$0xf0] }
  0x5c   :  { %v6541_v13 = vld [vmem:[#allocation5 + $0x440] sm:$0xf]  ;;  %v6286_v24 = vor.u32 %v8929_v11, %v6285_v10  ;;  %2553 = vmatpush.bf16.msra.mxu0 %v6030_v19  ;;  %v8893_v11 = vld [vmem:[#allocation5 + $0x144] sm:$0xf] }
  0x5d   :  { %v8993_v14 = vld [vmem:[#allocation5 + $0x45c] sm:$0xf0] }
  0x5e   :  { %v6797_v15 = vld [vmem:[#allocation5 + $0x640] sm:$0xf]  ;;  %v6542_v25 = vor.u32 %v8993_v14, %v6541_v13  ;;  %2567 = vmatpush.bf16.msra.mxu1 %v6286_v24  ;;  %v6450_v13 = vor.u32 %v8965_v2, %v6447_v3  ;;  %v6127_v24 = vld [vmem:[#allocation5 + $0x120] sm:$0xf0] }
  0x5f   :  { %v9057_v16 = vld [vmem:[#allocation5 + $0x65c] sm:$0xf0]  ;;  %v6031_v2 = vld [vmem:[#allocation5 + $0x60] sm:$0xf0] }
  0x60   :  { %v5997_v17 = vld [vmem:[#allocation5] sm:$0xf]  ;;  %v6798_v29 = vor.u32 %v9057_v16, %v6797_v15  ;;  %2581 = vmatpush.bf16.msra.mxu2 %v6542_v25  ;;  %v8957_v15 = vld [vmem:[#allocation5 + $0x344] sm:$0xf] }
  0x61   :  { %v8857_v18 = vld [vmem:[#allocation5 + $0x1c] sm:$0xf0]  ;;  %v6415_v16 = vld [vmem:[#allocation5 + $0x360] sm:$0xf0] }
  0x62   :  { %v6253_v20 = vld [vmem:[#allocation5 + $0x200] sm:$0xf]  ;;  %v5998_v36 = vor.u32 %v8857_v18, %v5997_v17  ;;  %2595 = vmatpush.bf16.msra.mxu3 %v6798_v29  ;;  %v6162_v18 = vor.u32 %v8893_v11, %v6159_v12  ;;  %v6418_v25 = vor.u32 %v8957_v15, %v6415_v16  ;;  %v8925_v3 = vld [vmem:[#allocation5 + $0x244] sm:$0xf] }
  0x63   :  { %v8921_v21 = vld [vmem:[#allocation5 + $0x21c] sm:$0xf0]  ;;  %v5999_v15 = vld [vmem:[#allocation5 + $0x20] sm:$0xf0] }
  0x64   :  { %v6509_v22 = vld [vmem:[#allocation5 + $0x400] sm:$0xf]  ;;  %v6254_v40 = vor.u32 %v8921_v21, %v6253_v20  ;;  %2554 = vmatpush.bf16.msra.mxu0 %v5998_v36  ;;  %v6095_v36 = vld [vmem:[#allocation5 + $0xe0] sm:$0xf0] }
  0x65   :  { %v8985_v23 = vld [vmem:[#allocation5 + $0x41c] sm:$0xf0]  ;;  %v9037_v16 = vld [vmem:[#allocation5 + $0x5c4] sm:$0xf] }
  0x66   :  { %v6765_v26 = vld [vmem:[#allocation5 + $0x600] sm:$0xf]  ;;  %v6510_v41 = vor.u32 %v8985_v23, %v6509_v22  ;;  %2568 = vmatpush.bf16.msra.mxu1 %v6254_v40  ;;  %v8885_v23 = vld [vmem:[#allocation5 + $0x104] sm:$0xf] }
  0x67   :  { %v9049_v27 = vld [vmem:[#allocation5 + $0x61c] sm:$0xf0]  ;;  %2555 = vmatmul.bf16.vlgmr.msra.gmra.mxu0 %v9889_v56 }
  0x68   :  { %v7245_v28 = vld [vmem:[#allocation5 + $0x9c0] sm:$0xf]  ;;  %v6766_v45 = vor.u32 %v9049_v27, %v6765_v26  ;;  %2582 = vmatpush.bf16.msra.mxu2 %v6510_v41  ;;  %v8949_v27 = vld [vmem:[#allocation5 + $0x304] sm:$0xf] }
  0x69   :  { %v9169_v30 = vld [vmem:[#allocation5 + $0x9dc] sm:$0xf0]  ;;  %2569 = vmatmul.bf16.vlgmr.msra.gmra.mxu1 %v9895_v9  ;;  %v8941_v41 = vld [vmem:[#allocation5 + $0x2c4] sm:$0xf] }
  0x6a   :  { %v7501_v31 = vld [vmem:[#allocation5 + $0xbc0] sm:$0xf]  ;;  %v7246_v46 = vor.u32 %v9169_v30, %v7245_v28  ;;  %2596 = vmatpush.bf16.msra.mxu3 %v6766_v45  ;;  %v6383_v28 = vld [vmem:[#allocation5 + $0x320] sm:$0xf0]  ;;  %v6130_v30 = vor.u32 %v8885_v23, %v6127_v24  ;;  %v156_v24 = vld [vmem:[#allocation3 + $0x20] sm:$0xff] }
  0x6b   :  { %v9233_v32 = vld [vmem:[#allocation5 + $0xbdc] sm:$0xf0] }
  0x6c   :  { %v154_v35 = vld [vmem:[#allocation3 + $0x10] sm:$0xff]  ;;  %v7502_v50 = vor.u32 %v9233_v32, %v7501_v31  ;;  %2603 = vmatpush.bf16.msrb.mxu0 %v7246_v46 }
  0x6d   :  { %v7533_v38 = vld [vmem:[#allocation5 + $0xc00] sm:$0xf]  ;;  %v9887_v55 = vpack.c.bf16 %v161_v37, %v154_v35  ;;  %v8877_v35 = vld [vmem:[#allocation5 + $0xc4] sm:$0xf] }
  0x6e   :  { %v9241_v39 = vld [vmem:[#allocation5 + $0xc1c] sm:$0xf0]  ;;  %2617 = vmatpush.bf16.msrb.mxu1 %v7502_v50  ;;  %2645 = vmatpush.bf16.msrb.mxu3 %v6226_v51  ;;  %v6098_v44 = vor.u32 %v8877_v35, %v6095_v36  ;;  %v6063_v50 = vld [vmem:[#allocation5 + $0xa0] sm:$0xf0] }
  0x6f   :  { %v162_v49 = vld [vmem:[#allocation3 + $0x50] sm:$0xff]  ;;  %v7534_v60 = vor.u32 %v9241_v39, %v7533_v38  ;;  %2583 = vmatmul.bf16.vlgmr.msra.gmra.mxu2 %v9887_v55  ;;  %v165_v38 = vld [vmem:[#allocation3 + $0x68] sm:$0xff]  ;;  %v6386_v39 = vor.u32 %v8949_v27, %v6383_v28 }
  0x70   :  { %v7213_v52 = vld [vmem:[#allocation5 + $0x980] sm:$0xf]  ;;  %v9891_v61 = vpack.c.bf16 %v162_v49, %v155_v48  ;;  %v8869_v49 = vld [vmem:[#allocation5 + $0x84] sm:$0xf] }
  0x71   :  { %v9161_v53 = vld [vmem:[#allocation5 + $0x99c] sm:$0xf0]  ;;  %2638 = vmatpush.bf16.msrb.mxu2 %v7534_v60  ;;  %v6066_v59 = vor.u32 %v8869_v49, %v6063_v50  ;;  %v7503_v35 = vld [vmem:[#allocation5 + $0xbe0] sm:$0xf0] }
  0x72   :  { %v7469_v54 = vld [vmem:[#allocation5 + $0xb80] sm:$0xf]  ;;  %v7214_v1 = vor.u32 %v9161_v53, %v7213_v52  ;;  %2597 = vmatmul.bf16.vlgmr.msra.gmra.mxu3 %v9891_v61  ;;  %v6354_v52 = vor.u32 %v8941_v41, %v6351_v42  ;;  %v9029_v36 = vld [vmem:[#allocation5 + $0x584] sm:$0xf] }
  0x73   :  { %v9225_v57 = vld [vmem:[#allocation5 + $0xb9c] sm:$0xf0]  ;;  %2646 = vmatpush.bf16.msrb.mxu3 %v6194_v5  ;;  %v6959_v41 = vld [vmem:[#allocation5 + $0x7a0] sm:$0xf0] }
  0x74   :  { %v7470_v4 = vor.u32 %v9225_v57, %v7469_v54  ;;  %v7181_v6 = vld [vmem:[#allocation5 + $0x940] sm:$0xf]  ;;  %2604 = vmatpush.bf16.msrb.mxu0 %v7214_v1  ;;  %v8933_v54 = vld [vmem:[#allocation5 + $0x284] sm:$0xf] }
  0x75   :  { %v9153_v7 = vld [vmem:[#allocation5 + $0x95c] sm:$0xf0]  ;;  %2659 = vmatpush.bf16.msra.mxu2 %v6482_v0  ;;  %v6319_v57 = vld [vmem:[#allocation5 + $0x2a0] sm:$0xf0] }
  0x76   :  { %v7437_v8 = vld [vmem:[#allocation5 + $0xb40] sm:$0xf]  ;;  %v7182_v14 = vor.u32 %v9153_v7, %v7181_v6  ;;  %2618 = vmatpush.bf16.msrb.mxu1 %v7470_v4  ;;  %v8861_v1 = vld [vmem:[#allocation5 + $0x44] sm:$0xf]  ;;  %v6322_v5 = vor.u32 %v8933_v54, %v6319_v57 }
  0x77   :  { %v9217_v10 = vld [vmem:[#allocation5 + $0xb5c] sm:$0xf0]  ;;  %2647 = vmatpush.bf16.msrb.mxu3 %v6162_v18  ;;  %v6287_v4 = vld [vmem:[#allocation5 + $0x260] sm:$0xf0]  ;;  %v6034_v12 = vor.u32 %v8861_v1, %v6031_v2 }
  0x78   :  { %v7438_v17 = vor.u32 %v9217_v10, %v7437_v8  ;;  %v7149_v19 = vld [vmem:[#allocation5 + $0x900] sm:$0xf]  ;;  %2605 = vmatpush.bf16.msrb.mxu0 %v7182_v14  ;;  %v8853_v14 = vld [vmem:[#allocation5 + $0x4] sm:$0xf] }
  0x79   :  { %v9145_v20 = vld [vmem:[#allocation5 + $0x91c] sm:$0xf0]  ;;  %2660 = vmatpush.bf16.msra.mxu2 %v6450_v13  ;;  %v9101_v18 = vld [vmem:[#allocation5 + $0x7c4] sm:$0xf]  ;;  %v6002_v28 = vor.u32 %v8853_v14, %v5999_v15 }
  0x7a   :  { %v7405_v21 = vld [vmem:[#allocation5 + $0xb00] sm:$0xf]  ;;  %v7150_v26 = vor.u32 %v9145_v20, %v7149_v19  ;;  %2619 = vmatpush.bf16.msrb.mxu1 %v7438_v17  ;;  %v6735_v17 = vld [vmem:[#allocation5 + $0x5e0] sm:$0xf0] }
  0x7b   :  { %v9209_v22 = vld [vmem:[#allocation5 + $0xb1c] sm:$0xf0]  ;;  %2648 = vmatpush.bf16.msrb.mxu3 %v6130_v30  ;;  %v6991_v19 = vld [vmem:[#allocation5 + $0x7e0] sm:$0xf0]  ;;  %v157_v30 = vld [vmem:[#allocation3 + $0x28] sm:$0xff] }
  0x7c   :  { %v7406_v29 = vor.u32 %v9209_v22, %v7405_v21  ;;  %v7117_v31 = vld [vmem:[#allocation5 + $0x8c0] sm:$0xf]  ;;  %2606 = vmatpush.bf16.msrb.mxu0 %v7150_v26  ;;  %v9165_v20 = vld [vmem:[#allocation5 + $0x9c4] sm:$0xf]  ;;  %v6290_v22 = vor.u32 %v8925_v3, %v6287_v4 }
  0x7d   :  { %v9137_v32 = vld [vmem:[#allocation5 + $0x8dc] sm:$0xf0]  ;;  %2661 = vmatpush.bf16.msra.mxu2 %v6418_v25  ;;  %v7247_v21 = vld [vmem:[#allocation5 + $0x9e0] sm:$0xf0]  ;;  %v163_v25 = vld [vmem:[#allocation3 + $0x58] sm:$0xff] }
  0x7e   :  { %v7373_v33 = vld [vmem:[#allocation5 + $0xac0] sm:$0xf]  ;;  %v7118_v40 = vor.u32 %v9137_v32, %v7117_v31  ;;  %2620 = vmatpush.bf16.msrb.mxu1 %v7406_v29  ;;  %v8917_v26 = vld [vmem:[#allocation5 + $0x204] sm:$0xf]  ;;  %v164_v31 = vld [vmem:[#allocation3 + $0x60] sm:$0xff]  ;;  %v6738_v32 = vor.u32 %v9037_v16, %v6735_v17 }
  0x7f   :  { %v9201_v34 = vld [vmem:[#allocation5 + $0xadc] sm:$0xf0]  ;;  %2649 = vmatpush.bf16.msrb.mxu3 %v6098_v44  ;;  %v6255_v29 = vld [vmem:[#allocation5 + $0x220] sm:$0xf0] }
  0x80   :  { %v158_v37 = vld [vmem:[#allocation3 + $0x30] sm:$0xff]  ;;  %v7374_v43 = vor.u32 %v9201_v34, %v7373_v33  ;;  %2607 = vmatpush.bf16.msrb.mxu0 %v7118_v40  ;;  %v6994_v33 = vor.u32 %v9101_v18, %v6991_v19  ;;  %v6258_v42 = vor.u32 %v8917_v26, %v6255_v29 }
  0x81   :  { %v7085_v45 = vld [vmem:[#allocation5 + $0x880] sm:$0xf]  ;;  %v9899_v51 = vpack.c.bf16 %v165_v38, %v158_v37  ;;  %2662 = vmatpush.bf16.msra.mxu2 %v6386_v39  ;;  %v9229_v34 = vld [vmem:[#allocation5 + $0xbc4] sm:$0xf]  ;;  %v7250_v37 = vor.u32 %v9165_v20, %v7247_v21  ;;  %v9903_v38 = vpack.c.bf16 %v163_v25, %v156_v24 }
  0x82   :  { %v9129_v46 = vld [vmem:[#allocation5 + $0x89c] sm:$0xf0]  ;;  %2621 = vmatpush.bf16.msrb.mxu1 %v7374_v43  ;;  %v6703_v39 = vld [vmem:[#allocation5 + $0x5a0] sm:$0xf0]  ;;  %v9905_v43 = vpack.c.bf16 %v164_v31, %v157_v30 }
  0x83   :  { %v7341_v47 = vld [vmem:[#allocation5 + $0xa80] sm:$0xf]  ;;  %10327 = vst [vmem:[#allocation21_spill] sm:$0xff] %v9899_v51  ;;  %v7086_v53 = vor.u32 %v9129_v46, %v7085_v45  ;;  %7563 = vmatmul.msk.bf16.vlgmr.msrb.gmra.mxu2 %vm2543_vm0, %v9899_v51  ;;  %2650 = vmatpush.bf16.msrb.mxu3 %v6066_v59  ;;  %v9093_v40 = vld [vmem:[#allocation5 + $0x784] sm:$0xf]  ;;  %v7506_v46 = vor.u32 %v9229_v34, %v7503_v35 }
  0x84   :  { %v9193_v48 = vld [vmem:[#allocation5 + $0xa9c] sm:$0xf0]  ;;  %v9157_v44 = vld [vmem:[#allocation5 + $0x984] sm:$0xf] }
  0x85   :  { %v7342_v58 = vor.u32 %v9193_v48, %v7341_v47  ;;  %v7053_v60 = vld [vmem:[#allocation5 + $0x840] sm:$0xf]  ;;  %2663 = vmatpush.bf16.msra.mxu2 %v6354_v52  ;;  %2608 = vmatpush.bf16.msrb.mxu0 %v7086_v53  ;;  %v7215_v45 = vld [vmem:[#allocation5 + $0x9a0] sm:$0xf0]  ;;  %v6706_v47 = vor.u32 %v9029_v36, %v6703_v39  ;;  %v6962_v48 = vor.u32 %v9093_v40, %v6959_v41 }
  0x86   :  { %v9121_v62 = vld [vmem:[#allocation5 + $0x85c] sm:$0xf0]  ;;  %v9221_v49 = vld [vmem:[#allocation5 + $0xb84] sm:$0xf]  ;;  %v7218_v53 = vor.u32 %v9157_v44, %v7215_v45 }
  0x87   :  { %v7309_v63 = vld [vmem:[#allocation5 + $0xa40] sm:$0xf]  ;;  %v7054_v6 = vor.u32 %v9121_v62, %v7053_v60  ;;  %2622 = vmatpush.bf16.msrb.mxu1 %v7342_v58  ;;  %2651 = vmatpush.bf16.msrb.mxu3 %v6034_v12  ;;  %v7471_v50 = vld [vmem:[#allocation5 + $0xba0] sm:$0xf0] }
  0x88   :  { %v9185_v0 = vld [vmem:[#allocation5 + $0xa5c] sm:$0xf0]  ;;  %v9021_v52 = vld [vmem:[#allocation5 + $0x544] sm:$0xf]  ;;  %v7474_v62 = vor.u32 %v9221_v49, %v7471_v50 }
  0x89   :  { %v7021_v7 = vld [vmem:[#allocation5 + $0x800] sm:$0xf]  ;;  %v7310_v11 = vor.u32 %v9185_v0, %v7309_v63  ;;  %2664 = vmatpush.bf16.msra.mxu2 %v6322_v5  ;;  %2609 = vmatpush.bf16.msrb.mxu0 %v7054_v6  ;;  %v6671_v54 = vld [vmem:[#allocation5 + $0x560] sm:$0xf0] }
  0x8a   :  { %v9113_v8 = vld [vmem:[#allocation5 + $0x81c] sm:$0xf0]  ;;  %v9085_v57 = vld [vmem:[#allocation5 + $0x744] sm:$0xf]  ;;  %v6674_v63 = vor.u32 %v9021_v52, %v6671_v54 }
  0x8b   :  { %v7277_v10 = vld [vmem:[#allocation5 + $0xa00] sm:$0xf]  ;;  %v7022_v23 = vor.u32 %v9113_v8, %v7021_v7  ;;  %2623 = vmatpush.bf16.msrb.mxu1 %v7310_v11  ;;  %2652 = vmatpush.bf16.msrb.mxu3 %v6002_v28  ;;  %v6927_v58 = vld [vmem:[#allocation5 + $0x760] sm:$0xf0] }
  0x8c   :  { %v9177_v13 = vld [vmem:[#allocation5 + $0xa1c] sm:$0xf0]  ;;  %v9149_v59 = vld [vmem:[#allocation5 + $0x944] sm:$0xf]  ;;  %v6930_v0 = vor.u32 %v9085_v57, %v6927_v58 }
  0x8d   :  { %v7278_v27 = vor.u32 %v9177_v13, %v7277_v10  ;;  %2665 = vmatpush.bf16.msra.mxu2 %v6290_v22  ;;  %2610 = vmatpush.bf16.msrb.mxu0 %v7022_v23  ;;  %v7183_v60 = vld [vmem:[#allocation5 + $0x960] sm:$0xf0] }
  0x8e   :  { %2653 = vmatmul.bf16.vlgmr.msrb.gmra.mxu3 %v9889_v56  ;;  %v9213_v1 = vld [vmem:[#allocation5 + $0xb44] sm:$0xf]  ;;  %v7186_v4 = vor.u32 %v9149_v59, %v7183_v60 }
  0x8f   :  { %2624 = vmatpush.bf16.msrb.mxu1 %v7278_v27  ;;  %2701 = vmatpush.bf16.msra.mxu3 %v7250_v37  ;;  %v7439_v2 = vld [vmem:[#allocation5 + $0xb60] sm:$0xf0] }
  0x90   :  { %2611 = vmatmul.bf16.vlgmr.msrb.gmra.mxu0 %v9903_v38  ;;  %v9013_v3 = vld [vmem:[#allocation5 + $0x504] sm:$0xf]  ;;  %v7442_v11 = vor.u32 %v9213_v1, %v7439_v2  ;;  %v6229_v1 = vld [vmem:[#allocation5 + $0x1c8] sm:$0xf] }
  0x91   :  { %2673 = vmatpush.bf16.msra.mxu0 %v6738_v32  ;;  %2666 = vmatpush.bf16.msra.mxu2 %v6258_v42  ;;  %v6639_v5 = vld [vmem:[#allocation5 + $0x520] sm:$0xf0]  ;;  %v8914_v2 = vld [vmem:[#allocation5 + $0x1e4] sm:$0xf0] }
  0x92   :  { %2625 = vmatmul.bf16.vlgmr.msrb.gmra.mxu1 %v9905_v43  ;;  %v9077_v6 = vld [vmem:[#allocation5 + $0x704] sm:$0xf]  ;;  %v6642_v12 = vor.u32 %v9013_v3, %v6639_v5  ;;  %v6741_v3 = vld [vmem:[#allocation5 + $0x5c8] sm:$0xf] }
  0x93   :  { %2687 = vmatpush.bf16.msra.mxu1 %v6994_v33  ;;  %2702 = vmatpush.bf16.msra.mxu3 %v7218_v53  ;;  %v6895_v7 = vld [vmem:[#allocation5 + $0x720] sm:$0xf0]  ;;  %v9042_v5 = vld [vmem:[#allocation5 + $0x5e4] sm:$0xf0] }
  0x94   :  { %2667 = vmatmul.bf16.vlgmr.msra.gmra.mxu2 %v9895_v9  ;;  %v9141_v8 = vld [vmem:[#allocation5 + $0x904] sm:$0xf]  ;;  %v6898_v13 = vor.u32 %v9077_v6, %v6895_v7 }
  0x95   :  { %2715 = vmatpush.bf16.msrb.mxu2 %v7506_v46  ;;  %2674 = vmatpush.bf16.msra.mxu0 %v6706_v47  ;;  %v7151_v10 = vld [vmem:[#allocation5 + $0x920] sm:$0xf0] }
  0x96   :  { %v9205_v14 = vld [vmem:[#allocation5 + $0xb04] sm:$0xf]  ;;  %v7154_v17 = vor.u32 %v9141_v8, %v7151_v10 }
  0x97   :  { %2688 = vmatpush.bf16.msra.mxu1 %v6962_v48  ;;  %v7407_v15 = vld [vmem:[#allocation5 + $0xb20] sm:$0xf0]  ;;  %2703 = vmatpush.bf16.msra.mxu3 %v7186_v4 }
  0x98   :  { %v9005_v16 = vld [vmem:[#allocation5 + $0x4c4] sm:$0xf]  ;;  %v7410_v23 = vor.u32 %v9205_v14, %v7407_v15  ;;  %v6230_v14 = vor.u32 %v8914_v2, %v6229_v1  ;;  %v6997_v15 = vld [vmem:[#allocation5 + $0x7c8] sm:$0xf] }
  0x99   :  { %2716 = vmatpush.bf16.msrb.mxu2 %v7474_v62  ;;  %2675 = vmatpush.bf16.msra.mxu0 %v6674_v63  ;;  %v6607_v18 = vld [vmem:[#allocation5 + $0x4e0] sm:$0xf0]  ;;  %v8882_v1 = vld [vmem:[#allocation5 + $0xe4] sm:$0xf0] }
  0x9a   :  { %v9069_v19 = vld [vmem:[#allocation5 + $0x6c4] sm:$0xf]  ;;  %v6610_v24 = vor.u32 %v9005_v16, %v6607_v18  ;;  %v9106_v16 = vld [vmem:[#allocation5 + $0x7e4] sm:$0xf0] }
  0x9b   :  { %2689 = vmatpush.bf16.msra.mxu1 %v6930_v0  ;;  %v6863_v20 = vld [vmem:[#allocation5 + $0x6e0] sm:$0xf0]  ;;  %2704 = vmatpush.bf16.msra.mxu3 %v7154_v17  ;;  %v6742_v17 = vor.u32 %v9042_v5, %v6741_v3  ;;  %v6613_v2 = vld [vmem:[#allocation5 + $0x4c8] sm:$0xf] }
  0x9c   :  { %v9133_v21 = vld [vmem:[#allocation5 + $0x8c4] sm:$0xf]  ;;  %v6866_v25 = vor.u32 %v9069_v19, %v6863_v20  ;;  %v6485_v19 = vld [vmem:[#allocation5 + $0x3c8] sm:$0xf] }
  0x9d   :  { %v7119_v22 = vld [vmem:[#allocation5 + $0x8e0] sm:$0xf0]  ;;  %2717 = vmatpush.bf16.msrb.mxu2 %v7442_v11  ;;  %2676 = vmatpush.bf16.msra.mxu0 %v6642_v12  ;;  %v8978_v20 = vld [vmem:[#allocation5 + $0x3e4] sm:$0xf0] }
  0x9e   :  { %v9197_v26 = vld [vmem:[#allocation5 + $0xac4] sm:$0xf]  ;;  %v7122_v29 = vor.u32 %v9133_v21, %v7119_v22  ;;  %v6197_v21 = vld [vmem:[#allocation5 + $0x188] sm:$0xf] }
  0x9f   :  { %2690 = vmatpush.bf16.msra.mxu1 %v6898_v13  ;;  %v7375_v27 = vld [vmem:[#allocation5 + $0xae0] sm:$0xf0]  ;;  %v9010_v3 = vld [vmem:[#allocation5 + $0x4e4] sm:$0xf0] }
  0xa0   :  { %v8997_v28 = vld [vmem:[#allocation5 + $0x484] sm:$0xf]  ;;  %v7378_v35 = vor.u32 %v9197_v26, %v7375_v27  ;;  %2705 = vmatpush.bf16.msra.mxu3 %v7122_v29  ;;  %v6998_v26 = vor.u32 %v9106_v16, %v6997_v15  ;;  %v6486_v27 = vor.u32 %v8978_v20, %v6485_v19  ;;  %v9098_v29 = vld [vmem:[#allocation5 + $0x7a4] sm:$0xf0] }
  0xa1   :  { %v6575_v30 = vld [vmem:[#allocation5 + $0x4a0] sm:$0xf0]  ;;  %2718 = vmatpush.bf16.msrb.mxu2 %v7410_v23  ;;  %2677 = vmatpush.bf16.msra.mxu0 %v6610_v24  ;;  %v8906_v23 = vld [vmem:[#allocation5 + $0x1a4] sm:$0xf0] }
  0xa2   :  { %v9061_v31 = vld [vmem:[#allocation5 + $0x684] sm:$0xf]  ;;  %v6578_v36 = vor.u32 %v8997_v28, %v6575_v30  ;;  %v6709_v24 = vld [vmem:[#allocation5 + $0x588] sm:$0xf]  ;;  %v6198_v30 = vor.u32 %v8906_v23, %v6197_v21 }
  0xa3   :  { %v6831_v32 = vld [vmem:[#allocation5 + $0x6a0] sm:$0xf0]  ;;  %2691 = vmatpush.bf16.msra.mxu1 %v6866_v25  ;;  %v9034_v25 = vld [vmem:[#allocation5 + $0x5a4] sm:$0xf0] }
  0xa4   :  { %v9125_v33 = vld [vmem:[#allocation5 + $0x884] sm:$0xf]  ;;  %v6834_v37 = vor.u32 %v9061_v31, %v6831_v32  ;;  %v6965_v28 = vld [vmem:[#allocation5 + $0x788] sm:$0xf]  ;;  %v6710_v31 = vor.u32 %v9034_v25, %v6709_v24 }
  0xa5   :  { %v7087_v34 = vld [vmem:[#allocation5 + $0x8a0] sm:$0xf0]  ;;  %2719 = vmatpush.bf16.msrb.mxu2 %v7378_v35  ;;  %2678 = vmatpush.bf16.msra.mxu0 %v6578_v36  ;;  %v6453_v32 = vld [vmem:[#allocation5 + $0x388] sm:$0xf] }
  0xa6   :  { %v9189_v39 = vld [vmem:[#allocation5 + $0xa84] sm:$0xf]  ;;  %v7090_v42 = vor.u32 %v9125_v33, %v7087_v34  ;;  %v8970_v33 = vld [vmem:[#allocation5 + $0x3a4] sm:$0xf0] }
  0xa7   :  { %v7343_v40 = vld [vmem:[#allocation5 + $0xaa0] sm:$0xf0]  ;;  %2692 = vmatpush.bf16.msra.mxu1 %v6834_v37  ;;  %v6165_v34 = vld [vmem:[#allocation5 + $0x148] sm:$0xf] }
  0xa8   :  { %v8989_v41 = vld [vmem:[#allocation5 + $0x444] sm:$0xf]  ;;  %v7346_v49 = vor.u32 %v9189_v39, %v7343_v40  ;;  %2706 = vmatpush.bf16.msra.mxu3 %v7090_v42  ;;  %v8898_v35 = vld [vmem:[#allocation5 + $0x164] sm:$0xf0]  ;;  %v6966_v39 = vor.u32 %v9098_v29, %v6965_v28  ;;  %v6454_v40 = vor.u32 %v8970_v33, %v6453_v32 }
  0xa9   :  { %v6543_v44 = vld [vmem:[#allocation5 + $0x460] sm:$0xf0]  ;;  %v6677_v36 = vld [vmem:[#allocation5 + $0x548] sm:$0xf] }
  0xaa   :  { %v9053_v45 = vld [vmem:[#allocation5 + $0x644] sm:$0xf]  ;;  %v6546_v53 = vor.u32 %v8989_v41, %v6543_v44  ;;  %2720 = vmatpush.bf16.msrb.mxu2 %v7346_v49  ;;  %v9026_v37 = vld [vmem:[#allocation5 + $0x564] sm:$0xf0] }
  0xab   :  { %v6799_v46 = vld [vmem:[#allocation5 + $0x660] sm:$0xf0]  ;;  %v6421_v41 = vld [vmem:[#allocation5 + $0x348] sm:$0xf] }
  0xac   :  { %v9117_v47 = vld [vmem:[#allocation5 + $0x844] sm:$0xf]  ;;  %v6802_v54 = vor.u32 %v9053_v45, %v6799_v46  ;;  %2679 = vmatpush.bf16.msra.mxu0 %v6546_v53  ;;  %v6933_v42 = vld [vmem:[#allocation5 + $0x748] sm:$0xf]  ;;  %v6166_v45 = vor.u32 %v8898_v35, %v6165_v34  ;;  %v6678_v46 = vor.u32 %v9026_v37, %v6677_v36 }
  0xad   :  { %v7055_v48 = vld [vmem:[#allocation5 + $0x860] sm:$0xf0]  ;;  %v9090_v44 = vld [vmem:[#allocation5 + $0x764] sm:$0xf0] }
  0xae   :  { %v9181_v50 = vld [vmem:[#allocation5 + $0xa44] sm:$0xf]  ;;  %v7058_v60 = vor.u32 %v9117_v47, %v7055_v48  ;;  %2693 = vmatpush.bf16.msra.mxu1 %v6802_v54  ;;  %v8962_v47 = vld [vmem:[#allocation5 + $0x364] sm:$0xf0]  ;;  %v6934_v53 = vor.u32 %v9090_v44, %v6933_v42 }
  0xaf   :  { %v7311_v52 = vld [vmem:[#allocation5 + $0xa60] sm:$0xf0]  ;;  %v6133_v48 = vld [vmem:[#allocation5 + $0x108] sm:$0xf]  ;;  %v6422_v54 = vor.u32 %v8962_v47, %v6421_v41 }
  0xb0   :  { %v8981_v57 = vld [vmem:[#allocation5 + $0x404] sm:$0xf]  ;;  %v7314_v4 = vor.u32 %v9181_v50, %v7311_v52  ;;  %2707 = vmatpush.bf16.msra.mxu3 %v7058_v60  ;;  %v8890_v49 = vld [vmem:[#allocation5 + $0x124] sm:$0xf0] }
  0xb1   :  { %v6511_v58 = vld [vmem:[#allocation5 + $0x420] sm:$0xf0]  ;;  %v6645_v50 = vld [vmem:[#allocation5 + $0x508] sm:$0xf] }
  0xb2   :  { %v9045_v59 = vld [vmem:[#allocation5 + $0x604] sm:$0xf]  ;;  %v6514_v8 = vor.u32 %v8981_v57, %v6511_v58  ;;  %2721 = vmatpush.bf16.msrb.mxu2 %v7314_v4  ;;  %v9018_v52 = vld [vmem:[#allocation5 + $0x524] sm:$0xf0] }
  0xb3   :  { %v6767_v62 = vld [vmem:[#allocation5 + $0x620] sm:$0xf0]  ;;  %v6901_v57 = vld [vmem:[#allocation5 + $0x708] sm:$0xf]  ;;  %v6646_v60 = vor.u32 %v9018_v52, %v6645_v50 }
  0xb4   :  { %v9109_v63 = vld [vmem:[#allocation5 + $0x804] sm:$0xf]  ;;  %v6770_v10 = vor.u32 %v9045_v59, %v6767_v62  ;;  %2680 = vmatpush.bf16.msra.mxu0 %v6514_v8  ;;  %v9082_v58 = vld [vmem:[#allocation5 + $0x724] sm:$0xf0]  ;;  %v6134_v59 = vor.u32 %v8890_v49, %v6133_v48 }
  0xb5   :  { %v7023_v0 = vld [vmem:[#allocation5 + $0x820] sm:$0xf0]  ;;  %v6389_v62 = vld [vmem:[#allocation5 + $0x308] sm:$0xf]  ;;  %v6902_v4 = vor.u32 %v9082_v58, %v6901_v57 }
  0xb6   :  { %v9237_v6 = vld [vmem:[#allocation5 + $0xc04] sm:$0xf]  ;;  %v7026_v13 = vor.u32 %v9109_v63, %v7023_v0  ;;  %2694 = vmatpush.bf16.msra.mxu1 %v6770_v10  ;;  %v8954_v63 = vld [vmem:[#allocation5 + $0x324] sm:$0xf0]  ;;  %v6614_v10 = vor.u32 %v9010_v3, %v6613_v2  ;;  %v6487_v3 = vld [vmem:[#allocation5 + $0x3e8] sm:$0xf0] }
  0xb7   :  { %v7535_v7 = vld [vmem:[#allocation5 + $0xc20] sm:$0xf0]  ;;  %2681 = vmatmul.bf16.vlgmr.msra.gmra.mxu0 %v9887_v55  ;;  %v6101_v0 = vld [vmem:[#allocation5 + $0xc8] sm:$0xf]  ;;  %v6390_v5 = vor.u32 %v8954_v63, %v6389_v62  ;;  %v8910_v63 = vld [vmem:[#allocation5 + $0x1cc] sm:$0xf] }
  0xb8   :  { %v9173_v11 = vld [vmem:[#allocation5 + $0xa04] sm:$0xf]  ;;  %v7538_v18 = vor.u32 %v9237_v6, %v7535_v7  ;;  %2708 = vmatpush.bf16.msra.mxu3 %v7026_v13  ;;  %2771 = vmatpush.bf16.msrb.mxu0 %v6742_v17  ;;  %v6869_v6 = vld [vmem:[#allocation5 + $0x6c8] sm:$0xf]  ;;  %v6102_v8 = vor.u32 %v8882_v1, %v6101_v0  ;;  %v6231_v0 = vld [vmem:[#allocation5 + $0x1e8] sm:$0xf0] }
  0xb9   :  { %v7279_v12 = vld [vmem:[#allocation5 + $0xa20] sm:$0xf0]  ;;  %2695 = vmatmul.bf16.vlgmr.msra.gmra.mxu1 %v9891_v61  ;;  %v9074_v7 = vld [vmem:[#allocation5 + $0x6e4] sm:$0xf0]  ;;  %v8974_v1 = vld [vmem:[#allocation5 + $0x3cc] sm:$0xf] }
  0xba   :  { %v7282_v22 = vor.u32 %v9173_v11, %v7279_v12  ;;  %2743 = vmatpush.bf16.msrb.mxu1 %v6230_v14  ;;  %v6357_v11 = vld [vmem:[#allocation5 + $0x2c8] sm:$0xf]  ;;  %v6870_v17 = vor.u32 %v9074_v7, %v6869_v6 }
  0xbb   :  { %2709 = vmatmul.bf16.vlgmr.msra.gmra.mxu3 %v9903_v38  ;;  %v8946_v12 = vld [vmem:[#allocation5 + $0x2e4] sm:$0xf0] }
  0xbc   :  { %2736 = vmatpush.bf16.msrb.mxu3 %v7538_v18  ;;  %2722 = vmatpush.bf16.msrb.mxu2 %v7282_v22  ;;  %v6069_v13 = vld [vmem:[#allocation5 + $0x88] sm:$0xf]  ;;  %v6358_v18 = vor.u32 %v8946_v12, %v6357_v11  ;;  %v6490_v12 = vor.u32 %v8974_v1, %v6487_v3 }
  0xbd   :  { %2772 = vmatpush.bf16.msrb.mxu0 %v6710_v31  ;;  %v8874_v14 = vld [vmem:[#allocation5 + $0xa4] sm:$0xf0] }
  0xbe   :  { %2744 = vmatpush.bf16.msrb.mxu1 %v6198_v30  ;;  %v6581_v15 = vld [vmem:[#allocation5 + $0x488] sm:$0xf]  ;;  %v6070_v21 = vor.u32 %v8874_v14, %v6069_v13  ;;  %v8902_v14 = vld [vmem:[#allocation5 + $0x18c] sm:$0xf] }
  0xbf   :  { %2723 = vmatmul.bf16.vlgmr.msrb.gmra.mxu2 %v9905_v43  ;;  %v9002_v16 = vld [vmem:[#allocation5 + $0x4a4] sm:$0xf0] }
  0xc0   :  { %2785 = vmatpush.bf16.msra.mxu2 %v6998_v26  ;;  %2757 = vmatpush.bf16.msra.mxu3 %v6486_v27  ;;  %v6837_v19 = vld [vmem:[#allocation5 + $0x688] sm:$0xf]  ;;  %v6582_v22 = vor.u32 %v9002_v16, %v6581_v15  ;;  %v6199_v15 = vld [vmem:[#allocation5 + $0x1a8] sm:$0xf0] }
  0xc1   :  { %2773 = vmatpush.bf16.msrb.mxu0 %v6678_v46  ;;  %v9066_v20 = vld [vmem:[#allocation5 + $0x6a4] sm:$0xf0]  ;;  %v8966_v16 = vld [vmem:[#allocation5 + $0x38c] sm:$0xf] }
  0xc2   :  { %2745 = vmatpush.bf16.msrb.mxu1 %v6166_v45  ;;  %v6325_v23 = vld [vmem:[#allocation5 + $0x288] sm:$0xf]  ;;  %v6838_v29 = vor.u32 %v9066_v20, %v6837_v19 }
  0xc3   :  { %v8938_v24 = vld [vmem:[#allocation5 + $0x2a4] sm:$0xf0] }
  0xc4   :  { %2786 = vmatpush.bf16.msra.mxu2 %v6966_v39  ;;  %2758 = vmatpush.bf16.msra.mxu3 %v6454_v40  ;;  %v6037_v25 = vld [vmem:[#allocation5 + $0x48] sm:$0xf]  ;;  %v6326_v30 = vor.u32 %v8938_v24, %v6325_v23 }
  0xc5   :  { %2774 = vmatpush.bf16.msrb.mxu0 %v6646_v60  ;;  %v8866_v26 = vld [vmem:[#allocation5 + $0x64] sm:$0xf0] }
  0xc6   :  { %2746 = vmatpush.bf16.msrb.mxu1 %v6134_v59  ;;  %v6549_v27 = vld [vmem:[#allocation5 + $0x448] sm:$0xf]  ;;  %v6038_v34 = vor.u32 %v8866_v26, %v6037_v25  ;;  %v8894_v26 = vld [vmem:[#allocation5 + $0x14c] sm:$0xf] }
  0xc7   :  { %v8994_v28 = vld [vmem:[#allocation5 + $0x464] sm:$0xf0] }
  0xc8   :  { %2787 = vmatpush.bf16.msra.mxu2 %v6934_v53  ;;  %2759 = vmatpush.bf16.msra.mxu3 %v6422_v54  ;;  %v6293_v31 = vld [vmem:[#allocation5 + $0x248] sm:$0xf]  ;;  %v6550_v35 = vor.u32 %v8994_v28, %v6549_v27  ;;  %v6167_v27 = vld [vmem:[#allocation5 + $0x168] sm:$0xf0] }
  0xc9   :  { %2775 = vmatpush.bf16.msrb.mxu0 %v6614_v10  ;;  %v6805_v32 = vld [vmem:[#allocation5 + $0x648] sm:$0xf]  ;;  %v8958_v28 = vld [vmem:[#allocation5 + $0x34c] sm:$0xf] }
  0xca   :  { %2747 = vmatpush.bf16.msrb.mxu1 %v6102_v8  ;;  %v9058_v33 = vld [vmem:[#allocation5 + $0x664] sm:$0xf0]  ;;  %v6234_v8 = vor.u32 %v8910_v63, %v6231_v0 }
  0xcb   :  { %7564 = vmatmul.msk.bf16.vlgmr.msrb.gmra.mxu3 %vm2543_vm0, %v9899_v51  ;;  %v8930_v36 = vld [vmem:[#allocation5 + $0x264] sm:$0xf0]  ;;  %v6806_v44 = vor.u32 %v9058_v33, %v6805_v32  ;;  %v6170_v33 = vor.u32 %v8894_v26, %v6167_v27 }
  0xcc   :  { %2788 = vmatpush.bf16.msra.mxu2 %v6902_v4  ;;  %2760 = vmatpush.bf16.msra.mxu3 %v6390_v5  ;;  %v6005_v37 = vld [vmem:[#allocation5 + $0x8] sm:$0xf]  ;;  %v6294_v48 = vor.u32 %v8930_v36, %v6293_v31 }
  0xcd   :  { %2776 = vmatpush.bf16.msrb.mxu0 %v6582_v22  ;;  %v8858_v39 = vld [vmem:[#allocation5 + $0x24] sm:$0xf0] }
  0xce   :  { %2748 = vmatpush.bf16.msrb.mxu1 %v6070_v21  ;;  %v6517_v40 = vld [vmem:[#allocation5 + $0x408] sm:$0xf]  ;;  %v6006_v53 = vor.u32 %v8858_v39, %v6005_v37  ;;  %v6202_v21 = vor.u32 %v8902_v14, %v6199_v15  ;;  %v8886_v39 = vld [vmem:[#allocation5 + $0x10c] sm:$0xf] }
  0xcf   :  { %v8986_v41 = vld [vmem:[#allocation5 + $0x424] sm:$0xf0] }
  0xd0   :  { %2789 = vmatpush.bf16.msra.mxu2 %v6870_v17  ;;  %2761 = vmatpush.bf16.msra.mxu3 %v6358_v18  ;;  %v7253_v42 = vld [vmem:[#allocation5 + $0x9c8] sm:$0xf]  ;;  %v6518_v54 = vor.u32 %v8986_v41, %v6517_v40  ;;  %v6455_v17 = vld [vmem:[#allocation5 + $0x3a8] sm:$0xf0] }
  0xd1   :  { %v9170_v45 = vld [vmem:[#allocation5 + $0x9e4] sm:$0xf0]  ;;  %2777 = vmatpush.bf16.msrb.mxu0 %v6550_v35  ;;  %v6458_v24 = vor.u32 %v8966_v16, %v6455_v17  ;;  %v6135_v40 = vld [vmem:[#allocation5 + $0x128] sm:$0xf0] }
  0xd2   :  { %v7541_v46 = vld [vmem:[#allocation5 + $0xc08] sm:$0xf]  ;;  %2749 = vmatpush.bf16.msrb.mxu1 %v6038_v34  ;;  %v7254_v60 = vor.u32 %v9170_v45, %v7253_v42  ;;  %v8950_v41 = vld [vmem:[#allocation5 + $0x30c] sm:$0xf] }
  0xd3   :  { %v9242_v47 = vld [vmem:[#allocation5 + $0xc24] sm:$0xf0]  ;;  %v6391_v42 = vld [vmem:[#allocation5 + $0x328] sm:$0xf0] }
  0xd4   :  { %2790 = vmatpush.bf16.msra.mxu2 %v6838_v29  ;;  %2762 = vmatpush.bf16.msra.mxu3 %v6326_v30  ;;  %v6261_v49 = vld [vmem:[#allocation5 + $0x208] sm:$0xf]  ;;  %v7542_v62 = vor.u32 %v9242_v47, %v7541_v46  ;;  %v6423_v29 = vld [vmem:[#allocation5 + $0x368] sm:$0xf0]  ;;  %v6138_v47 = vor.u32 %v8886_v39, %v6135_v40 }
  0xd5   :  { %v6773_v50 = vld [vmem:[#allocation5 + $0x608] sm:$0xf]  ;;  %2778 = vmatpush.bf16.msrb.mxu0 %v6518_v54  ;;  %v6426_v36 = vor.u32 %v8958_v28, %v6423_v29  ;;  %v6103_v54 = vld [vmem:[#allocation5 + $0xe8] sm:$0xf0] }
  0xd6   :  { %v9050_v52 = vld [vmem:[#allocation5 + $0x624] sm:$0xf0]  ;;  %2750 = vmatpush.bf16.msrb.mxu1 %v6006_v53  ;;  %v8878_v53 = vld [vmem:[#allocation5 + $0xcc] sm:$0xf] }
  0xd7   :  { %v8922_v57 = vld [vmem:[#allocation5 + $0x224] sm:$0xf0]  ;;  %v6774_v2 = vor.u32 %v9050_v52, %v6773_v50  ;;  %v6394_v50 = vor.u32 %v8950_v41, %v6391_v42  ;;  %v6106_v63 = vor.u32 %v8878_v53, %v6103_v54  ;;  %v8862_v17 = vld [vmem:[#allocation5 + $0x4c] sm:$0xf] }
  0xd8   :  { %v7509_v58 = vld [vmem:[#allocation5 + $0xbc8] sm:$0xf]  ;;  %2791 = vmatpush.bf16.msra.mxu2 %v6806_v44  ;;  %2763 = vmatpush.bf16.msra.mxu3 %v6294_v48  ;;  %v6262_v6 = vor.u32 %v8922_v57, %v6261_v49  ;;  %v8942_v57 = vld [vmem:[#allocation5 + $0x2cc] sm:$0xf] }
  0xd9   :  { %v9234_v59 = vld [vmem:[#allocation5 + $0xbe4] sm:$0xf0]  ;;  %2834 = vmatpush.bf16.msra.mxu0 %v7542_v62  ;;  %2751 = vmatmul.bf16.vlgmr.msrb.gmra.mxu1 %v9889_v56  ;;  %v9166_v39 = vld [vmem:[#allocation5 + $0x9cc] sm:$0xf] }
  0xda   :  { %v7221_v4 = vld [vmem:[#allocation5 + $0x988] sm:$0xf]  ;;  %v7510_v7 = vor.u32 %v9234_v59, %v7509_v58  ;;  %2799 = vmatpush.bf16.msra.mxu1 %v7254_v60  ;;  %2779 = vmatmul.bf16.vlgmr.msrb.gmra.mxu0 %v9887_v55  ;;  %v6359_v58 = vld [vmem:[#allocation5 + $0x2e8] sm:$0xf0] }
  0xdb   :  { %v9162_v5 = vld [vmem:[#allocation5 + $0x9a4] sm:$0xf0]  ;;  %v7255_v40 = vld [vmem:[#allocation5 + $0x9e8] sm:$0xf0] }
  0xdc   :  { %v7477_v10 = vld [vmem:[#allocation5 + $0xb88] sm:$0xf]  ;;  %v7222_v13 = vor.u32 %v9162_v5, %v7221_v4  ;;  %2792 = vmatpush.bf16.msra.mxu2 %v6774_v2  ;;  %2764 = vmatpush.bf16.msra.mxu3 %v6262_v6  ;;  %v6362_v2 = vor.u32 %v8942_v57, %v6359_v58  ;;  %v8870_v4 = vld [vmem:[#allocation5 + $0x8c] sm:$0xf] }
  0xdd   :  { %v9226_v11 = vld [vmem:[#allocation5 + $0xba4] sm:$0xf0]  ;;  %2855 = vmatpush.bf16.msrb.mxu0 %v6490_v12  ;;  %v6071_v5 = vld [vmem:[#allocation5 + $0xa8] sm:$0xf0] }
  0xde   :  { %v7189_v18 = vld [vmem:[#allocation5 + $0x948] sm:$0xf]  ;;  %v7478_v20 = vor.u32 %v9226_v11, %v7477_v10  ;;  %2800 = vmatpush.bf16.msra.mxu1 %v7222_v13  ;;  %v8934_v6 = vld [vmem:[#allocation5 + $0x28c] sm:$0xf]  ;;  %v6074_v12 = vor.u32 %v8870_v4, %v6071_v5 }
  0xdf   :  { %v9154_v19 = vld [vmem:[#allocation5 + $0x964] sm:$0xf0]  ;;  %2765 = vmatmul.bf16.vlgmr.msra.gmra.mxu3 %v9895_v9  ;;  %2793 = vmatmul.bf16.vlgmr.msra.gmra.mxu2 %v9891_v61  ;;  %v9230_v41 = vld [vmem:[#allocation5 + $0xbcc] sm:$0xf] }
  0xe0   :  { %2813 = vmatpush.bf16.msrb.mxu3 %v7510_v7  ;;  %2841 = vmatpush.bf16.msrb.mxu2 %v6234_v8  ;;  %v7445_v22 = vld [vmem:[#allocation5 + $0xb48] sm:$0xf]  ;;  %v7190_v25 = vor.u32 %v9154_v19, %v7189_v18  ;;  %v6327_v7 = vld [vmem:[#allocation5 + $0x2a8] sm:$0xf0] }
  0xe1   :  { %v9218_v23 = vld [vmem:[#allocation5 + $0xb64] sm:$0xf0]  ;;  %2856 = vmatpush.bf16.msrb.mxu0 %v6458_v24  ;;  %v6330_v15 = vor.u32 %v8934_v6, %v6327_v7  ;;  %v6039_v18 = vld [vmem:[#allocation5 + $0x68] sm:$0xf0] }
  0xe2   :  { %v7157_v30 = vld [vmem:[#allocation5 + $0x908] sm:$0xf]  ;;  %v7446_v32 = vor.u32 %v9218_v23, %v7445_v22  ;;  %2801 = vmatpush.bf16.msra.mxu1 %v7190_v25  ;;  %v8926_v19 = vld [vmem:[#allocation5 + $0x24c] sm:$0xf]  ;;  %v6042_v26 = vor.u32 %v8862_v17, %v6039_v18 }
  0xe3   :  { %v9146_v31 = vld [vmem:[#allocation5 + $0x924] sm:$0xf0]  ;;  %v9038_v23 = vld [vmem:[#allocation5 + $0x5cc] sm:$0xf] }
  0xe4   :  { %2814 = vmatpush.bf16.msrb.mxu3 %v7478_v20  ;;  %2842 = vmatpush.bf16.msrb.mxu2 %v6202_v21  ;;  %v7413_v34 = vld [vmem:[#allocation5 + $0xb08] sm:$0xf]  ;;  %v7158_v37 = vor.u32 %v9146_v31, %v7157_v30  ;;  %v6295_v20 = vld [vmem:[#allocation5 + $0x268] sm:$0xf0] }
  0xe5   :  { %v9210_v35 = vld [vmem:[#allocation5 + $0xb24] sm:$0xf0]  ;;  %2857 = vmatpush.bf16.msrb.mxu0 %v6426_v36  ;;  %v6743_v24 = vld [vmem:[#allocation5 + $0x5e8] sm:$0xf0]  ;;  %v6298_v29 = vor.u32 %v8926_v19, %v6295_v20 }
  0xe6   :  { %v7125_v44 = vld [vmem:[#allocation5 + $0x8c8] sm:$0xf]  ;;  %v7414_v46 = vor.u32 %v9210_v35, %v7413_v34  ;;  %2802 = vmatpush.bf16.msra.mxu1 %v7158_v37  ;;  %v8854_v31 = vld [vmem:[#allocation5 + $0xc] sm:$0xf]  ;;  %v6746_v34 = vor.u32 %v9038_v23, %v6743_v24 }
  0xe7   :  { %v9138_v45 = vld [vmem:[#allocation5 + $0x8e4] sm:$0xf0]  ;;  %v6263_v35 = vld [vmem:[#allocation5 + $0x228] sm:$0xf0] }
  0xe8   :  { %2815 = vmatpush.bf16.msrb.mxu3 %v7446_v32  ;;  %2843 = vmatpush.bf16.msrb.mxu2 %v6170_v33  ;;  %v7381_v48 = vld [vmem:[#allocation5 + $0xac8] sm:$0xf]  ;;  %v7126_v52 = vor.u32 %v9138_v45, %v7125_v44  ;;  %v6007_v32 = vld [vmem:[#allocation5 + $0x28] sm:$0xf0] }
  0xe9   :  { %v9202_v49 = vld [vmem:[#allocation5 + $0xae4] sm:$0xf0]  ;;  %2858 = vmatpush.bf16.msrb.mxu0 %v6394_v50  ;;  %v8918_v33 = vld [vmem:[#allocation5 + $0x20c] sm:$0xf]  ;;  %v7258_v50 = vor.u32 %v9166_v39, %v7255_v40 }
  0xea   :  { %v7093_v59 = vld [vmem:[#allocation5 + $0x888] sm:$0xf]  ;;  %v7382_v62 = vor.u32 %v9202_v49, %v7381_v48  ;;  %2803 = vmatpush.bf16.msra.mxu1 %v7126_v52  ;;  %7565 = vmatmul.msk.bf16.vlgmr.msra.gmra.mxu0 %vm2543_vm0, %v9899_v51  ;;  %v9102_v36 = vld [vmem:[#allocation5 + $0x7cc] sm:$0xf]  ;;  %v6266_v48 = vor.u32 %v8918_v33, %v6263_v35 }
  0xeb   :  { %v9130_v60 = vld [vmem:[#allocation5 + $0x8a4] sm:$0xf0]  ;;  %v6999_v37 = vld [vmem:[#allocation5 + $0x7e8] sm:$0xf0] }
  0xec   :  { %2816 = vmatpush.bf16.msrb.mxu3 %v7414_v46  ;;  %2844 = vmatpush.bf16.msrb.mxu2 %v6138_v47  ;;  %v7349_v0 = vld [vmem:[#allocation5 + $0xa88] sm:$0xf]  ;;  %v7094_v3 = vor.u32 %v9130_v60, %v7093_v59  ;;  %v7511_v44 = vld [vmem:[#allocation5 + $0xbe8] sm:$0xf0]  ;;  %v6010_v47 = vor.u32 %v8854_v31, %v6007_v32  ;;  %v7002_v49 = vor.u32 %v9102_v36, %v6999_v37 }
  0xed   :  { %v9194_v1 = vld [vmem:[#allocation5 + $0xaa4] sm:$0xf0]  ;;  %2859 = vmatpush.bf16.msrb.mxu0 %v6362_v2  ;;  %v9030_v45 = vld [vmem:[#allocation5 + $0x58c] sm:$0xf]  ;;  %v7514_v54 = vor.u32 %v9230_v41, %v7511_v44 }
  0xee   :  { %v7061_v8 = vld [vmem:[#allocation5 + $0x848] sm:$0xf]  ;;  %v7350_v11 = vor.u32 %v9194_v1, %v7349_v0  ;;  %2804 = vmatpush.bf16.msra.mxu1 %v7094_v3  ;;  %v6711_v46 = vld [vmem:[#allocation5 + $0x5a8] sm:$0xf0]  ;;  %v9924_v1 = vld [vmem:[#allocation7] sm:$0xff] }
  0xef   :  { %v9122_v10 = vld [vmem:[#allocation5 + $0x864] sm:$0xf0]  ;;  %v9094_v52 = vld [vmem:[#allocation5 + $0x78c] sm:$0xf]  ;;  %v6714_v57 = vor.u32 %v9030_v45, %v6711_v46 }
  0xf0   :  { %2817 = vmatpush.bf16.msrb.mxu3 %v7382_v62  ;;  %2845 = vmatpush.bf16.msrb.mxu2 %v6106_v63  ;;  %v7317_v13 = vld [vmem:[#allocation5 + $0xa48] sm:$0xf]  ;;  %v7062_v16 = vor.u32 %v9122_v10, %v7061_v8  ;;  %v6967_v53 = vld [vmem:[#allocation5 + $0x7a8] sm:$0xf0] }
  0xf1   :  { %v9186_v14 = vld [vmem:[#allocation5 + $0xa64] sm:$0xf0]  ;;  %2860 = vmatpush.bf16.msrb.mxu0 %v6330_v15  ;;  %v9158_v58 = vld [vmem:[#allocation5 + $0x98c] sm:$0xf]  ;;  %v6970_v2 = vor.u32 %v9094_v52, %v6967_v53  ;;  %v10324_v15 = vperm.slane %v9924_v1, 0 }
  0xf2   :  { %v7029_v21 = vld [vmem:[#allocation5 + $0x808] sm:$0xf]  ;;  %v7318_v25 = vor.u32 %v9186_v14, %v7317_v13  ;;  %2805 = vmatpush.bf16.msra.mxu1 %v7062_v16  ;;  %v7223_v59 = vld [vmem:[#allocation5 + $0x9a8] sm:$0xf0]  ;;  %v2584_v46 = vpop.f32.mrf.mxu2 }
  0xf3   :  { %v9114_v22 = vld [vmem:[#allocation5 + $0x824] sm:$0xf0]  ;;  %v9222_v60 = vld [vmem:[#allocation5 + $0xb8c] sm:$0xf]  ;;  %v7226_v3 = vor.u32 %v9158_v58, %v7223_v59 }
  0xf4   :  { %2818 = vmatpush.bf16.msrb.mxu3 %v7350_v11  ;;  %2846 = vmatpush.bf16.msrb.mxu2 %v6074_v12  ;;  %v7285_v27 = vld [vmem:[#allocation5 + $0xa08] sm:$0xf]  ;;  %v7030_v30 = vor.u32 %v9114_v22, %v7029_v21  ;;  %v7479_v62 = vld [vmem:[#allocation5 + $0xba8] sm:$0xf0]  ;;  %v2556_v22 = vpop.f32.mrf.mxu0 }
  0xf5   :  { %v9178_v28 = vld [vmem:[#allocation5 + $0xa24] sm:$0xf0]  ;;  %2861 = vmatpush.bf16.msrb.mxu0 %v6298_v29  ;;  %v9022_v63 = vld [vmem:[#allocation5 + $0x54c] sm:$0xf]  ;;  %v7482_v7 = vor.u32 %v9222_v60, %v7479_v62  ;;  %v2598_v53 = vpop.f32.mrf.mxu3 }
  0xf6   :  { %v7286_v42 = vor.u32 %v9178_v28, %v7285_v27  ;;  %2806 = vmatpush.bf16.msra.mxu1 %v7030_v30  ;;  %v6679_v0 = vld [vmem:[#allocation5 + $0x568] sm:$0xf0] }
  0xf7   :  { %v9086_v4 = vld [vmem:[#allocation5 + $0x74c] sm:$0xf]  ;;  %v6682_v8 = vor.u32 %v9022_v63, %v6679_v0 }
  0xf8   :  { %2819 = vmatpush.bf16.msrb.mxu3 %v7318_v25  ;;  %2847 = vmatpush.bf16.msrb.mxu2 %v6042_v26  ;;  %v6935_v5 = vld [vmem:[#allocation5 + $0x768] sm:$0xf0]  ;;  %v2557_v26 = vadd.f32 %v2556_v22, %v10324_v15  ;;  %v9096_v15 = vld [vmem:[#allocation5 + $0x79c] sm:$0xf] }
  0xf9   :  { %2807 = vmatmul.bf16.vlgmr.msra.gmra.mxu1 %v9903_v38  ;;  %2862 = vmatpush.bf16.msrb.mxu0 %v6266_v48  ;;  %v9150_v6 = vld [vmem:[#allocation5 + $0x94c] sm:$0xf]  ;;  %v6938_v16 = vor.u32 %v9086_v4, %v6935_v5 }
  0xfa   :  { %2869 = vmatpush.bf16.msrb.mxu1 %v6746_v34  ;;  %v7191_v10 = vld [vmem:[#allocation5 + $0x968] sm:$0xf0]  ;;  %v2570_v34 = vpop.f32.mrf.mxu1 }
  0xfb   :  { %v9214_v11 = vld [vmem:[#allocation5 + $0xb4c] sm:$0xf]  ;;  %v7194_v17 = vor.u32 %v9150_v6, %v7191_v10  ;;  %v2571_v41 = vadd.f32 %v2570_v34, %v2557_v26  ;;  %v8979_v34 = vld [vmem:[#allocation5 + $0x3ec] sm:$0xf0] }
  0xfc   :  { %2820 = vmatpush.bf16.msrb.mxu3 %v7286_v42  ;;  %2848 = vmatpush.bf16.msrb.mxu2 %v6010_v47  ;;  %v7447_v12 = vld [vmem:[#allocation5 + $0xb68] sm:$0xf0] }
  0xfd   :  { %2911 = vmatpush.bf16.msra.mxu0 %v7514_v54  ;;  %v9014_v13 = vld [vmem:[#allocation5 + $0x50c] sm:$0xf]  ;;  %v7450_v20 = vor.u32 %v9214_v11, %v7447_v12  ;;  %v2585_v47 = vadd.f32 %v2584_v46, %v2571_v41 }
  0xfe   :  { %2870 = vmatpush.bf16.msrb.mxu1 %v6714_v57  ;;  %v6647_v14 = vld [vmem:[#allocation5 + $0x528] sm:$0xf0]  ;;  %2863 = vmatmul.bf16.vlgmr.msrb.gmra.mxu0 %v9895_v9 }
  0xff   :  { %2821 = vmatmul.bf16.vlgmr.msrb.gmra.mxu3 %v9905_v43  ;;  %2849 = vmatmul.bf16.vlgmr.msrb.gmra.mxu2 %v9889_v56  ;;  %v9078_v18 = vld [vmem:[#allocation5 + $0x70c] sm:$0xf]  ;;  %v6650_v21 = vor.u32 %v9014_v13, %v6647_v14  ;;  %v9932_v62 = vadd.f32 %v2598_v53, %v2585_v47  ;;  %v6205_v47 = vld [vmem:[#allocation5 + $0x190] sm:$0xf] }
 0x100   :  { %2883 = vmatpush.bf16.msra.mxu3 %v7002_v49  ;;  %2897 = vmatpush.bf16.msra.mxu2 %v7258_v50  ;;  %v6903_v19 = vld [vmem:[#allocation5 + $0x728] sm:$0xf0]  ;;  %v6461_v53 = vld [vmem:[#allocation5 + $0x390] sm:$0xf] }
 0x101   :  { %2912 = vmatpush.bf16.msra.mxu0 %v7482_v7  ;;  %v9142_v23 = vld [vmem:[#allocation5 + $0x90c] sm:$0xf]  ;;  %v6906_v30 = vor.u32 %v9078_v18, %v6903_v19 }
 0x102   :  { %2871 = vmatpush.bf16.msrb.mxu1 %v6682_v8  ;;  %v7159_v24 = vld [vmem:[#allocation5 + $0x928] sm:$0xf0] }
 0x103   :  { %v9206_v25 = vld [vmem:[#allocation5 + $0xb0c] sm:$0xf]  ;;  %v7162_v31 = vor.u32 %v9142_v23, %v7159_v24 }
 0x104   :  { %2884 = vmatpush.bf16.msra.mxu3 %v6970_v2  ;;  %2898 = vmatpush.bf16.msra.mxu2 %v7226_v3  ;;  %v7415_v27 = vld [vmem:[#allocation5 + $0xb28] sm:$0xf0] }
 0x105   :  { %v9006_v28 = vld [vmem:[#allocation5 + $0x4cc] sm:$0xf]  ;;  %2913 = vmatpush.bf16.msra.mxu0 %v7450_v20  ;;  %v7418_v35 = vor.u32 %v9206_v25, %v7415_v27 }
 0x106   :  { %v6615_v29 = vld [vmem:[#allocation5 + $0x4e8] sm:$0xf0]  ;;  %2872 = vmatpush.bf16.msrb.mxu1 %v6650_v21 }
 0x107   :  { %v9070_v32 = vld [vmem:[#allocation5 + $0x6cc] sm:$0xf]  ;;  %v6618_v36 = vor.u32 %v9006_v28, %v6615_v29 }
 0x108   :  { %2885 = vmatpush.bf16.msra.mxu3 %v6938_v16  ;;  %2899 = vmatpush.bf16.msra.mxu2 %v7194_v17  ;;  %v6871_v33 = vld [vmem:[#allocation5 + $0x6e8] sm:$0xf0]  ;;  %v9934_v17 = vpop.f32.mrf.mxu2 }
 0x109   :  { %v9134_v37 = vld [vmem:[#allocation5 + $0x8cc] sm:$0xf]  ;;  %v6874_v48 = vor.u32 %v9070_v32, %v6871_v33  ;;  %2914 = vmatpush.bf16.msra.mxu0 %v7418_v35  ;;  %v8915_v32 = vld [vmem:[#allocation5 + $0x1ec] sm:$0xf0] }
 0x10a   :  { %v7127_v39 = vld [vmem:[#allocation5 + $0x8e8] sm:$0xf0]  ;;  %2873 = vmatpush.bf16.msrb.mxu1 %v6618_v36  ;;  %v6493_v33 = vld [vmem:[#allocation5 + $0x3d0] sm:$0xf] }
 0x10b   :  { %v9198_v40 = vld [vmem:[#allocation5 + $0xacc] sm:$0xf]  ;;  %v7130_v49 = vor.u32 %v9134_v37, %v7127_v39  ;;  %v6749_v35 = vld [vmem:[#allocation5 + $0x5d0] sm:$0xf]  ;;  %v6494_v46 = vor.u32 %v8979_v34, %v6493_v33 }
 0x10c   :  { %v7383_v42 = vld [vmem:[#allocation5 + $0xae8] sm:$0xf0]  ;;  %2886 = vmatpush.bf16.msra.mxu3 %v6906_v30  ;;  %2900 = vmatpush.bf16.msra.mxu2 %v7162_v31  ;;  %v6237_v31 = vld [vmem:[#allocation5 + $0x1d0] sm:$0xf] }
 0x10d   :  { %v8998_v44 = vld [vmem:[#allocation5 + $0x48c] sm:$0xf]  ;;  %v7386_v54 = vor.u32 %v9198_v40, %v7383_v42  ;;  %v9043_v37 = vld [vmem:[#allocation5 + $0x5ec] sm:$0xf0] }
 0x10e   :  { %v6583_v45 = vld [vmem:[#allocation5 + $0x4a8] sm:$0xf0]  ;;  %v7005_v39 = vld [vmem:[#allocation5 + $0x7d0] sm:$0xf] }
 0x10f   :  { %v9062_v50 = vld [vmem:[#allocation5 + $0x68c] sm:$0xf]  ;;  %v6586_v57 = vor.u32 %v8998_v44, %v6583_v45  ;;  %2915 = vmatpush.bf16.msra.mxu0 %v7386_v54  ;;  %v9107_v40 = vld [vmem:[#allocation5 + $0x7ec] sm:$0xf0]  ;;  %v9936_v44 = vpop.f32.mrf.mxu0  ;;  %v6238_v45 = vor.u32 %v8915_v32, %v6237_v31 }
 0x110   :  { %v6839_v52 = vld [vmem:[#allocation5 + $0x6a8] sm:$0xf0]  ;;  %2887 = vmatpush.bf16.msra.mxu3 %v6874_v48  ;;  %2901 = vmatpush.bf16.msra.mxu2 %v7130_v49  ;;  %v8907_v48 = vld [vmem:[#allocation5 + $0x1ac] sm:$0xf0]  ;;  %v9938_v49 = vpop.f32.mrf.mxu1 }
 0x111   :  { %v9126_v58 = vld [vmem:[#allocation5 + $0x88c] sm:$0xf]  ;;  %v6842_v3 = vor.u32 %v9062_v50, %v6839_v52  ;;  %2874 = vmatpush.bf16.msrb.mxu1 %v6586_v57  ;;  %v6750_v50 = vor.u32 %v9043_v37, %v6749_v35  ;;  %v7006_v52 = vor.u32 %v9107_v40, %v7005_v39  ;;  %v8971_v54 = vld [vmem:[#allocation5 + $0x3ac] sm:$0xf0] }
 0x112   :  { %v7095_v59 = vld [vmem:[#allocation5 + $0x8a8] sm:$0xf0]  ;;  %v6717_v57 = vld [vmem:[#allocation5 + $0x590] sm:$0xf] }
 0x113   :  { %v9190_v60 = vld [vmem:[#allocation5 + $0xa8c] sm:$0xf]  ;;  %v7098_v4 = vor.u32 %v9126_v58, %v7095_v59  ;;  %v2640_v58 = vpop.f32.mrf.mxu2  ;;  %v9035_v59 = vld [vmem:[#allocation5 + $0x5ac] sm:$0xf0] }
 0x114   :  { %v7351_v63 = vld [vmem:[#allocation5 + $0xaa8] sm:$0xf0]  ;;  %2888 = vmatpush.bf16.msra.mxu3 %v6842_v3  ;;  %v6173_v3 = vld [vmem:[#allocation5 + $0x150] sm:$0xf] }
 0x115   :  { %v8990_v0 = vld [vmem:[#allocation5 + $0x44c] sm:$0xf]  ;;  %v7354_v7 = vor.u32 %v9190_v60, %v7351_v63  ;;  %2902 = vmatpush.bf16.msra.mxu2 %v7098_v4  ;;  %v6973_v60 = vld [vmem:[#allocation5 + $0x790] sm:$0xf] }
 0x116   :  { %v6551_v2 = vld [vmem:[#allocation5 + $0x468] sm:$0xf0]  ;;  %v9099_v63 = vld [vmem:[#allocation5 + $0x7ac] sm:$0xf0] }
 0x117   :  { %v9054_v5 = vld [vmem:[#allocation5 + $0x64c] sm:$0xf]  ;;  %v6554_v8 = vor.u32 %v8990_v0, %v6551_v2  ;;  %2916 = vmatpush.bf16.msra.mxu0 %v7354_v7  ;;  %v6206_v0 = vor.u32 %v8907_v48, %v6205_v47  ;;  %v6462_v2 = vor.u32 %v8971_v54, %v6461_v53  ;;  %v8899_v4 = vld [vmem:[#allocation5 + $0x16c] sm:$0xf0] }
 0x118   :  { %v6807_v6 = vld [vmem:[#allocation5 + $0x668] sm:$0xf0]  ;;  %v6429_v7 = vld [vmem:[#allocation5 + $0x350] sm:$0xf] }
 0x119   :  { %v9118_v10 = vld [vmem:[#allocation5 + $0x84c] sm:$0xf]  ;;  %v6810_v20 = vor.u32 %v9054_v5, %v6807_v6  ;;  %2875 = vmatpush.bf16.msrb.mxu1 %v6554_v8  ;;  %v6718_v5 = vor.u32 %v9035_v59, %v6717_v57  ;;  %v6974_v6 = vor.u32 %v9099_v63, %v6973_v60  ;;  %v8963_v8 = vld [vmem:[#allocation5 + $0x36c] sm:$0xf0] }
 0x11a   :  { %v7063_v11 = vld [vmem:[#allocation5 + $0x868] sm:$0xf0]  ;;  %v6909_v31 = vld [vmem:[#allocation5 + $0x710] sm:$0xf] }
 0x11b   :  { %v9182_v12 = vld [vmem:[#allocation5 + $0xa4c] sm:$0xf]  ;;  %v7066_v21 = vor.u32 %v9118_v10, %v7063_v11  ;;  %2889 = vmatpush.bf16.msra.mxu3 %v6810_v20  ;;  %v6685_v10 = vld [vmem:[#allocation5 + $0x550] sm:$0xf] }
 0x11c   :  { %v7319_v13 = vld [vmem:[#allocation5 + $0xa68] sm:$0xf0]  ;;  %v9027_v11 = vld [vmem:[#allocation5 + $0x56c] sm:$0xf0] }
 0x11d   :  { %v8982_v14 = vld [vmem:[#allocation5 + $0x40c] sm:$0xf]  ;;  %v7322_v24 = vor.u32 %v9182_v12, %v7319_v13  ;;  %2903 = vmatpush.bf16.msra.mxu2 %v7066_v21  ;;  %v6941_v12 = vld [vmem:[#allocation5 + $0x750] sm:$0xf] }
 0x11e   :  { %v6519_v16 = vld [vmem:[#allocation5 + $0x428] sm:$0xf0]  ;;  %v9091_v13 = vld [vmem:[#allocation5 + $0x76c] sm:$0xf0] }
 0x11f   :  { %v9238_v18 = vld [vmem:[#allocation5 + $0xc0c] sm:$0xf]  ;;  %v6522_v25 = vor.u32 %v8982_v14, %v6519_v16  ;;  %2917 = vmatpush.bf16.msra.mxu0 %v7322_v24  ;;  %v9944_v14 = vpop.f32.mrf.mxu3  ;;  %v2612_v16 = vpop.f32.mrf.mxu0  ;;  %v6141_v20 = vld [vmem:[#allocation5 + $0x110] sm:$0xf]  ;;  %v6942_v24 = vor.u32 %v9091_v13, %v6941_v12 }
 0x120   :  { %v7543_v19 = vld [vmem:[#allocation5 + $0xc28] sm:$0xf0]  ;;  %v8891_v21 = vld [vmem:[#allocation5 + $0x12c] sm:$0xf0] }
 0x121   :  { %v9046_v22 = vld [vmem:[#allocation5 + $0x60c] sm:$0xf]  ;;  %v7546_v30 = vor.u32 %v9238_v18, %v7543_v19  ;;  %2876 = vmatpush.bf16.msrb.mxu1 %v6522_v25  ;;  %v6174_v18 = vor.u32 %v8899_v4, %v6173_v3  ;;  %v6430_v19 = vor.u32 %v8963_v8, %v6429_v7  ;;  %v2626_v25 = vpop.f32.mrf.mxu1  ;;  %v9083_v32 = vld [vmem:[#allocation5 + $0x72c] sm:$0xf0]  ;;  %v6142_v34 = vor.u32 %v8891_v21, %v6141_v20 }
 0x122   :  { %v6775_v23 = vld [vmem:[#allocation5 + $0x628] sm:$0xf0]  ;;  %v8883_v37 = vld [vmem:[#allocation5 + $0xec] sm:$0xf0] }
 0x123   :  { %v9110_v26 = vld [vmem:[#allocation5 + $0x80c] sm:$0xf]  ;;  %v6778_v36 = vor.u32 %v9046_v22, %v6775_v23  ;;  %v2613_v22 = vadd.f32 %v2612_v16, %v9932_v62  ;;  %v6686_v23 = vor.u32 %v9027_v11, %v6685_v10  ;;  %v6365_v39 = vld [vmem:[#allocation5 + $0x2d0] sm:$0xf] }
 0x124   :  { %v7031_v27 = vld [vmem:[#allocation5 + $0x828] sm:$0xf0]  ;;  %2877 = vmatmul.bf16.vlgmr.msrb.gmra.mxu1 %v9887_v55  ;;  %v9011_v47 = vld [vmem:[#allocation5 + $0x4ec] sm:$0xf0] }
 0x125   :  { %v9174_v28 = vld [vmem:[#allocation5 + $0xa0c] sm:$0xf]  ;;  %v7034_v41 = vor.u32 %v9110_v26, %v7031_v27  ;;  %2932 = vmatpush.bf16.msra.mxu1 %v7546_v30  ;;  %2890 = vmatpush.bf16.msra.mxu3 %v6778_v36  ;;  %v6397_v26 = vld [vmem:[#allocation5 + $0x310] sm:$0xf]  ;;  %v2627_v33 = vadd.f32 %v2626_v25, %v2613_v22 }
 0x126   :  { %v7287_v29 = vld [vmem:[#allocation5 + $0xa28] sm:$0xf0]  ;;  %v8955_v27 = vld [vmem:[#allocation5 + $0x32c] sm:$0xf0] }
 0x127   :  { %v7290_v42 = vor.u32 %v9174_v28, %v7287_v29  ;;  %2904 = vmatpush.bf16.msra.mxu2 %v7034_v41  ;;  %v6653_v28 = vld [vmem:[#allocation5 + $0x510] sm:$0xf]  ;;  %v9947_v29 = vpop.f32.mrf.mxu2  ;;  %v6398_v35 = vor.u32 %v8955_v27, %v6397_v26  ;;  %v9949_v62 = vadd.f32 %v2640_v58, %v2627_v33  ;;  %v6910_v41 = vor.u32 %v9083_v32, %v6909_v31  ;;  %v2654_v59 = vpop.f32.mrf.mxu3 }
 0x128   :  { %2891 = vmatmul.bf16.vlgmr.msra.gmra.mxu3 %v9891_v61  ;;  %v9019_v30 = vld [vmem:[#allocation5 + $0x52c] sm:$0xf0] }
 0x129   :  { %2918 = vmatpush.bf16.msra.mxu0 %v7290_v42  ;;  %2939 = vmatpush.bf16.msrb.mxu3 %v6238_v45  ;;  %v6109_v36 = vld [vmem:[#allocation5 + $0xd0] sm:$0xf]  ;;  %v6654_v40 = vor.u32 %v9019_v30, %v6653_v28  ;;  %vm3331_vm2 = vcmp.gt.f32.partialorder %v9949_v62, 0.0 }
 0x12a   :  { %2953 = vmatpush.bf16.msrb.mxu1 %v6494_v46  ;;  %2905 = vmatmul.bf16.vlgmr.msra.gmra.mxu2 %v9903_v38  ;;  %v8947_v42 = vld [vmem:[#allocation5 + $0x2ec] sm:$0xf0]  ;;  %v10323_v46 = vperm.slane %v9924_v1, 1 }
 0x12b   :  { %2967 = vmatpush.bf16.msrb.mxu2 %v6750_v50  ;;  %v6621_v45 = vld [vmem:[#allocation5 + $0x4d0] sm:$0xf]  ;;  %v6366_v53 = vor.u32 %v8947_v42, %v6365_v39 }
 0x12c   :  { %2919 = vmatmul.bf16.vlgmr.msra.gmra.mxu0 %v9905_v43  ;;  %v6877_v48 = vld [vmem:[#allocation5 + $0x6d0] sm:$0xf]  ;;  %v6622_v58 = vor.u32 %v9011_v47, %v6621_v45  ;;  %v2655_v3 = vadd.f32 %v2654_v59, %v10323_v46 }
 0x12d   :  { %2981 = vmatpush.bf16.msrb.mxu0 %v7006_v52  ;;  %2940 = vmatpush.bf16.msrb.mxu3 %v6206_v0  ;;  %v9075_v50 = vld [vmem:[#allocation5 + $0x6ec] sm:$0xf0]  ;;  %v6110_v52 = vor.u32 %v8883_v37, %v6109_v36 }
 0x12e   :  { %2954 = vmatpush.bf16.msrb.mxu1 %v6462_v2  ;;  %v6077_v54 = vld [vmem:[#allocation5 + $0x90] sm:$0xf]  ;;  %v6878_v60 = vor.u32 %v9075_v50, %v6877_v48  ;;  %v8911_v48 = vld [vmem:[#allocation5 + $0x1d4] sm:$0xf] }
 0x12f   :  { %2968 = vmatpush.bf16.msrb.mxu2 %v6718_v5  ;;  %v8875_v57 = vld [vmem:[#allocation5 + $0xac] sm:$0xf0]  ;;  %v2668_v7 = vpop.f32.mrf.mxu2  ;;  %v6239_v50 = vld [vmem:[#allocation5 + $0x1f0] sm:$0xf0] }
 0x130   :  { %v6333_v63 = vld [vmem:[#allocation5 + $0x290] sm:$0xf]  ;;  %v9956_v8 = vadd.f32 %v2668_v7, %v2655_v3  ;;  %v6078_v10 = vor.u32 %v8875_v57, %v6077_v54  ;;  %v9958_v57 = vpop.f32.mrf.mxu0 }
 0x131   :  { %2982 = vmatpush.bf16.msrb.mxu0 %v6974_v6  ;;  %2941 = vmatpush.bf16.msrb.mxu3 %v6174_v18  ;;  %v8939_v0 = vld [vmem:[#allocation5 + $0x2ac] sm:$0xf0] }
 0x132   :  { %2955 = vmatpush.bf16.msrb.mxu1 %v6430_v19  ;;  %v6589_v2 = vld [vmem:[#allocation5 + $0x490] sm:$0xf]  ;;  %v6334_v11 = vor.u32 %v8939_v0, %v6333_v63  ;;  %v8975_v63 = vld [vmem:[#allocation5 + $0x3d4] sm:$0xf] }
 0x133   :  { %2969 = vmatpush.bf16.msrb.mxu2 %v6686_v23  ;;  %v9003_v4 = vld [vmem:[#allocation5 + $0x4ac] sm:$0xf0]  ;;  %v6495_v0 = vld [vmem:[#allocation5 + $0x3f0] sm:$0xf0] }
 0x134   :  { %7566 = vmatmul.msk.bf16.vlgmr.msra.gmra.mxu1 %vm2543_vm0, %v9899_v51  ;;  %v6845_v5 = vld [vmem:[#allocation5 + $0x690] sm:$0xf]  ;;  %v6590_v16 = vor.u32 %v9003_v4, %v6589_v2  ;;  %v6242_v2 = vor.u32 %v8911_v48, %v6239_v50  ;;  %v8887_v48 = vld [vmem:[#allocation5 + $0x114] sm:$0xf] }
 0x135   :  { %2983 = vmatpush.bf16.msrb.mxu0 %v6942_v24  ;;  %2942 = vmatpush.bf16.msrb.mxu3 %v6142_v34  ;;  %v9067_v6 = vld [vmem:[#allocation5 + $0x6ac] sm:$0xf0]  ;;  %v6143_v50 = vld [vmem:[#allocation5 + $0x130] sm:$0xf0] }
 0x136   :  { %2956 = vmatpush.bf16.msrb.mxu1 %v6398_v35  ;;  %v6045_v12 = vld [vmem:[#allocation5 + $0x50] sm:$0xf]  ;;  %v6846_v18 = vor.u32 %v9067_v6, %v6845_v5  ;;  %v9960_v6 = vpop.f32.mrf.mxu1 }
 0x137   :  { %2970 = vmatpush.bf16.msrb.mxu2 %v6654_v40  ;;  %v8867_v13 = vld [vmem:[#allocation5 + $0x6c] sm:$0xf0] }
 0x138   :  { %v6301_v19 = vld [vmem:[#allocation5 + $0x250] sm:$0xf]  ;;  %v6046_v25 = vor.u32 %v8867_v13, %v6045_v12  ;;  %v6498_v13 = vor.u32 %v8975_v63, %v6495_v0 }
 0x139   :  { %2984 = vmatpush.bf16.msrb.mxu0 %v6910_v41  ;;  %2943 = vmatpush.bf16.msrb.mxu3 %v6110_v52  ;;  %v8931_v20 = vld [vmem:[#allocation5 + $0x26c] sm:$0xf0] }
 0x13a   :  { %2957 = vmatpush.bf16.msrb.mxu1 %v6366_v53  ;;  %v6557_v21 = vld [vmem:[#allocation5 + $0x450] sm:$0xf]  ;;  %v6302_v26 = vor.u32 %v8931_v20, %v6301_v19  ;;  %v6463_v19 = vld [vmem:[#allocation5 + $0x3b0] sm:$0xf0] }
 0x13b   :  { %2971 = vmatpush.bf16.msrb.mxu2 %v6622_v58  ;;  %v8995_v22 = vld [vmem:[#allocation5 + $0x46c] sm:$0xf0] }
 0x13c   :  { %v6813_v23 = vld [vmem:[#allocation5 + $0x650] sm:$0xf]  ;;  %v6558_v31 = vor.u32 %v8995_v22, %v6557_v21 }
 0x13d   :  { %2985 = vmatpush.bf16.msrb.mxu0 %v6878_v60  ;;  %v9059_v24 = vld [vmem:[#allocation5 + $0x66c] sm:$0xf0]  ;;  %2944 = vmatpush.bf16.msrb.mxu3 %v6078_v10  ;;  %v8903_v10 = vld [vmem:[#allocation5 + $0x194] sm:$0xf] }
 0x13e   :  { %2958 = vmatpush.bf16.msrb.mxu1 %v6334_v11  ;;  %v6013_v27 = vld [vmem:[#allocation5 + $0x10] sm:$0xf]  ;;  %v6814_v32 = vor.u32 %v9059_v24, %v6813_v23  ;;  %v6207_v11 = vld [vmem:[#allocation5 + $0x1b0] sm:$0xf0] }
 0x13f   :  { %v8859_v28 = vld [vmem:[#allocation5 + $0x2c] sm:$0xf0]  ;;  %2972 = vmatpush.bf16.msrb.mxu2 %v6590_v16  ;;  %v6210_v21 = vor.u32 %v8903_v10, %v6207_v11 }
 0x140   :  { %v6269_v30 = vld [vmem:[#allocation5 + $0x210] sm:$0xf]  ;;  %v6014_v45 = vor.u32 %v8859_v28, %v6013_v27  ;;  %v6175_v27 = vld [vmem:[#allocation5 + $0x170] sm:$0xf0]  ;;  %v9965_v28 = vpop.f32.mrf.mxu3 }
 0x141   :  { %2986 = vmatpush.bf16.msrb.mxu0 %v6846_v18  ;;  %v8923_v33 = vld [vmem:[#allocation5 + $0x22c] sm:$0xf0]  ;;  %2945 = vmatpush.bf16.msrb.mxu3 %v6046_v25  ;;  %v8967_v18 = vld [vmem:[#allocation5 + $0x394] sm:$0xf] }
 0x142   :  { %v6525_v34 = vld [vmem:[#allocation5 + $0x410] sm:$0xf]  ;;  %2959 = vmatpush.bf16.msrb.mxu1 %v6302_v26  ;;  %v6270_v47 = vor.u32 %v8923_v33, %v6269_v30  ;;  %v8895_v26 = vld [vmem:[#allocation5 + $0x154] sm:$0xf]  ;;  %v6466_v30 = vor.u32 %v8967_v18, %v6463_v19 }
 0x143   :  { %v8987_v35 = vld [vmem:[#allocation5 + $0x42c] sm:$0xf0]  ;;  %2973 = vmatpush.bf16.msrb.mxu2 %v6558_v31  ;;  %v2682_v31 = vpop.f32.mrf.mxu0  ;;  %v8959_v33 = vld [vmem:[#allocation5 + $0x354] sm:$0xf] }
 0x144   :  { %v6781_v36 = vld [vmem:[#allocation5 + $0x610] sm:$0xf]  ;;  %v6526_v52 = vor.u32 %v8987_v35, %v6525_v34  ;;  %v6431_v34 = vld [vmem:[#allocation5 + $0x370] sm:$0xf0]  ;;  %v2683_v35 = vadd.f32 %v2682_v31, %v9956_v8 }
 0x145   :  { %v9051_v37 = vld [vmem:[#allocation5 + $0x62c] sm:$0xf0]  ;;  %2987 = vmatpush.bf16.msrb.mxu0 %v6814_v32  ;;  %2946 = vmatpush.bf16.msrb.mxu3 %v6014_v45  ;;  %v2696_v45 = vpop.f32.mrf.mxu1 }
 0x146   :  { %v7261_v39 = vld [vmem:[#allocation5 + $0x9d0] sm:$0xf]  ;;  %v6782_v53 = vor.u32 %v9051_v37, %v6781_v36  ;;  %2960 = vmatpush.bf16.msrb.mxu1 %v6270_v47  ;;  %v6178_v37 = vor.u32 %v8895_v26, %v6175_v27  ;;  %v6079_v26 = vld [vmem:[#allocation5 + $0xb0] sm:$0xf0] }
 0x147   :  { %v9171_v40 = vld [vmem:[#allocation5 + $0x9ec] sm:$0xf0]  ;;  %2974 = vmatpush.bf16.msrb.mxu2 %v6526_v52  ;;  %v2697_v52 = vadd.f32 %v2696_v45, %v2683_v35  ;;  %v6047_v45 = vld [vmem:[#allocation5 + $0x70] sm:$0xf0] }
 0x148   :  { %v7517_v41 = vld [vmem:[#allocation5 + $0xbd0] sm:$0xf]  ;;  %v7262_v59 = vor.u32 %v9171_v40, %v7261_v39  ;;  %2947 = vmatmul.bf16.vlgmr.msrb.gmra.mxu3 %v9889_v56 }
 0x149   :  { %v9235_v42 = vld [vmem:[#allocation5 + $0xbec] sm:$0xf0]  ;;  %2988 = vmatpush.bf16.msrb.mxu0 %v6782_v53  ;;  %2961 = vmatmul.bf16.vlgmr.msrb.gmra.mxu1 %v9895_v9  ;;  %v6434_v53 = vor.u32 %v8959_v33, %v6431_v34  ;;  %v6335_v33 = vld [vmem:[#allocation5 + $0x2b0] sm:$0xf0] }
 0x14a   :  { %v7549_v54 = vld [vmem:[#allocation5 + $0xc10] sm:$0xf]  ;;  %v7518_v58 = vor.u32 %v9235_v42, %v7517_v41  ;;  %2995 = vmatpush.bf16.msra.mxu3 %v7262_v59  ;;  %2975 = vmatmul.bf16.vlgmr.msrb.gmra.mxu2 %v9887_v55  ;;  %v9969_v42 = vpop.f32.mrf.mxu2  ;;  %v8951_v59 = vld [vmem:[#allocation5 + $0x314] sm:$0xf] }
 0x14b   :  { %v9243_v60 = vld [vmem:[#allocation5 + $0xc2c] sm:$0xf0] }
 0x14c   :  { %v7229_v3 = vld [vmem:[#allocation5 + $0x990] sm:$0xf]  ;;  %v7550_v12 = vor.u32 %v9243_v60, %v7549_v54  ;;  %3009 = vmatpush.bf16.msra.mxu1 %v7518_v58  ;;  %2989 = vmatmul.bf16.vlgmr.msrb.gmra.mxu0 %v9891_v61  ;;  %v6399_v58 = vld [vmem:[#allocation5 + $0x330] sm:$0xf0]  ;;  %v6146_v60 = vor.u32 %v8887_v48, %v6143_v50 }
 0x14d   :  { %v9163_v4 = vld [vmem:[#allocation5 + $0x9ac] sm:$0xf0]  ;;  %3037 = vmatpush.bf16.msra.mxu0 %v6242_v2  ;;  %v6402_v11 = vor.u32 %v8951_v59, %v6399_v58 }
 0x14e   :  { %v7485_v5 = vld [vmem:[#allocation5 + $0xb90] sm:$0xf]  ;;  %v7230_v16 = vor.u32 %v9163_v4, %v7229_v3  ;;  %3030 = vmatpush.bf16.msra.mxu2 %v7550_v12  ;;  %v8879_v4 = vld [vmem:[#allocation5 + $0xd4] sm:$0xf] }
 0x14f   :  { %v9227_v7 = vld [vmem:[#allocation5 + $0xbac] sm:$0xf0] }
 0x150   :  { %v7486_v20 = vor.u32 %v9227_v7, %v7485_v5  ;;  %v7197_v22 = vld [vmem:[#allocation5 + $0x950] sm:$0xf]  ;;  %2996 = vmatpush.bf16.msra.mxu3 %v7230_v16  ;;  %v6111_v5 = vld [vmem:[#allocation5 + $0xf0] sm:$0xf0]  ;;  %v2710_v7 = vpop.f32.mrf.mxu3 }
 0x151   :  { %v9155_v23 = vld [vmem:[#allocation5 + $0x96c] sm:$0xf0]  ;;  %3038 = vmatpush.bf16.msra.mxu0 %v6210_v21  ;;  %v2711_v10 = vadd.f32 %v2710_v7, %v2697_v52  ;;  %v6367_v16 = vld [vmem:[#allocation5 + $0x2f0] sm:$0xf0]  ;;  %v6114_v19 = vor.u32 %v8879_v4, %v6111_v5 }
 0x152   :  { %v7453_v24 = vld [vmem:[#allocation5 + $0xb50] sm:$0xf]  ;;  %3051 = vmatpush.bf16.msrb.mxu2 %v6498_v13  ;;  %v7198_v32 = vor.u32 %v9155_v23, %v7197_v22  ;;  %3010 = vmatpush.bf16.msra.mxu1 %v7486_v20  ;;  %v8943_v13 = vld [vmem:[#allocation5 + $0x2d4] sm:$0xf]  ;;  %v2724_v23 = vpop.f32.mrf.mxu2 }
 0x153   :  { %v9219_v25 = vld [vmem:[#allocation5 + $0xb6c] sm:$0xf0]  ;;  %v9971_v27 = vadd.f32 %v2724_v23, %v2711_v10  ;;  %v8927_v52 = vld [vmem:[#allocation5 + $0x254] sm:$0xf] }
 0x154   :  { %v7454_v36 = vor.u32 %v9219_v25, %v7453_v24  ;;  %v7165_v39 = vld [vmem:[#allocation5 + $0x910] sm:$0xf]  ;;  %2997 = vmatpush.bf16.msra.mxu3 %v7198_v32  ;;  %v8871_v25 = vld [vmem:[#allocation5 + $0x94] sm:$0xf] }
 0x155   :  { %v9147_v40 = vld [vmem:[#allocation5 + $0x92c] sm:$0xf0]  ;;  %3039 = vmatpush.bf16.msra.mxu0 %v6178_v37  ;;  %v8935_v32 = vld [vmem:[#allocation5 + $0x294] sm:$0xf]  ;;  %v6082_v35 = vor.u32 %v8871_v25, %v6079_v26 }
 0x156   :  { %v7421_v41 = vld [vmem:[#allocation5 + $0xb10] sm:$0xf]  ;;  %3052 = vmatpush.bf16.msrb.mxu2 %v6466_v30  ;;  %v7166_v54 = vor.u32 %v9147_v40, %v7165_v39  ;;  %3011 = vmatpush.bf16.msra.mxu1 %v7454_v36  ;;  %v6370_v30 = vor.u32 %v8943_v13, %v6367_v16  ;;  %v6338_v48 = vor.u32 %v8935_v32, %v6335_v33  ;;  %v6751_v4 = vld [vmem:[#allocation5 + $0x5f0] sm:$0xf0] }
 0x157   :  { %v9211_v47 = vld [vmem:[#allocation5 + $0xb2c] sm:$0xf0]  ;;  %v9103_v5 = vld [vmem:[#allocation5 + $0x7d4] sm:$0xf] }
 0x158   :  { %v7422_v8 = vor.u32 %v9211_v47, %v7421_v41  ;;  %v7133_v63 = vld [vmem:[#allocation5 + $0x8d0] sm:$0xf]  ;;  %2998 = vmatpush.bf16.msra.mxu3 %v7166_v54  ;;  %v8863_v41 = vld [vmem:[#allocation5 + $0x54] sm:$0xf]  ;;  %v9975_v47 = vpop.f32.mrf.mxu3 }
 0x159   :  { %v9139_v0 = vld [vmem:[#allocation5 + $0x8ec] sm:$0xf0]  ;;  %3040 = vmatpush.bf16.msra.mxu0 %v6146_v60  ;;  %v6050_v58 = vor.u32 %v8863_v41, %v6047_v45  ;;  %v7007_v7 = vld [vmem:[#allocation5 + $0x7f0] sm:$0xf0] }
 0x15a   :  { %v7389_v2 = vld [vmem:[#allocation5 + $0xad0] sm:$0xf]  ;;  %3053 = vmatpush.bf16.msrb.mxu2 %v6434_v53  ;;  %v7134_v12 = vor.u32 %v9139_v0, %v7133_v63  ;;  %3012 = vmatpush.bf16.msra.mxu1 %v7422_v8  ;;  %v6303_v53 = vld [vmem:[#allocation5 + $0x270] sm:$0xf0] }
 0x15b   :  { %v9203_v3 = vld [vmem:[#allocation5 + $0xaec] sm:$0xf0]  ;;  %7567 = vmatmul.msk.bf16.vlgmr.msra.gmra.mxu2 %vm2543_vm0, %v9899_v51  ;;  %v8855_v0 = vld [vmem:[#allocation5 + $0x14] sm:$0xf]  ;;  %v6306_v10 = vor.u32 %v8927_v52, %v6303_v53 }
 0x15c   :  { %v7390_v18 = vor.u32 %v9203_v3, %v7389_v2  ;;  %v7101_v20 = vld [vmem:[#allocation5 + $0x890] sm:$0xf]  ;;  %2999 = vmatpush.bf16.msra.mxu3 %v7134_v12  ;;  %v6015_v2 = vld [vmem:[#allocation5 + $0x30] sm:$0xf0] }
 0x15d   :  { %v9131_v21 = vld [vmem:[#allocation5 + $0x8ac] sm:$0xf0]  ;;  %3041 = vmatpush.bf16.msra.mxu0 %v6114_v19  ;;  %v9039_v3 = vld [vmem:[#allocation5 + $0x5d4] sm:$0xf] }
 0x15e   :  { %v7357_v22 = vld [vmem:[#allocation5 + $0xa90] sm:$0xf]  ;;  %3054 = vmatpush.bf16.msrb.mxu2 %v6402_v11  ;;  %v7102_v31 = vor.u32 %v9131_v21, %v7101_v20  ;;  %3013 = vmatpush.bf16.msra.mxu1 %v7390_v18  ;;  %v9167_v12 = vld [vmem:[#allocation5 + $0x9d4] sm:$0xf]  ;;  %v6018_v18 = vor.u32 %v8855_v0, %v6015_v2  ;;  %v6754_v21 = vor.u32 %v9039_v3, %v6751_v4 }
 0x15f   :  { %v9195_v24 = vld [vmem:[#allocation5 + $0xaac] sm:$0xf0]  ;;  %v7263_v13 = vld [vmem:[#allocation5 + $0x9f0] sm:$0xf0] }
 0x160   :  { %v7358_v34 = vor.u32 %v9195_v24, %v7357_v22  ;;  %v7069_v36 = vld [vmem:[#allocation5 + $0x850] sm:$0xf]  ;;  %3000 = vmatpush.bf16.msra.mxu3 %v7102_v31  ;;  %v8919_v19 = vld [vmem:[#allocation5 + $0x214] sm:$0xf]  ;;  %v7010_v22 = vor.u32 %v9103_v5, %v7007_v7  ;;  %v7266_v26 = vor.u32 %v9167_v12, %v7263_v13 }
 0x161   :  { %v9123_v37 = vld [vmem:[#allocation5 + $0x86c] sm:$0xf0]  ;;  %3042 = vmatpush.bf16.msra.mxu0 %v6082_v35  ;;  %v6271_v20 = vld [vmem:[#allocation5 + $0x230] sm:$0xf0] }
 0x162   :  { %v7325_v39 = vld [vmem:[#allocation5 + $0xa50] sm:$0xf]  ;;  %3055 = vmatpush.bf16.msrb.mxu2 %v6370_v30  ;;  %v7070_v50 = vor.u32 %v9123_v37, %v7069_v36  ;;  %3014 = vmatpush.bf16.msra.mxu1 %v7358_v34  ;;  %v9231_v23 = vld [vmem:[#allocation5 + $0xbd4] sm:$0xf]  ;;  %v2738_v30 = vpop.f32.mrf.mxu3  ;;  %v6274_v35 = vor.u32 %v8919_v19, %v6271_v20 }
 0x163   :  { %v9187_v40 = vld [vmem:[#allocation5 + $0xa6c] sm:$0xf0]  ;;  %v7519_v24 = vld [vmem:[#allocation5 + $0xbf0] sm:$0xf0]  ;;  %v9978_v34 = vadd.f32 %v2738_v30, %v9971_v27 }
 0x164   :  { %v7037_v54 = vld [vmem:[#allocation5 + $0x810] sm:$0xf]  ;;  %v7326_v59 = vor.u32 %v9187_v40, %v7325_v39  ;;  %3001 = vmatpush.bf16.msra.mxu3 %v7070_v50  ;;  %v9031_v25 = vld [vmem:[#allocation5 + $0x594] sm:$0xf]  ;;  %v7522_v39 = vor.u32 %v9231_v23, %v7519_v24 }
 0x165   :  { %v9115_v8 = vld [vmem:[#allocation5 + $0x82c] sm:$0xf0]  ;;  %3043 = vmatpush.bf16.msra.mxu0 %v6050_v58  ;;  %v6719_v31 = vld [vmem:[#allocation5 + $0x5b0] sm:$0xf0]  ;;  %10328 = vst [vmem:[#allocation22_spill] sm:$0xff] %v9978_v34 }
 0x166   :  { %v7293_v60 = vld [vmem:[#allocation5 + $0xa10] sm:$0xf]  ;;  %3056 = vmatpush.bf16.msrb.mxu2 %v6338_v48  ;;  %v7038_v11 = vor.u32 %v9115_v8, %v7037_v54  ;;  %3015 = vmatpush.bf16.msra.mxu1 %v7326_v59  ;;  %v9095_v32 = vld [vmem:[#allocation5 + $0x794] sm:$0xf]  ;;  %v6722_v40 = vor.u32 %v9031_v25, %v6719_v31 }
 0x167   :  { %v9179_v63 = vld [vmem:[#allocation5 + $0xa2c] sm:$0xf0]  ;;  %v6975_v33 = vld [vmem:[#allocation5 + $0x7b0] sm:$0xf0] }
 0x168   :  { %v7294_v16 = vor.u32 %v9179_v63, %v7293_v60  ;;  %3002 = vmatpush.bf16.msra.mxu3 %v7038_v11  ;;  %v9159_v36 = vld [vmem:[#allocation5 + $0x994] sm:$0xf]  ;;  %v6978_v41 = vor.u32 %v9095_v32, %v6975_v33 }
 0x169   :  { %v7231_v37 = vld [vmem:[#allocation5 + $0x9b0] sm:$0xf0]  ;;  %3044 = vmatpush.bf16.msra.mxu0 %v6018_v18 }
 0x16a   :  { %3057 = vmatpush.bf16.msrb.mxu2 %v6306_v10  ;;  %3016 = vmatpush.bf16.msra.mxu1 %v7294_v16  ;;  %v9223_v45 = vld [vmem:[#allocation5 + $0xb94] sm:$0xf]  ;;  %v7234_v52 = vor.u32 %v9159_v36, %v7231_v37 }
 0x16b   :  { %v7487_v48 = vld [vmem:[#allocation5 + $0xbb0] sm:$0xf0]  ;;  %3003 = vmatmul.bf16.vlgmr.msra.gmra.mxu3 %v9903_v38 }
 0x16c   :  { %3065 = vmatpush.bf16.msrb.mxu3 %v6754_v21  ;;  %v9023_v50 = vld [vmem:[#allocation5 + $0x554] sm:$0xf]  ;;  %v7490_v8 = vor.u32 %v9223_v45, %v7487_v48  ;;  %3045 = vmatmul.bf16.vlgmr.msra.gmra.mxu0 %v9889_v56 }
 0x16d   :  { %3093 = vmatpush.bf16.msrb.mxu0 %v7266_v26  ;;  %v6687_v53 = vld [vmem:[#allocation5 + $0x570] sm:$0xf0]  ;;  %3017 = vmatmul.bf16.vlgmr.msra.gmra.mxu1 %v9905_v43 }
 0x16e   :  { %3079 = vmatpush.bf16.msrb.mxu1 %v7010_v22  ;;  %v9087_v27 = vld [vmem:[#allocation5 + $0x754] sm:$0xf]  ;;  %3058 = vmatpush.bf16.msrb.mxu2 %v6274_v35  ;;  %v6690_v60 = vor.u32 %v9023_v50, %v6687_v53 }
 0x16f   :  { %v6943_v54 = vld [vmem:[#allocation5 + $0x770] sm:$0xf0] }
 0x170   :  { %v9151_v59 = vld [vmem:[#allocation5 + $0x954] sm:$0xf]  ;;  %3066 = vmatpush.bf16.msrb.mxu3 %v6722_v40  ;;  %v6946_v63 = vor.u32 %v9087_v27, %v6943_v54 }
 0x171   :  { %v7199_v58 = vld [vmem:[#allocation5 + $0x970] sm:$0xf0]  ;;  %3094 = vmatpush.bf16.msrb.mxu0 %v7234_v52  ;;  %3059 = vmatmul.bf16.vlgmr.msrb.gmra.mxu2 %v9895_v9 }
 0x172   :  { %3107 = vmatpush.bf16.msra.mxu2 %v7522_v39  ;;  %3080 = vmatpush.bf16.msrb.mxu1 %v6978_v41  ;;  %v9215_v0 = vld [vmem:[#allocation5 + $0xb54] sm:$0xf]  ;;  %v7202_v4 = vor.u32 %v9151_v59, %v7199_v58 }
 0x173   :  { %v7455_v2 = vld [vmem:[#allocation5 + $0xb70] sm:$0xf0] }
 0x174   :  { %v9015_v3 = vld [vmem:[#allocation5 + $0x514] sm:$0xf]  ;;  %v7458_v13 = vor.u32 %v9215_v0, %v7455_v2  ;;  %3067 = vmatpush.bf16.msrb.mxu3 %v6690_v60 }
 0x175   :  { %v6655_v5 = vld [vmem:[#allocation5 + $0x530] sm:$0xf0]  ;;  %3095 = vmatpush.bf16.msrb.mxu0 %v7202_v4 }
 0x176   :  { %v9079_v7 = vld [vmem:[#allocation5 + $0x714] sm:$0xf]  ;;  %3108 = vmatpush.bf16.msra.mxu2 %v7490_v8  ;;  %3081 = vmatpush.bf16.msrb.mxu1 %v6946_v63  ;;  %v6658_v16 = vor.u32 %v9015_v3, %v6655_v5 }
 0x177   :  { %v6911_v10 = vld [vmem:[#allocation5 + $0x730] sm:$0xf0] }
 0x178   :  { %v9143_v11 = vld [vmem:[#allocation5 + $0x914] sm:$0xf]  ;;  %v6914_v18 = vor.u32 %v9079_v7, %v6911_v10  ;;  %3068 = vmatpush.bf16.msrb.mxu3 %v6658_v16 }
 0x179   :  { %v7167_v12 = vld [vmem:[#allocation5 + $0x930] sm:$0xf0] }
 0x17a   :  { %v9207_v19 = vld [vmem:[#allocation5 + $0xb14] sm:$0xf]  ;;  %v7170_v22 = vor.u32 %v9143_v11, %v7167_v12  ;;  %3109 = vmatpush.bf16.msra.mxu2 %v7458_v13  ;;  %3082 = vmatpush.bf16.msrb.mxu1 %v6914_v18 }
 0x17b   :  { %v7423_v20 = vld [vmem:[#allocation5 + $0xb30] sm:$0xf0] }
 0x17c   :  { %v9007_v21 = vld [vmem:[#allocation5 + $0x4d4] sm:$0xf]  ;;  %v7426_v31 = vor.u32 %v9207_v19, %v7423_v20  ;;  %3096 = vmatpush.bf16.msrb.mxu0 %v7170_v22  ;;  %v6245_v22 = vld [vmem:[#allocation5 + $0x1d8] sm:$0xf] }
 0x17d   :  { %v6623_v23 = vld [vmem:[#allocation5 + $0x4f0] sm:$0xf0] }
 0x17e   :  { %v9071_v24 = vld [vmem:[#allocation5 + $0x6d4] sm:$0xf]  ;;  %v6626_v32 = vor.u32 %v9007_v21, %v6623_v23  ;;  %3110 = vmatpush.bf16.msra.mxu2 %v7426_v31  ;;  %v8916_v23 = vld [vmem:[#allocation5 + $0x1f4] sm:$0xf0] }
 0x17f   :  { %v6879_v25 = vld [vmem:[#allocation5 + $0x6f0] sm:$0xf0] }
 0x180   :  { %v9135_v26 = vld [vmem:[#allocation5 + $0x8d4] sm:$0xf]  ;;  %v6882_v33 = vor.u32 %v9071_v24, %v6879_v25  ;;  %3069 = vmatpush.bf16.msrb.mxu3 %v6626_v32  ;;  %v6757_v24 = vld [vmem:[#allocation5 + $0x5d8] sm:$0xf] }
 0x181   :  { %v7135_v30 = vld [vmem:[#allocation5 + $0x8f0] sm:$0xf0] }
 0x182   :  { %v9199_v35 = vld [vmem:[#allocation5 + $0xad4] sm:$0xf]  ;;  %v7138_v39 = vor.u32 %v9135_v26, %v7135_v30  ;;  %3083 = vmatpush.bf16.msrb.mxu1 %v6882_v33  ;;  %v9044_v26 = vld [vmem:[#allocation5 + $0x5f4] sm:$0xf0] }
 0x183   :  { %v7391_v36 = vld [vmem:[#allocation5 + $0xaf0] sm:$0xf0] }
 0x184   :  { %v8999_v37 = vld [vmem:[#allocation5 + $0x494] sm:$0xf]  ;;  %v7394_v52 = vor.u32 %v9199_v35, %v7391_v36  ;;  %3097 = vmatpush.bf16.msrb.mxu0 %v7138_v39 }
 0x185   :  { %v6591_v40 = vld [vmem:[#allocation5 + $0x4b0] sm:$0xf0] }
 0x186   :  { %v9063_v41 = vld [vmem:[#allocation5 + $0x694] sm:$0xf]  ;;  %v6594_v53 = vor.u32 %v8999_v37, %v6591_v40  ;;  %3111 = vmatpush.bf16.msra.mxu2 %v7394_v52  ;;  %v6501_v37 = vld [vmem:[#allocation5 + $0x3d8] sm:$0xf]  ;;  %v6246_v40 = vor.u32 %v8916_v23, %v6245_v22 }
 0x187   :  { %v6847_v45 = vld [vmem:[#allocation5 + $0x6b0] sm:$0xf0]  ;;  %v9092_v22 = vld [vmem:[#allocation5 + $0x774] sm:$0xf0] }
 0x188   :  { %v9127_v48 = vld [vmem:[#allocation5 + $0x894] sm:$0xf]  ;;  %v6850_v27 = vor.u32 %v9063_v41, %v6847_v45  ;;  %3070 = vmatpush.bf16.msrb.mxu3 %v6594_v53  ;;  %v8980_v41 = vld [vmem:[#allocation5 + $0x3f4] sm:$0xf0] }
 0x189   :  { %v7103_v50 = vld [vmem:[#allocation5 + $0x8b0] sm:$0xf0]  ;;  %v7013_v45 = vld [vmem:[#allocation5 + $0x7d8] sm:$0xf] }
 0x18a   :  { %v9191_v54 = vld [vmem:[#allocation5 + $0xa94] sm:$0xf]  ;;  %v7106_v8 = vor.u32 %v9127_v48, %v7103_v50  ;;  %3084 = vmatpush.bf16.msrb.mxu1 %v6850_v27  ;;  %v9108_v48 = vld [vmem:[#allocation5 + $0x7f4] sm:$0xf0]  ;;  %v6758_v50 = vor.u32 %v9044_v26, %v6757_v24 }
 0x18b   :  { %v7359_v59 = vld [vmem:[#allocation5 + $0xab0] sm:$0xf0]  ;;  %v6213_v53 = vld [vmem:[#allocation5 + $0x198] sm:$0xf] }
 0x18c   :  { %v8991_v58 = vld [vmem:[#allocation5 + $0x454] sm:$0xf]  ;;  %v7362_v4 = vor.u32 %v9191_v54, %v7359_v59  ;;  %3098 = vmatpush.bf16.msrb.mxu0 %v7106_v8  ;;  %v8908_v27 = vld [vmem:[#allocation5 + $0x1b4] sm:$0xf0]  ;;  %v6502_v8 = vor.u32 %v8980_v41, %v6501_v37 }
 0x18d   :  { %v6559_v60 = vld [vmem:[#allocation5 + $0x470] sm:$0xf0]  ;;  %v6725_v59 = vld [vmem:[#allocation5 + $0x598] sm:$0xf] }
 0x18e   :  { %v9055_v63 = vld [vmem:[#allocation5 + $0x654] sm:$0xf]  ;;  %v6562_v10 = vor.u32 %v8991_v58, %v6559_v60  ;;  %3112 = vmatpush.bf16.msra.mxu2 %v7362_v4  ;;  %v9036_v58 = vld [vmem:[#allocation5 + $0x5b4] sm:$0xf0]  ;;  %v7014_v60 = vor.u32 %v9108_v48, %v7013_v45 }
 0x18f   :  { %v6815_v0 = vld [vmem:[#allocation5 + $0x670] sm:$0xf0]  ;;  %v9100_v4 = vld [vmem:[#allocation5 + $0x7b4] sm:$0xf0] }
 0x190   :  { %v9119_v2 = vld [vmem:[#allocation5 + $0x854] sm:$0xf]  ;;  %v6818_v11 = vor.u32 %v9055_v63, %v6815_v0  ;;  %3071 = vmatpush.bf16.msrb.mxu3 %v6562_v10  ;;  %v6469_v63 = vld [vmem:[#allocation5 + $0x398] sm:$0xf]  ;;  %v6214_v0 = vor.u32 %v8908_v27, %v6213_v53 }
 0x191   :  { %v7071_v3 = vld [vmem:[#allocation5 + $0x870] sm:$0xf0]  ;;  %v8900_v10 = vld [vmem:[#allocation5 + $0x174] sm:$0xf0] }
 0x192   :  { %v9183_v5 = vld [vmem:[#allocation5 + $0xa54] sm:$0xf]  ;;  %v7074_v18 = vor.u32 %v9119_v2, %v7071_v3  ;;  %3085 = vmatpush.bf16.msrb.mxu1 %v6818_v11  ;;  %v8972_v2 = vld [vmem:[#allocation5 + $0x3b4] sm:$0xf0] }
 0x193   :  { %v7327_v7 = vld [vmem:[#allocation5 + $0xa70] sm:$0xf0]  ;;  %v6981_v3 = vld [vmem:[#allocation5 + $0x798] sm:$0xf] }
 0x194   :  { %v8983_v12 = vld [vmem:[#allocation5 + $0x414] sm:$0xf]  ;;  %v7330_v25 = vor.u32 %v9183_v5, %v7327_v7  ;;  %3099 = vmatpush.bf16.msrb.mxu0 %v7074_v18  ;;  %v6726_v5 = vor.u32 %v9036_v58, %v6725_v59  ;;  %v6181_v7 = vld [vmem:[#allocation5 + $0x158] sm:$0xf] }
 0x195   :  { %v6527_v13 = vld [vmem:[#allocation5 + $0x430] sm:$0xf0]  ;;  %v6693_v11 = vld [vmem:[#allocation5 + $0x558] sm:$0xf] }
 0x196   :  { %v9047_v16 = vld [vmem:[#allocation5 + $0x614] sm:$0xf]  ;;  %v6530_v32 = vor.u32 %v8983_v12, %v6527_v13  ;;  %3113 = vmatpush.bf16.msra.mxu2 %v7330_v25  ;;  %v9028_v12 = vld [vmem:[#allocation5 + $0x574] sm:$0xf0]  ;;  %v6470_v13 = vor.u32 %v8972_v2, %v6469_v63 }
 0x197   :  { %v6783_v19 = vld [vmem:[#allocation5 + $0x630] sm:$0xf0]  ;;  %v6437_v18 = vld [vmem:[#allocation5 + $0x358] sm:$0xf]  ;;  %v6694_v23 = vor.u32 %v9028_v12, %v6693_v11 }
 0x198   :  { %v9111_v20 = vld [vmem:[#allocation5 + $0x814] sm:$0xf]  ;;  %v6786_v33 = vor.u32 %v9047_v16, %v6783_v19  ;;  %3072 = vmatpush.bf16.msrb.mxu3 %v6530_v32  ;;  %v6982_v16 = vor.u32 %v9100_v4, %v6981_v3  ;;  %v6182_v19 = vor.u32 %v8900_v10, %v6181_v7  ;;  %v6149_v24 = vld [vmem:[#allocation5 + $0x118] sm:$0xf] }
 0x199   :  { %v7039_v21 = vld [vmem:[#allocation5 + $0x830] sm:$0xf0]  ;;  %v8892_v25 = vld [vmem:[#allocation5 + $0x134] sm:$0xf0] }
 0x19a   :  { %v9239_v30 = vld [vmem:[#allocation5 + $0xc14] sm:$0xf]  ;;  %v7042_v39 = vor.u32 %v9111_v20, %v7039_v21  ;;  %3086 = vmatpush.bf16.msrb.mxu1 %v6786_v33  ;;  %v8964_v20 = vld [vmem:[#allocation5 + $0x374] sm:$0xf0] }
 0x19b   :  { %v7551_v31 = vld [vmem:[#allocation5 + $0xc30] sm:$0xf0]  ;;  %3073 = vmatmul.bf16.vlgmr.msrb.gmra.mxu3 %v9887_v55  ;;  %v6949_v21 = vld [vmem:[#allocation5 + $0x758] sm:$0xf] }
 0x19c   :  { %v9175_v35 = vld [vmem:[#allocation5 + $0xa14] sm:$0xf]  ;;  %v7554_v52 = vor.u32 %v9239_v30, %v7551_v31  ;;  %3100 = vmatpush.bf16.msrb.mxu0 %v7042_v39  ;;  %v6661_v26 = vld [vmem:[#allocation5 + $0x518] sm:$0xf]  ;;  %v6438_v31 = vor.u32 %v8964_v20, %v6437_v18  ;;  %v6950_v32 = vor.u32 %v9092_v22, %v6949_v21 }
 0x19d   :  { %v7295_v36 = vld [vmem:[#allocation5 + $0xa30] sm:$0xf0]  ;;  %3087 = vmatmul.bf16.vlgmr.msrb.gmra.mxu1 %v9891_v61  ;;  %v9020_v30 = vld [vmem:[#allocation5 + $0x534] sm:$0xf0] }
 0x19e   :  { %v7298_v54 = vor.u32 %v9175_v35, %v7295_v36  ;;  %3135 = vmatpush.bf16.msra.mxu1 %v6246_v40  ;;  %3128 = vmatpush.bf16.msra.mxu3 %v7554_v52  ;;  %v6405_v33 = vld [vmem:[#allocation5 + $0x318] sm:$0xf]  ;;  %v6150_v35 = vor.u32 %v8892_v25, %v6149_v24  ;;  %v6662_v40 = vor.u32 %v9020_v30, %v6661_v26 }
 0x19f   :  { %3101 = vmatmul.bf16.vlgmr.msrb.gmra.mxu0 %v9903_v38  ;;  %v8956_v36 = vld [vmem:[#allocation5 + $0x334] sm:$0xf0] }
 0x1a0   :  { %3163 = vmatpush.bf16.msra.mxu0 %v6758_v50  ;;  %3114 = vmatpush.bf16.msra.mxu2 %v7298_v54  ;;  %v6917_v37 = vld [vmem:[#allocation5 + $0x718] sm:$0xf]  ;;  %v6406_v52 = vor.u32 %v8956_v36, %v6405_v33 }
 0x1a1   :  { %v9084_v39 = vld [vmem:[#allocation5 + $0x734] sm:$0xf0] }
 0x1a2   :  { %3149 = vmatpush.bf16.msrb.mxu3 %v6502_v8  ;;  %3136 = vmatpush.bf16.msra.mxu1 %v6214_v0  ;;  %v6117_v41 = vld [vmem:[#allocation5 + $0xd8] sm:$0xf]  ;;  %v6918_v53 = vor.u32 %v9084_v39, %v6917_v37 }
 0x1a3   :  { %3115 = vmatmul.bf16.vlgmr.msra.gmra.mxu2 %v9905_v43  ;;  %v8884_v45 = vld [vmem:[#allocation5 + $0xf4] sm:$0xf0] }
 0x1a4   :  { %3177 = vmatpush.bf16.msrb.mxu2 %v7014_v60  ;;  %3164 = vmatpush.bf16.msra.mxu0 %v6726_v5  ;;  %v6629_v48 = vld [vmem:[#allocation5 + $0x4d8] sm:$0xf]  ;;  %v6118_v54 = vor.u32 %v8884_v45, %v6117_v41 }
 0x1a5   :  { %v9012_v50 = vld [vmem:[#allocation5 + $0x4f4] sm:$0xf0] }
 0x1a6   :  { %3150 = vmatpush.bf16.msrb.mxu3 %v6470_v13  ;;  %3137 = vmatpush.bf16.msra.mxu1 %v6182_v19  ;;  %v6373_v27 = vld [vmem:[#allocation5 + $0x2d8] sm:$0xf]  ;;  %v6630_v60 = vor.u32 %v9012_v50, %v6629_v48  ;;  %v9994_v48 = vpop.f32.mrf.mxu2 }
 0x1a7   :  { %v8948_v59 = vld [vmem:[#allocation5 + $0x2f4] sm:$0xf0] }
 0x1a8   :  { %3178 = vmatpush.bf16.msrb.mxu2 %v6982_v16  ;;  %3165 = vmatpush.bf16.msra.mxu0 %v6694_v23  ;;  %v6885_v58 = vld [vmem:[#allocation5 + $0x6d8] sm:$0xf]  ;;  %v6374_v4 = vor.u32 %v8948_v59, %v6373_v27  ;;  %v9988_v16 = vpop.f32.mrf.mxu1  ;;  %v9992_v23 = vpop.f32.mrf.mxu0 }
 0x1a9   :  { %v9076_v8 = vld [vmem:[#allocation5 + $0x6f4] sm:$0xf0] }
 0x1aa   :  { %3151 = vmatpush.bf16.msrb.mxu3 %v6438_v31  ;;  %3138 = vmatpush.bf16.msra.mxu1 %v6150_v35  ;;  %v6085_v63 = vld [vmem:[#allocation5 + $0x98] sm:$0xf]  ;;  %v6886_v5 = vor.u32 %v9076_v8, %v6885_v58 }
 0x1ab   :  { %v8876_v0 = vld [vmem:[#allocation5 + $0xb4] sm:$0xf0]  ;;  %7568 = vmatmul.msk.bf16.vlgmr.msra.gmra.mxu3 %vm2543_vm0, %v9899_v51 }
 0x1ac   :  { %3179 = vmatpush.bf16.msrb.mxu2 %v6950_v32  ;;  %3166 = vmatpush.bf16.msra.mxu0 %v6662_v40  ;;  %v6597_v2 = vld [vmem:[#allocation5 + $0x498] sm:$0xf]  ;;  %v6086_v10 = vor.u32 %v8876_v0, %v6085_v63 }
 0x1ad   :  { %v9004_v3 = vld [vmem:[#allocation5 + $0x4b4] sm:$0xf0] }
 0x1ae   :  { %3152 = vmatpush.bf16.msrb.mxu3 %v6406_v52  ;;  %v6341_v7 = vld [vmem:[#allocation5 + $0x298] sm:$0xf]  ;;  %3139 = vmatpush.bf16.msra.mxu1 %v6118_v54  ;;  %v6598_v18 = vor.u32 %v9004_v3, %v6597_v2 }
 0x1af   :  { %v8940_v11 = vld [vmem:[#allocation5 + $0x2b4] sm:$0xf0] }
 0x1b0   :  { %3180 = vmatpush.bf16.msrb.mxu2 %v6918_v53  ;;  %v6853_v12 = vld [vmem:[#allocation5 + $0x698] sm:$0xf]  ;;  %3167 = vmatpush.bf16.msra.mxu0 %v6630_v60  ;;  %v6342_v24 = vor.u32 %v8940_v11, %v6341_v7  ;;  %v9996_v63 = vpop.f32.mrf.mxu1  ;;  %v8976_v11 = vld [vmem:[#allocation5 + $0x3dc] sm:$0xf] }
 0x1b1   :  { %v9068_v13 = vld [vmem:[#allocation5 + $0x6b4] sm:$0xf0] }
 0x1b2   :  { %v6053_v19 = vld [vmem:[#allocation5 + $0x58] sm:$0xf]  ;;  %3153 = vmatpush.bf16.msrb.mxu3 %v6374_v4  ;;  %v6854_v25 = vor.u32 %v9068_v13, %v6853_v12  ;;  %3140 = vmatpush.bf16.msra.mxu1 %v6086_v10  ;;  %v6247_v10 = vld [vmem:[#allocation5 + $0x1f8] sm:$0xf0]  ;;  %v9998_v13 = vpop.f32.mrf.mxu0 }
 0x1b3   :  { %v8868_v20 = vld [vmem:[#allocation5 + $0x74] sm:$0xf0]  ;;  %v6503_v12 = vld [vmem:[#allocation5 + $0x3f8] sm:$0xf0] }
 0x1b4   :  { %v6565_v21 = vld [vmem:[#allocation5 + $0x458] sm:$0xf]  ;;  %3181 = vmatpush.bf16.msrb.mxu2 %v6886_v5  ;;  %v6054_v30 = vor.u32 %v8868_v20, %v6053_v19  ;;  %3168 = vmatpush.bf16.msra.mxu0 %v6598_v18  ;;  %v8912_v5 = vld [vmem:[#allocation5 + $0x1dc] sm:$0xf] }
 0x1b5   :  { %v8996_v22 = vld [vmem:[#allocation5 + $0x474] sm:$0xf0] }
 0x1b6   :  { %v6309_v26 = vld [vmem:[#allocation5 + $0x258] sm:$0xf]  ;;  %v6566_v35 = vor.u32 %v8996_v22, %v6565_v21  ;;  %3154 = vmatpush.bf16.msrb.mxu3 %v6342_v24  ;;  %3141 = vmatpush.bf16.msra.mxu1 %v6054_v30  ;;  %v6250_v24 = vor.u32 %v8912_v5, %v6247_v10 }
 0x1b7   :  { %v8932_v31 = vld [vmem:[#allocation5 + $0x274] sm:$0xf0] }
 0x1b8   :  { %v6821_v32 = vld [vmem:[#allocation5 + $0x658] sm:$0xf]  ;;  %3182 = vmatpush.bf16.msrb.mxu2 %v6854_v25  ;;  %v6310_v50 = vor.u32 %v8932_v31, %v6309_v26  ;;  %3169 = vmatpush.bf16.msra.mxu0 %v6566_v35  ;;  %v6506_v25 = vor.u32 %v8976_v11, %v6503_v12  ;;  %v8904_v31 = vld [vmem:[#allocation5 + $0x19c] sm:$0xf] }
 0x1b9   :  { %v9060_v33 = vld [vmem:[#allocation5 + $0x674] sm:$0xf0]  ;;  %v8968_v35 = vld [vmem:[#allocation5 + $0x39c] sm:$0xf] }
 0x1ba   :  { %v6021_v36 = vld [vmem:[#allocation5 + $0x18] sm:$0xf]  ;;  %v6822_v52 = vor.u32 %v9060_v33, %v6821_v32  ;;  %3155 = vmatpush.bf16.msrb.mxu3 %v6310_v50  ;;  %v6215_v33 = vld [vmem:[#allocation5 + $0x1b8] sm:$0xf0]  ;;  %v10010_v5 = vpop.f32.mrf.mxu0 }
 0x1bb   :  { %v8860_v37 = vld [vmem:[#allocation5 + $0x34] sm:$0xf0]  ;;  %v6218_v50 = vor.u32 %v8904_v31, %v6215_v33 }
 0x1bc   :  { %v6533_v39 = vld [vmem:[#allocation5 + $0x418] sm:$0xf]  ;;  %v6022_v59 = vor.u32 %v8860_v37, %v6021_v36  ;;  %3183 = vmatpush.bf16.msrb.mxu2 %v6822_v52  ;;  %v6471_v36 = vld [vmem:[#allocation5 + $0x3b8] sm:$0xf0]  ;;  %v10000_v37 = vpop.f32.mrf.mxu2 }
 0x1bd   :  { %v8988_v40 = vld [vmem:[#allocation5 + $0x434] sm:$0xf0]  ;;  %v6474_v52 = vor.u32 %v8968_v35, %v6471_v36  ;;  %v8880_v36 = vld [vmem:[#allocation5 + $0xdc] sm:$0xf] }
 0x1be   :  { %v7269_v41 = vld [vmem:[#allocation5 + $0x9d8] sm:$0xf]  ;;  %v6534_v0 = vor.u32 %v8988_v40, %v6533_v39  ;;  %3142 = vmatpush.bf16.msra.mxu1 %v6022_v59 }
 0x1bf   :  { %v9172_v45 = vld [vmem:[#allocation5 + $0x9f4] sm:$0xf0] }
 0x1c0   :  { %v6277_v53 = vld [vmem:[#allocation5 + $0x218] sm:$0xf]  ;;  %v7270_v2 = vor.u32 %v9172_v45, %v7269_v41  ;;  %3170 = vmatpush.bf16.msra.mxu0 %v6534_v0  ;;  %v10003_v45 = vpop.f32.mrf.mxu3  ;;  %v10006_v0 = vpop.f32.mrf.mxu1 }
 0x1c1   :  { %v7557_v27 = vld [vmem:[#allocation5 + $0xc18] sm:$0xf]  ;;  %10329 = vst [vmem:[#allocation23_spill] sm:$0xff] %v10003_v45  ;;  %3143 = vmatmul.bf16.vlgmr.msra.gmra.mxu1 %v9889_v56 }
 0x1c2   :  { %v9244_v54 = vld [vmem:[#allocation5 + $0xc34] sm:$0xf0]  ;;  %3191 = vmatpush.bf16.msrb.mxu1 %v7270_v2 }
 0x1c3   :  { %v8924_v58 = vld [vmem:[#allocation5 + $0x234] sm:$0xf0]  ;;  %v7558_v7 = vor.u32 %v9244_v54, %v7557_v27  ;;  %3171 = vmatmul.bf16.vlgmr.msra.gmra.mxu0 %v9887_v55  ;;  %v8896_v54 = vld [vmem:[#allocation5 + $0x15c] sm:$0xf] }
 0x1c4   :  { %v6789_v8 = vld [vmem:[#allocation5 + $0x618] sm:$0xf]  ;;  %v6278_v18 = vor.u32 %v8924_v58, %v6277_v53  ;;  %v6183_v58 = vld [vmem:[#allocation5 + $0x178] sm:$0xf0] }
 0x1c5   :  { %v9052_v60 = vld [vmem:[#allocation5 + $0x634] sm:$0xf0]  ;;  %3226 = vmatpush.bf16.msrb.mxu0 %v7558_v7  ;;  %v6186_v7 = vor.u32 %v8896_v54, %v6183_v58  ;;  %v10018_v58 = vpop.f32.mrf.mxu0 }
 0x1c6   :  { %v7525_v3 = vld [vmem:[#allocation5 + $0xbd8] sm:$0xf]  ;;  %v6790_v19 = vor.u32 %v9052_v60, %v6789_v8  ;;  %3156 = vmatpush.bf16.msrb.mxu3 %v6278_v18  ;;  %v8960_v8 = vld [vmem:[#allocation5 + $0x35c] sm:$0xf]  ;;  %10330 = vst [vmem:[#allocation24_spill] sm:$0xff] %v10018_v58 }
 0x1c7   :  { %v9236_v4 = vld [vmem:[#allocation5 + $0xbf4] sm:$0xf0]  ;;  %v6439_v60 = vld [vmem:[#allocation5 + $0x378] sm:$0xf0] }
 0x1c8   :  { %v7237_v20 = vld [vmem:[#allocation5 + $0x998] sm:$0xf]  ;;  %v7526_v22 = vor.u32 %v9236_v4, %v7525_v3  ;;  %3184 = vmatpush.bf16.msrb.mxu2 %v6790_v19  ;;  %v6442_v10 = vor.u32 %v8960_v8, %v6439_v60  ;;  %v8888_v18 = vld [vmem:[#allocation5 + $0x11c] sm:$0xf] }
 0x1c9   :  { %v9164_v21 = vld [vmem:[#allocation5 + $0x9b4] sm:$0xf0]  ;;  %3247 = vmatpush.bf16.msra.mxu0 %v6506_v25  ;;  %3157 = vmatmul.bf16.vlgmr.msrb.gmra.mxu3 %v9895_v9  ;;  %v6567_v58 = vld [vmem:[#allocation5 + $0x478] sm:$0xf0] }
 0x1ca   :  { %v7493_v26 = vld [vmem:[#allocation5 + $0xb98] sm:$0xf]  ;;  %v7238_v32 = vor.u32 %v9164_v21, %v7237_v20  ;;  %3205 = vmatpush.bf16.msra.mxu3 %v7526_v22  ;;  %v6151_v20 = vld [vmem:[#allocation5 + $0x138] sm:$0xf0] }
 0x1cb   :  { %v9228_v30 = vld [vmem:[#allocation5 + $0xbb4] sm:$0xf0]  ;;  %3185 = vmatmul.bf16.vlgmr.msrb.gmra.mxu2 %v9891_v61  ;;  %v8952_v21 = vld [vmem:[#allocation5 + $0x31c] sm:$0xf]  ;;  %v6154_v31 = vor.u32 %v8888_v18, %v6151_v20 }
 0x1cc   :  { %v7205_v39 = vld [vmem:[#allocation5 + $0x958] sm:$0xf]  ;;  %v7494_v41 = vor.u32 %v9228_v30, %v7493_v26  ;;  %3233 = vmatpush.bf16.msra.mxu2 %v6250_v24  ;;  %3192 = vmatpush.bf16.msrb.mxu1 %v7238_v32  ;;  %v6407_v22 = vld [vmem:[#allocation5 + $0x338] sm:$0xf0]  ;;  %v10012_v30 = vpop.f32.mrf.mxu2 }
 0x1cd   :  { %v9156_v40 = vld [vmem:[#allocation5 + $0x974] sm:$0xf0]  ;;  %3248 = vmatpush.bf16.msra.mxu0 %v6474_v52  ;;  %v6410_v32 = vor.u32 %v8952_v21, %v6407_v22  ;;  %v10014_v52 = vpop.f32.mrf.mxu3 }
 0x1ce   :  { %v7461_v53 = vld [vmem:[#allocation5 + $0xb58] sm:$0xf]  ;;  %v7206_v59 = vor.u32 %v9156_v40, %v7205_v39  ;;  %3206 = vmatpush.bf16.msra.mxu3 %v7494_v41  ;;  %v6119_v40 = vld [vmem:[#allocation5 + $0xf8] sm:$0xf0] }
 0x1cf   :  { %v9220_v27 = vld [vmem:[#allocation5 + $0xb74] sm:$0xf0]  ;;  %v8944_v41 = vld [vmem:[#allocation5 + $0x2dc] sm:$0xf]  ;;  %v6122_v8 = vor.u32 %v8880_v36, %v6119_v40 }
 0x1d0   :  { %v7173_v2 = vld [vmem:[#allocation5 + $0x918] sm:$0xf]  ;;  %v7462_v4 = vor.u32 %v9220_v27, %v7461_v53  ;;  %3234 = vmatpush.bf16.msra.mxu2 %v6218_v50  ;;  %3193 = vmatpush.bf16.msrb.mxu1 %v7206_v59  ;;  %v6375_v50 = vld [vmem:[#allocation5 + $0x2f8] sm:$0xf0]  ;;  %v10016_v53 = vpop.f32.mrf.mxu1 }
 0x1d1   :  { %v9148_v3 = vld [vmem:[#allocation5 + $0x934] sm:$0xf0]  ;;  %3249 = vmatpush.bf16.msra.mxu0 %v6442_v10  ;;  %v6378_v60 = vor.u32 %v8944_v41, %v6375_v50  ;;  %v6087_v10 = vld [vmem:[#allocation5 + $0xb8] sm:$0xf0] }
 0x1d2   :  { %v7429_v11 = vld [vmem:[#allocation5 + $0xb18] sm:$0xf]  ;;  %v7174_v19 = vor.u32 %v9148_v3, %v7173_v2  ;;  %3207 = vmatpush.bf16.msra.mxu3 %v7462_v4  ;;  %v8872_v4 = vld [vmem:[#allocation5 + $0x9c] sm:$0xf] }
 0x1d3   :  { %v9212_v12 = vld [vmem:[#allocation5 + $0xb34] sm:$0xf0]  ;;  %7569 = vmatmul.msk.bf16.vlgmr.msrb.gmra.mxu0 %vm2543_vm0, %v9899_v51  ;;  %v6090_v22 = vor.u32 %v8872_v4, %v6087_v10  ;;  %v6311_v36 = vld [vmem:[#allocation5 + $0x278] sm:$0xf0] }
 0x1d4   :  { %v7141_v24 = vld [vmem:[#allocation5 + $0x8d8] sm:$0xf]  ;;  %v7430_v26 = vor.u32 %v9212_v12, %v7429_v11  ;;  %3235 = vmatpush.bf16.msra.mxu2 %v6186_v7  ;;  %3194 = vmatpush.bf16.msrb.mxu1 %v7174_v19  ;;  %v8936_v11 = vld [vmem:[#allocation5 + $0x29c] sm:$0xf]  ;;  %v10022_v21 = vpop.f32.mrf.mxu2 }
 0x1d5   :  { %v9140_v25 = vld [vmem:[#allocation5 + $0x8f4] sm:$0xf0]  ;;  %3250 = vmatpush.bf16.msra.mxu0 %v6410_v32  ;;  %v6343_v12 = vld [vmem:[#allocation5 + $0x2b8] sm:$0xf0] }
 0x1d6   :  { %v7397_v33 = vld [vmem:[#allocation5 + $0xad8] sm:$0xf]  ;;  %v7142_v39 = vor.u32 %v9140_v25, %v7141_v24  ;;  %3208 = vmatpush.bf16.msra.mxu3 %v7430_v26  ;;  %v6346_v24 = vor.u32 %v8936_v11, %v6343_v12  ;;  %v9040_v50 = vld [vmem:[#allocation5 + $0x5dc] sm:$0xf] }
 0x1d7   :  { %v9204_v35 = vld [vmem:[#allocation5 + $0xaf4] sm:$0xf0]  ;;  %v8856_v4 = vld [vmem:[#allocation5 + $0x1c] sm:$0xf] }
 0x1d8   :  { %v7109_v27 = vld [vmem:[#allocation5 + $0x898] sm:$0xf]  ;;  %v7398_v59 = vor.u32 %v9204_v35, %v7397_v33  ;;  %3236 = vmatpush.bf16.msra.mxu2 %v6154_v31  ;;  %3195 = vmatpush.bf16.msrb.mxu1 %v7142_v39  ;;  %v8864_v31 = vld [vmem:[#allocation5 + $0x5c] sm:$0xf] }
 0x1d9   :  { %v9132_v54 = vld [vmem:[#allocation5 + $0x8b4] sm:$0xf0]  ;;  %3251 = vmatpush.bf16.msra.mxu0 %v6378_v60  ;;  %v6055_v33 = vld [vmem:[#allocation5 + $0x78] sm:$0xf0] }
 0x1da   :  { %v7365_v2 = vld [vmem:[#allocation5 + $0xa98] sm:$0xf]  ;;  %v7110_v7 = vor.u32 %v9132_v54, %v7109_v27  ;;  %3209 = vmatpush.bf16.msra.mxu3 %v7398_v59  ;;  %v8928_v35 = vld [vmem:[#allocation5 + $0x25c] sm:$0xf]  ;;  %v10024_v54 = vpop.f32.mrf.mxu3  ;;  %v10026_v59 = vpop.f32.mrf.mxu1 }
 0x1db   :  { %v9196_v3 = vld [vmem:[#allocation5 + $0xab4] sm:$0xf0]  ;;  %v6759_v27 = vld [vmem:[#allocation5 + $0x5f8] sm:$0xf0]  ;;  %v6314_v60 = vor.u32 %v8928_v35, %v6311_v36 }
 0x1dc   :  { %v7077_v18 = vld [vmem:[#allocation5 + $0x858] sm:$0xf]  ;;  %v7366_v20 = vor.u32 %v9196_v3, %v7365_v2  ;;  %3237 = vmatpush.bf16.msra.mxu2 %v6122_v8  ;;  %3196 = vmatpush.bf16.msrb.mxu1 %v7110_v7  ;;  %v6058_v8 = vor.u32 %v8864_v31, %v6055_v33  ;;  %v6023_v10 = vld [vmem:[#allocation5 + $0x38] sm:$0xf0] }
 0x1dd   :  { %v9124_v19 = vld [vmem:[#allocation5 + $0x874] sm:$0xf0]  ;;  %3252 = vmatpush.bf16.msra.mxu0 %v6346_v24  ;;  %v8920_v11 = vld [vmem:[#allocation5 + $0x21c] sm:$0xf]  ;;  %v6026_v33 = vor.u32 %v8856_v4, %v6023_v10 }
 0x1de   :  { %v7333_v25 = vld [vmem:[#allocation5 + $0xa58] sm:$0xf]  ;;  %v7078_v32 = vor.u32 %v9124_v19, %v7077_v18  ;;  %3210 = vmatpush.bf16.msra.mxu3 %v7366_v20  ;;  %v6279_v12 = vld [vmem:[#allocation5 + $0x238] sm:$0xf0]  ;;  %v10028_v18 = vpop.f32.mrf.mxu0  ;;  %v6762_v19 = vor.u32 %v9040_v50, %v6759_v27 }
 0x1df   :  { %v9188_v26 = vld [vmem:[#allocation5 + $0xa74] sm:$0xf0]  ;;  %10331 = vst [vmem:[#allocation25_spill] sm:$0xff] %v10028_v18  ;;  %v9104_v20 = vld [vmem:[#allocation5 + $0x7dc] sm:$0xf]  ;;  %v6282_v36 = vor.u32 %v8920_v11, %v6279_v12 }
 0x1e0   :  { %v7045_v39 = vld [vmem:[#allocation5 + $0x818] sm:$0xf]  ;;  %v7334_v41 = vor.u32 %v9188_v26, %v7333_v25  ;;  %3238 = vmatpush.bf16.msra.mxu2 %v6090_v22  ;;  %3197 = vmatpush.bf16.msrb.mxu1 %v7078_v32  ;;  %v7015_v25 = vld [vmem:[#allocation5 + $0x7f8] sm:$0xf0] }
 0x1e1   :  { %v9116_v40 = vld [vmem:[#allocation5 + $0x834] sm:$0xf0]  ;;  %v9168_v26 = vld [vmem:[#allocation5 + $0x9dc] sm:$0xf]  ;;  %3253 = vmatpush.bf16.msra.mxu0 %v6314_v60 }
 0x1e2   :  { %v7301_v2 = vld [vmem:[#allocation5 + $0xa18] sm:$0xf]  ;;  %v7046_v7 = vor.u32 %v9116_v40, %v7045_v39  ;;  %3211 = vmatpush.bf16.msra.mxu3 %v7334_v41  ;;  %v7271_v22 = vld [vmem:[#allocation5 + $0x9f8] sm:$0xf0]  ;;  %v7018_v39 = vor.u32 %v9104_v20, %v7015_v25  ;;  %v10030_v40 = vpop.f32.mrf.mxu2  ;;  %v10032_v60 = vpop.f32.mrf.mxu3 }
 0x1e3   :  { %v9180_v3 = vld [vmem:[#allocation5 + $0xa34] sm:$0xf0]  ;;  %v9232_v24 = vld [vmem:[#allocation5 + $0xbdc] sm:$0xf]  ;;  %v7274_v50 = vor.u32 %v9168_v26, %v7271_v22  ;;  %v10034_v4 = vpop.f32.mrf.mxu1 }
 0x1e4   :  { %v7302_v46 = vor.u32 %v9180_v3, %v7301_v2  ;;  %v7527_v31 = vld [vmem:[#allocation5 + $0xbf8] sm:$0xf0]  ;;  %3239 = vmatpush.bf16.msra.mxu2 %v6058_v8  ;;  %3198 = vmatpush.bf16.msrb.mxu1 %v7046_v7 }
 0x1e5   :  { %v9032_v35 = vld [vmem:[#allocation5 + $0x59c] sm:$0xf]  ;;  %v7530_v27 = vor.u32 %v9232_v24, %v7527_v31  ;;  %3254 = vmatpush.bf16.msra.mxu0 %v6282_v36 }
 0x1e6   :  { %v6727_v32 = vld [vmem:[#allocation5 + $0x5b8] sm:$0xf0]  ;;  %3212 = vmatpush.bf16.msra.mxu3 %v7302_v46  ;;  %v10037_v12 = vpop.f32.mrf.mxu0 }
 0x1e7   :  { %v6983_v51 = vld [vmem:[#allocation5 + $0x7b8] sm:$0xf0]  ;;  %v6730_v2 = vor.u32 %v9032_v35, %v6727_v32  ;;  %3199 = vmatmul.bf16.vlgmr.msrb.gmra.mxu1 %v9903_v38 }
 0x1e8   :  { %3261 = vmatpush.bf16.msra.mxu1 %v6762_v19  ;;  %v9160_v41 = vld [vmem:[#allocation5 + $0x99c] sm:$0xf]  ;;  %3240 = vmatpush.bf16.msra.mxu2 %v6026_v33  ;;  %v6986_v11 = vor.u32 %v9096_v15, %v6983_v51 }
 0x1e9   :  { %v7239_v3 = vld [vmem:[#allocation5 + $0x9b8] sm:$0xf0]  ;;  %3303 = vmatpush.bf16.msrb.mxu0 %v7530_v27  ;;  %3213 = vmatmul.bf16.vlgmr.msra.gmra.mxu3 %v9905_v43 }
 0x1ea   :  { %v9224_v18 = vld [vmem:[#allocation5 + $0xb9c] sm:$0xf]  ;;  %3275 = vmatpush.bf16.msrb.mxu3 %v7018_v39  ;;  %v7242_v46 = vor.u32 %v9160_v41, %v7239_v3  ;;  %3255 = vmatmul.bf16.vlgmr.msra.gmra.mxu0 %v9895_v9 }
 0x1eb   :  { %v7495_v8 = vld [vmem:[#allocation5 + $0xbb8] sm:$0xf0]  ;;  %3241 = vmatmul.bf16.vlgmr.msra.gmra.mxu2 %v9889_v56 }
 0x1ec   :  { %v9024_v7 = vld [vmem:[#allocation5 + $0x55c] sm:$0xf]  ;;  %3289 = vmatpush.bf16.msrb.mxu2 %v7274_v50  ;;  %v7498_v19 = vor.u32 %v9224_v18, %v7495_v8  ;;  %3262 = vmatpush.bf16.msra.mxu1 %v6730_v2  ;;  %v10042_v8 = vpop.f32.mrf.mxu2 }
 0x1ed   :  { %v6695_v10 = vld [vmem:[#allocation5 + $0x578] sm:$0xf0]  ;;  %10332 = vst [vmem:[#allocation26_spill] sm:$0xff] %v10042_v8 }
 0x1ee   :  { %v9088_v20 = vld [vmem:[#allocation5 + $0x75c] sm:$0xf]  ;;  %v6698_v22 = vor.u32 %v9024_v7, %v6695_v10  ;;  %3276 = vmatpush.bf16.msrb.mxu3 %v6986_v11  ;;  %3304 = vmatpush.bf16.msrb.mxu0 %v7498_v19  ;;  %v10044_v10 = vpop.f32.mrf.mxu3  ;;  %v10046_v11 = vpop.f32.mrf.mxu1 }
 0x1ef   :  { %v6951_v25 = vld [vmem:[#allocation5 + $0x778] sm:$0xf0]  ;;  %10333 = vst [vmem:[#allocation27_spill] sm:$0xff] %v10044_v10 }
 0x1f0   :  { %v9152_v26 = vld [vmem:[#allocation5 + $0x95c] sm:$0xf]  ;;  %v6954_v51 = vor.u32 %v9088_v20, %v6951_v25  ;;  %3290 = vmatpush.bf16.msrb.mxu2 %v7242_v46  ;;  %3263 = vmatpush.bf16.msra.mxu1 %v6698_v22 }
 0x1f1   :  { %v7207_v24 = vld [vmem:[#allocation5 + $0x978] sm:$0xf0] }
 0x1f2   :  { %v9216_v31 = vld [vmem:[#allocation5 + $0xb5c] sm:$0xf]  ;;  %v7210_v15 = vor.u32 %v9152_v26, %v7207_v24  ;;  %3277 = vmatpush.bf16.msrb.mxu3 %v6954_v51 }
 0x1f3   :  { %v7463_v33 = vld [vmem:[#allocation5 + $0xb78] sm:$0xf0] }
 0x1f4   :  { %v9016_v35 = vld [vmem:[#allocation5 + $0x51c] sm:$0xf]  ;;  %v7466_v18 = vor.u32 %v9216_v31, %v7463_v33  ;;  %3291 = vmatpush.bf16.msrb.mxu2 %v7210_v15 }
 0x1f5   :  { %v6663_v32 = vld [vmem:[#allocation5 + $0x538] sm:$0xf0] }
 0x1f6   :  { %v9080_v36 = vld [vmem:[#allocation5 + $0x71c] sm:$0xf]  ;;  %v6666_v27 = vor.u32 %v9016_v35, %v6663_v32  ;;  %3305 = vmatpush.bf16.msrb.mxu0 %v7466_v18  ;;  %v10048_v35 = vpop.f32.mrf.mxu0 }
 0x1f7   :  { %v6919_v39 = vld [vmem:[#allocation5 + $0x738] sm:$0xf0] }
 0x1f8   :  { %v9144_v50 = vld [vmem:[#allocation5 + $0x91c] sm:$0xf]  ;;  %v6922_v9 = vor.u32 %v9080_v36, %v6919_v39  ;;  %3264 = vmatpush.bf16.msra.mxu1 %v6666_v27 }
 0x1f9   :  { %v7175_v41 = vld [vmem:[#allocation5 + $0x938] sm:$0xf0] }
 0x1fa   :  { %v9208_v2 = vld [vmem:[#allocation5 + $0xb1c] sm:$0xf]  ;;  %v7178_v46 = vor.u32 %v9144_v50, %v7175_v41  ;;  %3278 = vmatpush.bf16.msrb.mxu3 %v6922_v9  ;;  %v10053_v9 = vld [vmem:[#allocation7] sm:$0xff] }
 0x1fb   :  { %v7431_v3 = vld [vmem:[#allocation5 + $0xb38] sm:$0xf0] }
 0x1fc   :  { %v9008_v7 = vld [vmem:[#allocation5 + $0x4dc] sm:$0xf]  ;;  %v7434_v19 = vor.u32 %v9208_v2, %v7431_v3  ;;  %3292 = vmatpush.bf16.msrb.mxu2 %v7178_v46  ;;  %v569_v46 = vperm.slane %v10053_v9, 2 }
 0x1fd   :  { %v6631_v56 = vld [vmem:[#allocation5 + $0x4f8] sm:$0xf0] }
 0x1fe   :  { %v9072_v20 = vld [vmem:[#allocation5 + $0x6dc] sm:$0xf]  ;;  %v6634_v22 = vor.u32 %v9008_v7, %v6631_v56  ;;  %3306 = vmatpush.bf16.msrb.mxu0 %v7434_v19  ;;  %v10334_v56 = vperm.slane %v9924_v1, 0 }
 0x1ff   :  { %v6887_v25 = vld [vmem:[#allocation5 + $0x6f8] sm:$0xf0] }
 0x200   :  { %v9136_v26 = vld [vmem:[#allocation5 + $0x8dc] sm:$0xf]  ;;  %v6890_v36 = vor.u32 %v9072_v20, %v6887_v25  ;;  %3265 = vmatpush.bf16.msra.mxu1 %v6634_v22  ;;  %v2559_v34 = vadd.f32 %v9936_v44, %v10334_v56  ;;  %v10056_v20 = vpop.f32.mrf.mxu3  ;;  %v10058_v25 = vpop.f32.mrf.mxu2 }
 0x201   :  { %v7143_v24 = vld [vmem:[#allocation5 + $0x8f8] sm:$0xf0]  ;;  %10335 = vst [vmem:[#allocation28_spill] sm:$0xff] %v10058_v25 }
 0x202   :  { %v9200_v31 = vld [vmem:[#allocation5 + $0xadc] sm:$0xf]  ;;  %v7146_v15 = vor.u32 %v9136_v26, %v7143_v24  ;;  %3279 = vmatpush.bf16.msrb.mxu3 %v6890_v36  ;;  %v2573_v45 = vadd.f32 %v9938_v49, %v2559_v34  ;;  %v10061_v36 = vpop.f32.mrf.mxu1 }
 0x203   :  { %v7399_v33 = vld [vmem:[#allocation5 + $0xaf8] sm:$0xf0]  ;;  %10336 = vst [vmem:[#allocation29_spill] sm:$0xff] %v10061_v36 }
 0x204   :  { %v9000_v32 = vld [vmem:[#allocation5 + $0x49c] sm:$0xf]  ;;  %v7402_v18 = vor.u32 %v9200_v31, %v7399_v33  ;;  %3293 = vmatpush.bf16.msrb.mxu2 %v7146_v15 }
 0x205   :  { %v6599_v51 = vld [vmem:[#allocation5 + $0x4b8] sm:$0xf0] }
 0x206   :  { %v9064_v39 = vld [vmem:[#allocation5 + $0x69c] sm:$0xf]  ;;  %v6602_v2 = vor.u32 %v9000_v32, %v6599_v51  ;;  %3307 = vmatpush.bf16.msrb.mxu0 %v7402_v18 }
 0x207   :  { %v6855_v50 = vld [vmem:[#allocation5 + $0x6b8] sm:$0xf0] }
 0x208   :  { %v9128_v41 = vld [vmem:[#allocation5 + $0x89c] sm:$0xf]  ;;  %v6858_v19 = vor.u32 %v9064_v39, %v6855_v50  ;;  %3266 = vmatpush.bf16.msra.mxu1 %v6602_v2 }
 0x209   :  { %v7111_v27 = vld [vmem:[#allocation5 + $0x8b8] sm:$0xf0] }
 0x20a   :  { %v9192_v3 = vld [vmem:[#allocation5 + $0xa9c] sm:$0xf]  ;;  %v7114_v26 = vor.u32 %v9128_v41, %v7111_v27  ;;  %3280 = vmatpush.bf16.msrb.mxu3 %v6858_v19  ;;  %v10063_v41 = vpop.f32.mrf.mxu0  ;;  %v2587_v19 = vadd.f32 %v9934_v17, %v2573_v45  ;;  %v8069_v45 = vld [vmem:[#allocation8 + $0x3e0] sm:$0xf] }
 0x20b   :  { %v7367_v7 = vld [vmem:[#allocation5 + $0xab8] sm:$0xf0]  ;;  %10337 = vst [vmem:[#allocation30_spill] sm:$0xff] %v10063_v41  ;;  %v7941_v41 = vld [vmem:[#allocation8 + $0x2e0] sm:$0xf] }
 0x20c   :  { %v8992_v8 = vld [vmem:[#allocation5 + $0x45c] sm:$0xf]  ;;  %v7370_v22 = vor.u32 %v9192_v3, %v7367_v7  ;;  %3294 = vmatpush.bf16.msrb.mxu2 %v7114_v26  ;;  %v2753_v7 = vadd.f32 %v9996_v63, %v569_v46  ;;  %v9339_v63 = vld [vmem:[#allocation8 + $0x2ec] sm:$0xf0] }
 0x20d   :  { %v9056_v24 = vld [vmem:[#allocation5 + $0x65c] sm:$0xf]  ;;  %v6570_v44 = vor.u32 %v8992_v8, %v6567_v58 }
 0x20e   :  { %v6823_v31 = vld [vmem:[#allocation5 + $0x678] sm:$0xf0]  ;;  %3308 = vmatpush.bf16.msrb.mxu0 %v7370_v22  ;;  %v7685_v22 = vld [vmem:[#allocation8 + $0xe0] sm:$0xf] }
 0x20f   :  { %v9120_v33 = vld [vmem:[#allocation5 + $0x85c] sm:$0xf]  ;;  %v6826_v25 = vor.u32 %v9056_v24, %v6823_v31  ;;  %3267 = vmatpush.bf16.msra.mxu1 %v6570_v44  ;;  %v10338_v24 = vperm.slane %v9924_v1, 1  ;;  %v2755_v44 = vadd.f32 %v10006_v0, %v569_v46  ;;  %v9371_v1 = vld [vmem:[#allocation8 + $0x3ec] sm:$0xf0]  ;;  %v7942_v46 = vor.u32 %v9339_v63, %v7941_v41 }
 0x210   :  { %v7079_v32 = vld [vmem:[#allocation5 + $0x878] sm:$0xf0]  ;;  %v8053_v41 = vld [vmem:[#allocation8 + $0x3c0] sm:$0xf] }
 0x211   :  { %v9184_v51 = vld [vmem:[#allocation5 + $0xa5c] sm:$0xf]  ;;  %v7082_v27 = vor.u32 %v9120_v33, %v7079_v32  ;;  %v2657_v31 = vadd.f32 %v9965_v28, %v10338_v24  ;;  %v9275_v33 = vld [vmem:[#allocation8 + $0xec] sm:$0xf0]  ;;  %v7813_v32 = vld [vmem:[#allocation8 + $0x1e0] sm:$0xf]  ;;  %3281 = vmatpush.bf16.msrb.mxu3 %v6826_v25  ;;  %v2767_v28 = vadd.f32 %v10014_v52, %v2753_v7  ;;  %v8070_v52 = vor.u32 %v9371_v1, %v8069_v45 }
 0x212   :  { %v7335_v56 = vld [vmem:[#allocation5 + $0xa78] sm:$0xf0]  ;;  %v7686_v25 = vor.u32 %v9275_v33, %v7685_v22  ;;  %v9303_v7 = vld [vmem:[#allocation8 + $0x1cc] sm:$0xf0]  ;;  %v10088_v22 = vpop.f32.mrf.mxu0 }
 0x213   :  { %v8984_v39 = vld [vmem:[#allocation5 + $0x41c] sm:$0xf]  ;;  %v7338_v2 = vor.u32 %v9184_v51, %v7335_v56  ;;  %v9307_v56 = vld [vmem:[#allocation8 + $0x1ec] sm:$0xf0]  ;;  %3295 = vmatpush.bf16.msrb.mxu2 %v7082_v27  ;;  %v7669_v27 = vld [vmem:[#allocation8 + $0xc0] sm:$0xf] }
 0x214   :  { %v6535_v50 = vld [vmem:[#allocation5 + $0x438] sm:$0xf0]  ;;  %v7814_v0 = vor.u32 %v9307_v56, %v7813_v32  ;;  %v9367_v24 = vld [vmem:[#allocation8 + $0x3cc] sm:$0xf0]  ;;  %v7781_v32 = vld [vmem:[#allocation8 + $0x1a0] sm:$0xf] }
 0x215   :  { %v9240_v15 = vld [vmem:[#allocation5 + $0xc1c] sm:$0xf]  ;;  %v6538_v49 = vor.u32 %v8984_v39, %v6535_v50  ;;  %v10071_v39 = vpop.f32.mrf.mxu2  ;;  %3309 = vmatpush.bf16.msrb.mxu0 %v7338_v2  ;;  %v570_v50 = vperm.slane %v10053_v9, 3  ;;  %v9271_v2 = vld [vmem:[#allocation8 + $0xcc] sm:$0xf0] }
 0x216   :  { %v7559_v18 = vld [vmem:[#allocation5 + $0xc38] sm:$0xf0]  ;;  %v9267_v33 = vld [vmem:[#allocation8 + $0xac] sm:$0xf0] }
 0x217   :  { %v9048_v58 = vld [vmem:[#allocation5 + $0x61c] sm:$0xf]  ;;  %v7562_v26 = vor.u32 %v9240_v15, %v7559_v18  ;;  %3268 = vmatpush.bf16.msra.mxu1 %v6538_v49  ;;  %v2601_v18 = vadd.f32 %v9944_v14, %v2587_v19  ;;  %v7925_v49 = vld [vmem:[#allocation8 + $0x2c0] sm:$0xf]  ;;  %v10083_v19 = vpop.f32.mrf.mxu1  ;;  %v9331_v56 = vld [vmem:[#allocation8 + $0x2ac] sm:$0xf0] }
 0x218   :  { %v6791_v8 = vld [vmem:[#allocation5 + $0x638] sm:$0xf0]  ;;  %v9363_v45 = vld [vmem:[#allocation8 + $0x3ac] sm:$0xf0] }
 0x219   :  { %v9112_v3 = vld [vmem:[#allocation5 + $0x81c] sm:$0xf]  ;;  %v6794_v51 = vor.u32 %v9048_v58, %v6791_v8  ;;  %v2671_v58 = vadd.f32 %v9969_v42, %v2657_v31  ;;  %v10077_v8 = vpop.f32.mrf.mxu3  ;;  %v2769_v42 = vadd.f32 %v10024_v54, %v2755_v44  ;;  %v2851_v31 = vadd.f32 %v10022_v21, %v570_v50  ;;  %v7653_v54 = vld [vmem:[#allocation8 + $0xa0] sm:$0xf] }
 0x21a   :  { %v7047_v34 = vld [vmem:[#allocation5 + $0x838] sm:$0xf0]  ;;  %3269 = vmatmul.bf16.vlgmr.msra.gmra.mxu1 %v9887_v55  ;;  %v7909_v21 = vld [vmem:[#allocation8 + $0x2a0] sm:$0xf] }
 0x21b   :  { %v9176_v36 = vld [vmem:[#allocation5 + $0xa1c] sm:$0xf]  ;;  %v7050_v17 = vor.u32 %v9112_v3, %v7047_v34  ;;  %3324 = vmatpush.bf16.msrb.mxu1 %v7562_v26  ;;  %v7797_v3 = vld [vmem:[#allocation8 + $0x1c0] sm:$0xf]  ;;  %v2853_v34 = vadd.f32 %v10030_v40, %v570_v50  ;;  %3282 = vmatpush.bf16.msrb.mxu3 %v6794_v51  ;;  %v2685_v14 = vadd.f32 %v9992_v23, %v2671_v58  ;;  %v9299_v51 = vld [vmem:[#allocation8 + $0x1ac] sm:$0xf0] }
 0x21c   :  { %v7303_v10 = vld [vmem:[#allocation5 + $0xa38] sm:$0xf0]  ;;  %v2781_v40 = vadd.f32 %v9998_v13, %v2767_v28  ;;  %v7670_v26 = vor.u32 %v9271_v2, %v7669_v27  ;;  %v8054_v13 = vor.u32 %v9367_v24, %v8053_v41  ;;  %v2783_v44 = vadd.f32 %v10010_v5, %v2769_v42  ;;  %v7637_v5 = vld [vmem:[#allocation8 + $0x80] sm:$0xf]  ;;  %v9295_v58 = vld [vmem:[#allocation8 + $0x18c] sm:$0xf0] }
 0x21d   :  { %v7306_v15 = vor.u32 %v9176_v36, %v7303_v10  ;;  %v9335_v10 = vld [vmem:[#allocation8 + $0x2cc] sm:$0xf0]  ;;  %v2615_v36 = vadd.f32 %v9958_v57, %v2601_v18  ;;  %3296 = vmatpush.bf16.msrb.mxu2 %v7050_v17  ;;  %v7798_v57 = vor.u32 %v9303_v7, %v7797_v3  ;;  %v2867_v55 = vadd.f32 %v10048_v35, %v2853_v34  ;;  %v8037_v17 = vld [vmem:[#allocation8 + $0x3a0] sm:$0xf] }
 0x21e   :  { %v7926_v23 = vor.u32 %v9335_v10, %v7925_v49  ;;  %3283 = vmatmul.bf16.vlgmr.msrb.gmra.mxu3 %v9891_v61  ;;  %v2699_v1 = vadd.f32 %v9988_v16, %v2685_v14  ;;  %v2795_v35 = vadd.f32 %v10000_v37, %v2781_v40  ;;  %v2865_v61 = vadd.f32 %v10037_v12, %v2851_v31  ;;  %v7621_v14 = vld [vmem:[#allocation8 + $0x60] sm:$0xf]  ;;  %v9259_v42 = vld [vmem:[#allocation8 + $0x6c] sm:$0xf0] }
 0x21f   :  { %3310 = vmatpush.bf16.msrb.mxu0 %v7306_v15  ;;  %4933 = vmatpush.bf16.msra.mxu3 %v7686_v25  ;;  %v2629_v63 = vadd.f32 %v9960_v6, %v2615_v36  ;;  %v7654_v28 = vor.u32 %v9267_v33, %v7653_v54  ;;  %v10101_v15 = vpop.f32.mrf.mxu2  ;;  %v7782_v6 = vor.u32 %v9299_v51, %v7781_v32  ;;  %v7765_v25 = vld [vmem:[#allocation8 + $0x180] sm:$0xf]  ;;  %v10107_v27 = vmul.f32 0.2, %v9949_v62  ;;  %v10113_v34 = vpop.f32.mrf.mxu1  ;;  %v9323_v31 = vld [vmem:[#allocation8 + $0x26c] sm:$0xf0] }
 0x220   :  { %4947 = vmatpush.bf16.msra.mxu1 %v7814_v0  ;;  %3297 = vmatmul.bf16.vlgmr.msrb.gmra.mxu2 %v9903_v38  ;;  %v7910_v38 = vor.u32 %v9331_v56, %v7909_v21  ;;  %v2713_v18 = vadd.f32 %v9975_v47, %v2699_v1  ;;  %v2809_v16 = vadd.f32 %v10016_v53, %v2795_v35  ;;  %v7893_v0 = vld [vmem:[#allocation8 + $0x280] sm:$0xf]  ;;  %v10119_v36 = vpop.f32.mrf.mxu0  ;;  %v9355_v54 = vld [vmem:[#allocation8 + $0x36c] sm:$0xf0]  ;;  %v10340_v33 = vld [vmem:[#allocation23_spill] sm:$0xff] }
 0x221   :  { %4961 = vmatpush.bf16.msra.mxu2 %v7942_v46  ;;  %v10099_v50 = vpop.f32.mrf.mxu3  ;;  %v2881_v37 = vadd.f32 %v10046_v11, %v2867_v55  ;;  %v8038_v12 = vor.u32 %v9363_v45, %v8037_v17  ;;  %v9327_v46 = vld [vmem:[#allocation8 + $0x28c] sm:$0xf0]  ;;  %v10110_v2 = vadd.f32 %v9947_v29, %v2629_v63  ;;  %v2797_v3 = vadd.f32 %v10012_v30, %v2783_v44  ;;  %v8021_v47 = vld [vmem:[#allocation8 + $0x380] sm:$0xf] }
 0x222   :  { %3311 = vmatmul.bf16.vlgmr.msrb.gmra.mxu0 %v9905_v43  ;;  %v9263_v43 = vld [vmem:[#allocation8 + $0x8c] sm:$0xf0]  ;;  %v2823_v53 = vadd.f32 %v10032_v60, %v2809_v16  ;;  %v2879_v11 = vadd.f32 %v10034_v4, %v2865_v61  ;;  %v7766_v29 = vor.u32 %v9295_v58, %v7765_v25  ;;  %v7894_v30 = vor.u32 %v9327_v46, %v7893_v0  ;;  %v7749_v41 = vld [vmem:[#allocation8 + $0x160] sm:$0xf]  ;;  %v10345_v25 = vld [vmem:[#allocation25_spill] sm:$0xff] }
 0x223   :  { %4975 = vmatpush.bf16.msra.mxu0 %v8070_v52  ;;  %4934 = vmatpush.bf16.msra.mxu3 %v7670_v26  ;;  %v9359_v52 = vld [vmem:[#allocation8 + $0x38c] sm:$0xf0]  ;;  %v2895_v7 = vadd.f32 %v10077_v8, %v2881_v37  ;;  %v7638_v49 = vor.u32 %v9263_v43, %v7637_v5  ;;  %v2811_v10 = vadd.f32 %v10026_v59, %v2797_v3  ;;  %v7877_v40 = vld [vmem:[#allocation8 + $0x260] sm:$0xf]  ;;  %v10124_v59 = vmul.f32 0.2, %v10110_v2 }
 0x224   :  { %4948 = vmatpush.bf16.msra.mxu1 %v7798_v57  ;;  %v2727_v24 = vadd.f32 %v9994_v48, %v2713_v18  ;;  %v2893_v60 = vadd.f32 %v10056_v20, %v2879_v11  ;;  %v8022_v4 = vor.u32 %v9359_v52, %v8021_v47  ;;  %v9291_v8 = vld [vmem:[#allocation8 + $0x16c] sm:$0xf0]  ;;  %v10339_v26 = vld [vmem:[#allocation27_spill] sm:$0xff]  ;;  %v10341_v55 = vld [vmem:[#allocation24_spill] sm:$0xff]  ;;  %v7622_v51 = vor.u32 %v9259_v42, %v7621_v14 }
 0x225   :  { %4962 = vmatpush.bf16.msra.mxu2 %v7926_v23  ;;  %v2825_v57 = vadd.f32 %v10339_v26, %v2811_v10  ;;  %v8005_v23 = vld [vmem:[#allocation8 + $0x360] sm:$0xf]  ;;  %vm3339_vm1 = vcmp.gt.f32.partialorder %v10110_v2, 0.0  ;;  %v7750_v56 = vor.u32 %v9291_v8, %v7749_v41  ;;  %v7878_v63 = vor.u32 %v9323_v31, %v7877_v40  ;;  %v9255_v17 = vld [vmem:[#allocation8 + $0x4c] sm:$0xf0]  ;;  %v10346_v37 = vld [vmem:[#allocation21_spill] sm:$0xff] }
 0x226   :  { %v10128_v32 = vadd.f32 %v10340_v33, %v2727_v24  ;;  %v10342_v48 = vld [vmem:[#allocation28_spill] sm:$0xff]  ;;  %v10343_v1 = vld [vmem:[#allocation26_spill] sm:$0xff]  ;;  %v8006_v61 = vor.u32 %v9355_v54, %v8005_v23  ;;  %v571_v31 = vperm.slane %v10053_v9, 4 }
 0x227   :  { %4976 = vmatpush.bf16.msra.mxu0 %v8054_v13  ;;  %4935 = vmatpush.bf16.msra.mxu3 %v7654_v28  ;;  %v10131_v13 = vadd.f32 %v10341_v55, %v2823_v53  ;;  %v2909_v20 = vadd.f32 %v10342_v48, %v2895_v7  ;;  %v10135_v21 = vpop.f32.mrf.mxu2  ;;  %v7605_v44 = vld [vmem:[#allocation8 + $0x40] sm:$0xf]  ;;  %v2907_v35 = vadd.f32 %v10343_v1, %v2893_v60  ;;  %v9287_v28 = vld [vmem:[#allocation8 + $0x14c] sm:$0xf0]  ;;  %v10153_v52 = vpop.f32.mrf.mxu1 }
 0x228   :  { %4949 = vmatpush.bf16.msra.mxu1 %v7782_v6  ;;  %v7733_v45 = vld [vmem:[#allocation8 + $0x140] sm:$0xf]  ;;  %v10344_v5 = vld [vmem:[#allocation22_spill] sm:$0xff]  ;;  %v10142_v18 = vadd.f32 %v10345_v25, %v2825_v57  ;;  %v3356_v0 = vmul.f32 0.2, %v10128_v32  ;;  %v7606_v47 = vor.u32 %v9255_v17, %v7605_v44  ;;  %vm3340_vm4 = vcmp.gt.f32.partialorder %v10128_v32, 0.0  ;;  %v10158_v24 = vpop.f32.mrf.mxu0 }
 0x229   :  { %4963 = vmatpush.bf16.msra.mxu2 %v7910_v38  ;;  %v7861_v6 = vld [vmem:[#allocation8 + $0x240] sm:$0xf]  ;;  %v9319_v38 = vld [vmem:[#allocation8 + $0x24c] sm:$0xf0]  ;;  %v10139_v43 = vmul.f32 0.2, %v10344_v5  ;;  %v2950_v16 = vpop.f32.mrf.mxu3  ;;  %v2923_v3 = vadd.f32 %v10088_v22, %v2909_v20  ;;  %v7734_v53 = vor.u32 %v9287_v28, %v7733_v45  ;;  %v3371_v28 = vsel %vm3339_vm1, %v10110_v2, %v10124_v59 }
 0x22a   :  { %7570 = vmatmul.msk.bf16.vlgmr.msrb.gmra.mxu1 %vm2543_vm0, %v10346_v37  ;;  %v9351_v58 = vld [vmem:[#allocation8 + $0x34c] sm:$0xf0]  ;;  %v10149_v46 = vmul.f32 0.2, %v10131_v13  ;;  %vm3332_vm3 = vcmp.gt.f32.partialorder %v10344_v5, 0.0  ;;  %v7862_v11 = vor.u32 %v9319_v38, %v7861_v6  ;;  %vm3341_vm5 = vcmp.gt.f32.partialorder %v10142_v18, 0.0 }
 0x22b   :  { %4977 = vmatpush.bf16.msra.mxu0 %v8038_v12  ;;  %4936 = vmatpush.bf16.msra.mxu3 %v7638_v49  ;;  %v7989_v12 = vld [vmem:[#allocation8 + $0x340] sm:$0xf]  ;;  %v9251_v49 = vld [vmem:[#allocation8 + $0x2c] sm:$0xf0]  ;;  %v3357_v8 = vmul.f32 0.2, %v10142_v18  ;;  %v2937_v40 = vadd.f32 %v10083_v19, %v2923_v3  ;;  %v3372_v6 = vsel %vm3340_vm4, %v10128_v32, %v3356_v0  ;;  %v3363_v32 = vsel %vm3331_vm2, %v9949_v62, %v10107_v27 }
 0x22c   :  { %4950 = vmatpush.bf16.msra.mxu1 %v7766_v29  ;;  %v7589_v7 = vld [vmem:[#allocation8 + $0x20] sm:$0xf]  ;;  %v10347_v29 = vld [vmem:[#allocation30_spill] sm:$0xff]  ;;  %v7990_v14 = vor.u32 %v9351_v58, %v7989_v12  ;;  %v10348_v20 = vld [vmem:[#allocation29_spill] sm:$0xff]  ;;  %v2951_v58 = vadd.f32 %v2950_v16, %v571_v31  ;;  %vm3333_vm7 = vcmp.gt.f32.partialorder %v10131_v13, 0.0  ;;  %v2949_v62 = vadd.f32 %v10099_v50, %v571_v31 }
 0x22d   :  { %4964 = vmatpush.bf16.msra.mxu2 %v7894_v30  ;;  %v7717_v10 = vld [vmem:[#allocation8 + $0x120] sm:$0xf]  ;;  %v2921_v30 = vadd.f32 %v10347_v29, %v2907_v35  ;;  %v9283_v42 = vld [vmem:[#allocation8 + $0x12c] sm:$0xf0]  ;;  %v7590_v26 = vor.u32 %v9251_v49, %v7589_v7  ;;  %v3358_v38 = vmul.f32 0.2, %v2937_v40  ;;  %v3373_v16 = vsel %vm3341_vm5, %v10142_v18, %v3357_v8 }
 0x22e   :  { %v7845_v41 = vld [vmem:[#allocation8 + $0x220] sm:$0xf]  ;;  %v9315_v22 = vld [vmem:[#allocation8 + $0x22c] sm:$0xf0]  ;;  %v7718_v23 = vor.u32 %v9283_v42, %v7717_v10  ;;  %vm3342_vm6 = vcmp.gt.f32.partialorder %v2937_v40, 0.0  ;;  %v10187_v29 = vpack.c.bf16 %v3371_v28, %v3363_v32  ;;  %v2963_v31 = vadd.f32 %v10113_v34, %v2949_v62 }
 0x22f   :  { %4978 = vmatpush.bf16.msra.mxu0 %v8022_v4  ;;  %4937 = vmatpush.bf16.msra.mxu3 %v7622_v51  ;;  %v7973_v60 = vld [vmem:[#allocation8 + $0x320] sm:$0xf]  ;;  %v9347_v4 = vld [vmem:[#allocation8 + $0x32c] sm:$0xf0]  ;;  %v7846_v54 = vor.u32 %v9315_v22, %v7845_v41  ;;  %v2935_v51 = vadd.f32 %v10348_v20, %v2921_v30  ;;  %v10166_v45 = vpop.f32.mrf.mxu2  ;;  %v10175_v3 = vpop.f32.mrf.mxu1  ;;  %v3364_v30 = vsel %vm3332_vm3, %v10344_v5, %v10139_v43 }
 0x230   :  { %4951 = vmatpush.bf16.msra.mxu1 %v7750_v56  ;;  %v7573_v57 = vld [vmem:[#allocation8] sm:$0xf]  ;;  %v9247_v33 = vld [vmem:[#allocation8 + $0xc] sm:$0xf0]  ;;  %v7974_v56 = vor.u32 %v9347_v4, %v7973_v60  ;;  %v10185_v7 = vpop.f32.mrf.mxu0  ;;  %v10195_v42 = vpack.c.bf16 %v3372_v6, %v3364_v30  ;;  %v3365_v41 = vsel %vm3333_vm7, %v10131_v13, %v10149_v46  ;;  %v2965_v22 = vadd.f32 %v10153_v52, %v2951_v58 }
 0x231   :  { %4965 = vmatpush.bf16.msra.mxu2 %v7878_v63  ;;  %v7701_v55 = vld [vmem:[#allocation8 + $0x100] sm:$0xf]  ;;  %v9279_v48 = vld [vmem:[#allocation8 + $0x10c] sm:$0xf0]  ;;  %v10164_v19 = vpop.f32.mrf.mxu3  ;;  %v7574_v25 = vor.u32 %v9247_v33, %v7573_v57  ;;  %v3350_v2 = vmul.f32 0.2, %v2935_v51  ;;  %v10202_v60 = vpack.c.bf16 %v3373_v16, %v3365_v41 }
 0x232   :  { %v7829_v63 = vld [vmem:[#allocation8 + $0x200] sm:$0xf]  ;;  %v9311_v44 = vld [vmem:[#allocation8 + $0x20c] sm:$0xf0]  ;;  %vm3334_vm8 = vcmp.gt.f32.partialorder %v2935_v51, 0.0 }
 0x233   :  { %4979 = vmatpush.bf16.msra.mxu0 %v8006_v61  ;;  %4938 = vmatpush.bf16.msra.mxu3 %v7606_v47  ;;  %v7957_v17 = vld [vmem:[#allocation8 + $0x300] sm:$0xf]  ;;  %v9343_v1 = vld [vmem:[#allocation8 + $0x30c] sm:$0xf0]  ;;  %v7702_v47 = vor.u32 %v9279_v48, %v7701_v55  ;;  %v3366_v5 = vsel %vm3334_vm8, %v2935_v51, %v3350_v2 }
 0x234   :  { %4952 = vmatpush.bf16.msra.mxu1 %v7734_v53  ;;  %v8197_v35 = vld [vmem:[#allocation8 + $0x4e0] sm:$0xf]  ;;  %v9403_v61 = vld [vmem:[#allocation8 + $0x4ec] sm:$0xf0]  ;;  %v7830_v53 = vor.u32 %v9311_v44, %v7829_v63  ;;  %v7958_v59 = vor.u32 %v9343_v1, %v7957_v17  ;;  %v2977_v44 = vadd.f32 %v10071_v39, %v2963_v31  ;;  %v572_v17 = vperm.slane %v10053_v9, 5 }
 0x235   :  { %4966 = vmatpush.bf16.msra.mxu2 %v7862_v11  ;;  %v8325_v37 = vld [vmem:[#allocation8 + $0x5e0] sm:$0xf]  ;;  %v9435_v12 = vld [vmem:[#allocation8 + $0x5ec] sm:$0xf0]  ;;  %v8198_v11 = vor.u32 %v9403_v61, %v8197_v35 }
 0x236   :  { %v8326_v0 = vor.u32 %v9435_v12, %v8325_v37  ;;  %v8181_v49 = vld [vmem:[#allocation8 + $0x4c0] sm:$0xf]  ;;  %v9399_v10 = vld [vmem:[#allocation8 + $0x4cc] sm:$0xf0]  ;;  %v2991_v39 = vadd.f32 %v10119_v36, %v2977_v44  ;;  %v3047_v9 = vadd.f32 %v10185_v7, %v572_v17 }
 0x237   :  { %4980 = vmatpush.bf16.msra.mxu0 %v7990_v14  ;;  %4939 = vmatpush.bf16.msra.mxu3 %v7590_v26  ;;  %v3374_v14 = vsel %vm3342_vm6, %v2937_v40, %v3358_v38  ;;  %v8309_v27 = vld [vmem:[#allocation8 + $0x5c0] sm:$0xf]  ;;  %v9431_v18 = vld [vmem:[#allocation8 + $0x5cc] sm:$0xf0]  ;;  %v8182_v50 = vor.u32 %v9399_v10, %v8181_v49  ;;  %v3060_v8 = vpop.f32.mrf.mxu2  ;;  %v3020_v20 = vpop.f32.mrf.mxu1 }
 0x238   :  { %4953 = vmatpush.bf16.msra.mxu1 %v7718_v23  ;;  %v8165_v43 = vld [vmem:[#allocation8 + $0x4a0] sm:$0xf]  ;;  %v10205_v4 = vpack.c.bf16 %v3374_v14, %v3366_v5  ;;  %v8310_v40 = vor.u32 %v9431_v18, %v8309_v27  ;;  %v9395_v13 = vld [vmem:[#allocation8 + $0x4ac] sm:$0xf0]  ;;  %v3048_v28 = vpop.f32.mrf.mxu0  ;;  %v3005_v32 = vadd.f32 %v10164_v19, %v2991_v39  ;;  %v3061_v27 = vadd.f32 %v3060_v8, %v3047_v9 }
 0x239   :  { %4967 = vmatpush.bf16.msra.mxu2 %v7846_v54  ;;  %v8453_v46 = vld [vmem:[#allocation8 + $0x6e0] sm:$0xf]  ;;  %v9467_v52 = vld [vmem:[#allocation8 + $0x6ec] sm:$0xf0]  ;;  %v2979_v54 = vadd.f32 %v10101_v15, %v2965_v22  ;;  %v3006_v33 = vpop.f32.mrf.mxu3  ;;  %v8166_v55 = vor.u32 %v9395_v13, %v8165_v43  ;;  %v3049_v5 = vadd.f32 %v3048_v28, %v572_v17 }
 0x23a   :  { %v8293_v26 = vld [vmem:[#allocation8 + $0x5a0] sm:$0xf]  ;;  %v9427_v57 = vld [vmem:[#allocation8 + $0x5ac] sm:$0xf0]  ;;  %v8454_v23 = vor.u32 %v9467_v52, %v8453_v46  ;;  %v3019_v22 = vadd.f32 %v10175_v3, %v3005_v32 }
 0x23b   :  { %4981 = vmatpush.bf16.msra.mxu0 %v7974_v56  ;;  %4940 = vmatpush.bf16.msra.mxu3 %v7574_v25  ;;  %v8149_v48 = vld [vmem:[#allocation8 + $0x480] sm:$0xf]  ;;  %v8294_v51 = vor.u32 %v9427_v57, %v8293_v26  ;;  %v9391_v34 = vld [vmem:[#allocation8 + $0x48c] sm:$0xf0]  ;;  %v2993_v61 = vadd.f32 %v10158_v24, %v2979_v54 }
 0x23c   :  { %4954 = vmatpush.bf16.msra.mxu1 %v7702_v47  ;;  %v8437_v56 = vld [vmem:[#allocation8 + $0x6c0] sm:$0xf]  ;;  %v9463_v63 = vld [vmem:[#allocation8 + $0x6cc] sm:$0xf0]  ;;  %v8150_v6 = vor.u32 %v9391_v34, %v8149_v48  ;;  %v3033_v3 = vadd.f32 %v10135_v21, %v3019_v22  ;;  %v9265_v22 = vld [vmem:[#allocation8 + $0xa4] sm:$0xf] }
 0x23d   :  { %4968 = vmatpush.bf16.msra.mxu2 %v7830_v53  ;;  %v8277_v1 = vld [vmem:[#allocation8 + $0x580] sm:$0xf]  ;;  %v9423_v35 = vld [vmem:[#allocation8 + $0x58c] sm:$0xf0]  ;;  %v8438_v15 = vor.u32 %v9463_v63, %v8437_v56  ;;  %v3007_v25 = vadd.f32 %v3006_v33, %v2993_v61  ;;  %v7687_v61 = vld [vmem:[#allocation8 + $0xf0] sm:$0xf0] }
 0x23e   :  { %4941 = vmatmul.bf16.vlgmr.msra.gmra.mxu3 %v10187_v29  ;;  %v8133_v38 = vld [vmem:[#allocation8 + $0x460] sm:$0xf]  ;;  %v8278_v37 = vor.u32 %v9423_v35, %v8277_v1  ;;  %v9387_v12 = vld [vmem:[#allocation8 + $0x46c] sm:$0xf0]  ;;  %vm3335_vm10 = vcmp.gt.f32.partialorder %v3033_v3, 0.0 }
 0x23f   :  { %4982 = vmatpush.bf16.msra.mxu0 %v7958_v59  ;;  %4989 = vmatpush.bf16.msrb.mxu3 %v8198_v11  ;;  %v8421_v58 = vld [vmem:[#allocation8 + $0x6a0] sm:$0xf]  ;;  %v9459_v47 = vld [vmem:[#allocation8 + $0x6ac] sm:$0xf0]  ;;  %v3062_v11 = vpop.f32.mrf.mxu2  ;;  %v8134_v16 = vor.u32 %v9387_v12, %v8133_v38  ;;  %v3021_v49 = vadd.f32 %v3020_v20, %v3007_v25  ;;  %v3088_v10 = vpop.f32.mrf.mxu1  ;;  %v7815_v38 = vld [vmem:[#allocation8 + $0x1f0] sm:$0xf0] }
 0x240   :  { %5003 = vmatpush.bf16.msrb.mxu1 %v8326_v0  ;;  %4969 = vmatmul.bf16.vlgmr.msra.gmra.mxu2 %v10202_v60  ;;  %v8261_v53 = vld [vmem:[#allocation8 + $0x560] sm:$0xf]  ;;  %v9419_v2 = vld [vmem:[#allocation8 + $0x56c] sm:$0xf0]  ;;  %v8422_v59 = vor.u32 %v9459_v47, %v8421_v58  ;;  %v3351_v25 = vmul.f32 0.2, %v3033_v3 }
 0x241   :  { %4955 = vmatmul.bf16.vlgmr.msra.gmra.mxu1 %v10195_v42  ;;  %5017 = vmatpush.bf16.msrb.mxu2 %v8454_v23  ;;  %v3074_v24 = vpop.f32.mrf.mxu3  ;;  %v8117_v0 = vld [vmem:[#allocation8 + $0x440] sm:$0xf]  ;;  %v8262_v30 = vor.u32 %v9419_v2, %v8261_v53  ;;  %v9383_v14 = vld [vmem:[#allocation8 + $0x44c] sm:$0xf0]  ;;  %v3035_v43 = vadd.f32 %v10166_v45, %v3021_v49  ;;  %v9301_v49 = vld [vmem:[#allocation8 + $0x1c4] sm:$0xf] }
 0x242   :  { %4983 = vmatmul.bf16.vlgmr.msra.gmra.mxu0 %v10205_v4  ;;  %v8405_v62 = vld [vmem:[#allocation8 + $0x680] sm:$0xf]  ;;  %v9455_v36 = vld [vmem:[#allocation8 + $0x68c] sm:$0xf0]  ;;  %v8118_v19 = vor.u32 %v9383_v14, %v8117_v0  ;;  %v3075_v26 = vadd.f32 %v3074_v24, %v3061_v27  ;;  %v7671_v24 = vld [vmem:[#allocation8 + $0xd0] sm:$0xf0] }
 0x243   :  { %4990 = vmatpush.bf16.msrb.mxu3 %v8182_v50  ;;  %v8245_v7 = vld [vmem:[#allocation8 + $0x540] sm:$0xf]  ;;  %v9415_v18 = vld [vmem:[#allocation8 + $0x54c] sm:$0xf0]  ;;  %v8406_v41 = vor.u32 %v9455_v36, %v8405_v62  ;;  %v3359_v34 = vmul.f32 0.2, %v3035_v43 }
 0x244   :  { %5004 = vmatpush.bf16.msrb.mxu1 %v8310_v40  ;;  %v8101_v50 = vld [vmem:[#allocation8 + $0x420] sm:$0xf]  ;;  %v3102_v40 = vpop.f32.mrf.mxu0  ;;  %v8246_v13 = vor.u32 %v9415_v18, %v8245_v7  ;;  %v9379_v46 = vld [vmem:[#allocation8 + $0x42c] sm:$0xf0]  ;;  %vm3343_vm9 = vcmp.gt.f32.partialorder %v3035_v43, 0.0  ;;  %v3089_v1 = vadd.f32 %v3088_v10, %v3075_v26 }
 0x245   :  { %5018 = vmatpush.bf16.msrb.mxu2 %v8438_v15  ;;  %v8389_v52 = vld [vmem:[#allocation8 + $0x660] sm:$0xf]  ;;  %v9451_v31 = vld [vmem:[#allocation8 + $0x66c] sm:$0xf0]  ;;  %v8102_v48 = vor.u32 %v9379_v46, %v8101_v50  ;;  %v9273_v15 = vld [vmem:[#allocation8 + $0xe4] sm:$0xf]  ;;  %v3375_v12 = vsel %vm3343_vm9, %v3035_v43, %v3359_v34 }
 0x246   :  { %v8229_v8 = vld [vmem:[#allocation8 + $0x520] sm:$0xf]  ;;  %v9411_v57 = vld [vmem:[#allocation8 + $0x52c] sm:$0xf0]  ;;  %v8390_v23 = vor.u32 %v9451_v31, %v8389_v52  ;;  %v7690_v47 = vor.u32 %v9273_v15, %v7687_v61  ;;  %v3103_v53 = vadd.f32 %v3102_v40, %v3089_v1  ;;  %v7799_v10 = vld [vmem:[#allocation8 + $0x1d0] sm:$0xf0] }
 0x247   :  { %4991 = vmatpush.bf16.msrb.mxu3 %v8166_v55  ;;  %v8085_v33 = vld [vmem:[#allocation8 + $0x400] sm:$0xf]  ;;  %v3063_v55 = vadd.f32 %v3062_v11, %v3049_v5  ;;  %v9375_v20 = vld [vmem:[#allocation8 + $0x40c] sm:$0xf0]  ;;  %v3116_v56 = vpop.f32.mrf.mxu2  ;;  %v8230_v63 = vor.u32 %v9411_v57, %v8229_v8  ;;  %v3090_v21 = vpop.f32.mrf.mxu1  ;;  %v9269_v11 = vld [vmem:[#allocation8 + $0xc4] sm:$0xf] }
 0x248   :  { %5005 = vmatpush.bf16.msrb.mxu1 %v8294_v51  ;;  %v8213_v51 = vld [vmem:[#allocation8 + $0x500] sm:$0xf]  ;;  %v9407_v45 = vld [vmem:[#allocation8 + $0x50c] sm:$0xf0]  ;;  %v7674_v62 = vor.u32 %v9269_v11, %v7671_v24  ;;  %v3117_v7 = vadd.f32 %v3116_v56, %v3103_v53  ;;  %v7655_v5 = vld [vmem:[#allocation8 + $0xb0] sm:$0xf0] }
 0x249   :  { %5019 = vmatpush.bf16.msrb.mxu2 %v8422_v59  ;;  %v3076_v54 = vpop.f32.mrf.mxu3  ;;  %v8373_v44 = vld [vmem:[#allocation8 + $0x640] sm:$0xf]  ;;  %v9447_v17 = vld [vmem:[#allocation8 + $0x64c] sm:$0xf0]  ;;  %v8214_v58 = vor.u32 %v9407_v45, %v8213_v51  ;;  %v9337_v50 = vld [vmem:[#allocation8 + $0x2e4] sm:$0xf]  ;;  %v7658_v26 = vor.u32 %v9265_v22, %v7655_v5 }
 0x24a   :  { %v3077_v35 = vadd.f32 %v3076_v54, %v3063_v55  ;;  %v8374_v28 = vor.u32 %v9447_v17, %v8373_v44  ;;  %v8357_v39 = vld [vmem:[#allocation8 + $0x620] sm:$0xf]  ;;  %v9443_v9 = vld [vmem:[#allocation8 + $0x62c] sm:$0xf0]  ;;  %v9297_v40 = vld [vmem:[#allocation8 + $0x1a4] sm:$0xf] }
 0x24b   :  { %4992 = vmatpush.bf16.msrb.mxu3 %v8150_v6  ;;  %v9305_v6 = vld [vmem:[#allocation8 + $0x1e4] sm:$0xf]  ;;  %v8358_v32 = vor.u32 %v9443_v9, %v8357_v39  ;;  %v8341_v36 = vld [vmem:[#allocation8 + $0x600] sm:$0xf]  ;;  %v9439_v27 = vld [vmem:[#allocation8 + $0x60c] sm:$0xf0] }
 0x24c   :  { %5006 = vmatpush.bf16.msrb.mxu1 %v8278_v37  ;;  %v8086_v37 = vor.u32 %v9375_v20, %v8085_v33  ;;  %v3091_v2 = vadd.f32 %v3090_v21, %v3077_v35  ;;  %v7818_v59 = vor.u32 %v9305_v6, %v7815_v38  ;;  %v7943_v46 = vld [vmem:[#allocation8 + $0x2f0] sm:$0xf0]  ;;  %v9261_v8 = vld [vmem:[#allocation8 + $0x84] sm:$0xf]  ;;  %v8581_v45 = vld [vmem:[#allocation8 + $0x7e0] sm:$0xf] }
 0x24d   :  { %5020 = vmatpush.bf16.msrb.mxu2 %v8406_v41  ;;  %v7802_v41 = vor.u32 %v9301_v49, %v7799_v10  ;;  %v7946_v31 = vor.u32 %v9337_v50, %v7943_v46  ;;  %v7639_v57 = vld [vmem:[#allocation8 + $0x90] sm:$0xf0]  ;;  %v9293_v33 = vld [vmem:[#allocation8 + $0x184] sm:$0xf]  ;;  %v9499_v34 = vld [vmem:[#allocation8 + $0x7ec] sm:$0xf0] }
 0x24e   :  { %v7927_v55 = vld [vmem:[#allocation8 + $0x2d0] sm:$0xf0]  ;;  %v9257_v44 = vld [vmem:[#allocation8 + $0x64] sm:$0xf]  ;;  %v8582_v1 = vor.u32 %v9499_v34, %v8581_v45  ;;  %v7642_v35 = vor.u32 %v9261_v8, %v7639_v57  ;;  %v8549_v10 = vld [vmem:[#allocation8 + $0x7a0] sm:$0xf] }
 0x24f   :  { %4993 = vmatpush.bf16.msrb.mxu3 %v8134_v16  ;;  %v3104_v16 = vpop.f32.mrf.mxu0  ;;  %v3118_v43 = vpop.f32.mrf.mxu2  ;;  %v7767_v20 = vld [vmem:[#allocation8 + $0x190] sm:$0xf0]  ;;  %v9289_v15 = vld [vmem:[#allocation8 + $0x164] sm:$0xf]  ;;  %v9483_v45 = vld [vmem:[#allocation8 + $0x76c] sm:$0xf0] }
 0x250   :  { %5007 = vmatpush.bf16.msrb.mxu1 %v8262_v30  ;;  %v3367_v30 = vsel %vm3335_vm10, %v3033_v3, %v3351_v25  ;;  %v3105_v18 = vadd.f32 %v3104_v16, %v3091_v2  ;;  %v9333_v3 = vld [vmem:[#allocation8 + $0x2c4] sm:$0xf]  ;;  %v7623_v17 = vld [vmem:[#allocation8 + $0x70] sm:$0xf0]  ;;  %v7770_v21 = vor.u32 %v9293_v33, %v7767_v20  ;;  %5031 = vmatpush.bf16.msrb.mxu0 %v8582_v1  ;;  %v8565_v25 = vld [vmem:[#allocation8 + $0x7c0] sm:$0xf] }
 0x251   :  { %5021 = vmatpush.bf16.msrb.mxu2 %v8390_v23  ;;  %v3130_v0 = vpop.f32.mrf.mxu3  ;;  %v10223_v14 = vpack.c.bf16 %v3375_v12, %v3367_v30  ;;  %v7930_v51 = vor.u32 %v9333_v3, %v7927_v55  ;;  %v7751_v61 = vld [vmem:[#allocation8 + $0x170] sm:$0xf0]  ;;  %v9329_v6 = vld [vmem:[#allocation8 + $0x2a4] sm:$0xf]  ;;  %v7626_v53 = vor.u32 %v9257_v44, %v7623_v17  ;;  %v9491_v30 = vld [vmem:[#allocation8 + $0x7ac] sm:$0xf0] }
 0x252   :  { %v3131_v52 = vadd.f32 %v3130_v0, %v3117_v7  ;;  %v3119_v23 = vadd.f32 %v3118_v43, %v3105_v18  ;;  %v7911_v38 = vld [vmem:[#allocation8 + $0x2b0] sm:$0xf0]  ;;  %v9253_v2 = vld [vmem:[#allocation8 + $0x44] sm:$0xf]  ;;  %v7754_v11 = vor.u32 %v9289_v15, %v7751_v61 }
 0x253   :  { %4994 = vmatpush.bf16.msrb.mxu3 %v8118_v19  ;;  %v8342_v19 = vor.u32 %v9439_v27, %v8341_v36  ;;  %v9285_v24 = vld [vmem:[#allocation8 + $0x144] sm:$0xf]  ;;  %v7895_v16 = vld [vmem:[#allocation8 + $0x290] sm:$0xf0] }
 0x254   :  { %5008 = vmatpush.bf16.msrb.mxu1 %v8246_v13  ;;  %v7783_v13 = vld [vmem:[#allocation8 + $0x1b0] sm:$0xf0]  ;;  %v3352_v56 = vmul.f32 0.2, %v3131_v52  ;;  %vm3336_vm11 = vcmp.gt.f32.partialorder %v3131_v52, 0.0 }
 0x255   :  { %5022 = vmatpush.bf16.msrb.mxu2 %v8374_v28  ;;  %v7786_v54 = vor.u32 %v9297_v40, %v7783_v13  ;;  %v7735_v0 = vld [vmem:[#allocation8 + $0x150] sm:$0xf0]  ;;  %v9249_v27 = vld [vmem:[#allocation8 + $0x24] sm:$0xf]  ;;  %v8533_v40 = vld [vmem:[#allocation8 + $0x780] sm:$0xf] }
 0x256   :  { %v3368_v12 = vsel %vm3336_vm11, %v3131_v52, %v3352_v56  ;;  %v7591_v7 = vld [vmem:[#allocation8 + $0x30] sm:$0xf0]  ;;  %v7738_v18 = vor.u32 %v9285_v24, %v7735_v0  ;;  %v9321_v22 = vld [vmem:[#allocation8 + $0x264] sm:$0xf]  ;;  %v9487_v13 = vld [vmem:[#allocation8 + $0x78c] sm:$0xf0] }
 0x257   :  { %4995 = vmatpush.bf16.msrb.mxu3 %v8102_v48  ;;  %v7879_v5 = vld [vmem:[#allocation8 + $0x270] sm:$0xf0]  ;;  %v9245_v46 = vld [vmem:[#allocation8 + $0x4] sm:$0xf]  ;;  %v8534_v52 = vor.u32 %v9487_v13, %v8533_v40  ;;  %v8469_v40 = vld [vmem:[#allocation8 + $0x700] sm:$0xf] }
 0x258   :  { %5009 = vmatpush.bf16.msrb.mxu1 %v8230_v63  ;;  %v7719_v50 = vld [vmem:[#allocation8 + $0x130] sm:$0xf0]  ;;  %v7882_v43 = vor.u32 %v9321_v22, %v7879_v5  ;;  %v9277_v57 = vld [vmem:[#allocation8 + $0x104] sm:$0xf]  ;;  %v9471_v13 = vld [vmem:[#allocation8 + $0x70c] sm:$0xf0] }
 0x259   :  { %5023 = vmatpush.bf16.msrb.mxu2 %v8358_v32  ;;  %v3132_v48 = vpop.f32.mrf.mxu3  ;;  %v9325_v32 = vld [vmem:[#allocation8 + $0x284] sm:$0xf]  ;;  %v7575_v8 = vld [vmem:[#allocation8 + $0x10] sm:$0xf0] }
 0x25a   :  { %v3133_v63 = vadd.f32 %v3132_v48, %v3119_v23  ;;  %v7898_v49 = vor.u32 %v9325_v32, %v7895_v16  ;;  %v7703_v23 = vld [vmem:[#allocation8 + $0x110] sm:$0xf0]  ;;  %v9401_v33 = vld [vmem:[#allocation8 + $0x4e4] sm:$0xf]  ;;  %v7578_v44 = vor.u32 %v9245_v46, %v7575_v8 }
 0x25b   :  { %4996 = vmatpush.bf16.msrb.mxu3 %v8086_v37  ;;  %v9495_v37 = vld [vmem:[#allocation8 + $0x7cc] sm:$0xf0]  ;;  %v9317_v3 = vld [vmem:[#allocation8 + $0x244] sm:$0xf]  ;;  %v7863_v55 = vld [vmem:[#allocation8 + $0x250] sm:$0xf0]  ;;  %v7706_v17 = vor.u32 %v9277_v57, %v7703_v23 }
 0x25c   :  { %5010 = vmatpush.bf16.msrb.mxu1 %v8214_v58  ;;  %vm3344_vm12 = vcmp.gt.f32.partialorder %v3133_v63, 0.0  ;;  %v3360_v28 = vmul.f32 0.2, %v3133_v63  ;;  %v8566_v39 = vor.u32 %v9495_v37, %v8565_v25  ;;  %v8199_v48 = vld [vmem:[#allocation8 + $0x4f0] sm:$0xf0]  ;;  %v7866_v20 = vor.u32 %v9317_v3, %v7863_v55  ;;  %v10231_v37 = vld [vmem:[#allocation7] sm:$0xff] }
 0x25d   :  { %5024 = vmatpush.bf16.msrb.mxu2 %v8342_v19  ;;  %v10229_v19 = vpop.f32.mrf.mxu0  ;;  %v9433_v34 = vld [vmem:[#allocation8 + $0x5e4] sm:$0xf]  ;;  %v8327_v56 = vld [vmem:[#allocation8 + $0x5f0] sm:$0xf0]  ;;  %v8202_v1 = vor.u32 %v9401_v33, %v8199_v48  ;;  %v9479_v25 = vld [vmem:[#allocation8 + $0x74c] sm:$0xf0] }
 0x25e   :  { %4997 = vmatmul.bf16.vlgmr.msrb.gmra.mxu3 %v10223_v14  ;;  %v3376_v58 = vsel %vm3344_vm12, %v3133_v63, %v3360_v28  ;;  %5032 = vmatpush.bf16.msrb.mxu0 %v8566_v39  ;;  %v8183_v15 = vld [vmem:[#allocation8 + $0x4d0] sm:$0xf0]  ;;  %v9313_v61 = vld [vmem:[#allocation8 + $0x224] sm:$0xf] }
 0x25f   :  { %5045 = vmatpush.bf16.msra.mxu3 %v7690_v47  ;;  %v7914_v47 = vor.u32 %v9329_v6, %v7911_v38  ;;  %v10226_v9 = vpack.c.bf16 %v3376_v58, %v3368_v12  ;;  %v7847_v6 = vld [vmem:[#allocation8 + $0x230] sm:$0xf0]  ;;  %v8501_v38 = vld [vmem:[#allocation8 + $0x740] sm:$0xf]  ;;  %v573_v12 = vperm.slane %v10231_v37, 6 }
 0x260   :  { %5059 = vmatpush.bf16.msra.mxu1 %v7818_v59  ;;  %v7607_v59 = vld [vmem:[#allocation8 + $0x50] sm:$0xf0]  ;;  %v9429_v58 = vld [vmem:[#allocation8 + $0x5c4] sm:$0xf]  ;;  %v7850_v39 = vor.u32 %v9313_v61, %v7847_v6 }
 0x261   :  { %5073 = vmatpush.bf16.msra.mxu2 %v7946_v31  ;;  %5011 = vmatmul.bf16.vlgmr.msrb.gmra.mxu1 %v10226_v9  ;;  %v7610_v36 = vor.u32 %v9253_v2, %v7607_v59  ;;  %v3144_v31 = vpop.f32.mrf.mxu1  ;;  %v3158_v28 = vpop.f32.mrf.mxu3  ;;  %v8167_v24 = vld [vmem:[#allocation8 + $0x4b0] sm:$0xf0]  ;;  %v9309_v32 = vld [vmem:[#allocation8 + $0x204] sm:$0xf] }
 0x262   :  { %v9389_v22 = vld [vmem:[#allocation8 + $0x484] sm:$0xf]  ;;  %v8151_v5 = vld [vmem:[#allocation8 + $0x490] sm:$0xf0] }
 0x263   :  { %5046 = vmatpush.bf16.msra.mxu3 %v7674_v62  ;;  %v8550_v62 = vor.u32 %v9491_v30, %v8549_v10  ;;  %v8485_v10 = vld [vmem:[#allocation8 + $0x720] sm:$0xf]  ;;  %v9475_v30 = vld [vmem:[#allocation8 + $0x72c] sm:$0xf0]  ;;  %v9369_v8 = vld [vmem:[#allocation8 + $0x3e4] sm:$0xf]  ;;  %v8154_v55 = vor.u32 %v9389_v22, %v8151_v5 }
 0x264   :  { %5060 = vmatpush.bf16.msra.mxu1 %v7802_v41  ;;  %v9281_v41 = vld [vmem:[#allocation8 + $0x124] sm:$0xf]  ;;  %v8071_v57 = vld [vmem:[#allocation8 + $0x3f0] sm:$0xf0] }
 0x265   :  { %5074 = vmatpush.bf16.msra.mxu2 %v7930_v51  ;;  %5033 = vmatpush.bf16.msrb.mxu0 %v8550_v62  ;;  %v8517_v51 = vld [vmem:[#allocation8 + $0x760] sm:$0xf]  ;;  %v10234_v2 = vpop.f32.mrf.mxu0  ;;  %v3145_v62 = vadd.f32 %v3144_v31, %v573_v12  ;;  %v8279_v31 = vld [vmem:[#allocation8 + $0x590] sm:$0xf0]  ;;  %v8074_v33 = vor.u32 %v9369_v8, %v8071_v57  ;;  %v9413_v6 = vld [vmem:[#allocation8 + $0x544] sm:$0xf] }
 0x266   :  { %v8518_v63 = vor.u32 %v9483_v45, %v8517_v51  ;;  %v9385_v51 = vld [vmem:[#allocation8 + $0x464] sm:$0xf]  ;;  %v8135_v45 = vld [vmem:[#allocation8 + $0x470] sm:$0xf0]  ;;  %v7821_v57 = vld [vmem:[#allocation8 + $0x1e8] sm:$0xf] }
 0x267   :  { %5047 = vmatpush.bf16.msra.mxu3 %v7658_v26  ;;  %v7594_v26 = vor.u32 %v9249_v27, %v7591_v7  ;;  %v8295_v27 = vld [vmem:[#allocation8 + $0x5b0] sm:$0xf0]  ;;  %v3159_v46 = vadd.f32 %v3158_v28, %v3145_v62  ;;  %v9381_v28 = vld [vmem:[#allocation8 + $0x444] sm:$0xf] }
 0x268   :  { %5061 = vmatpush.bf16.msra.mxu1 %v7786_v54  ;;  %v7722_v54 = vor.u32 %v9281_v41, %v7719_v50  ;;  %v9357_v62 = vld [vmem:[#allocation8 + $0x384] sm:$0xf]  ;;  %v8087_v22 = vld [vmem:[#allocation8 + $0x410] sm:$0xf0] }
 0x269   :  { %5075 = vmatpush.bf16.msra.mxu2 %v7914_v47  ;;  %5034 = vmatpush.bf16.msrb.mxu0 %v8534_v52  ;;  %v8311_v47 = vld [vmem:[#allocation8 + $0x5d0] sm:$0xf0]  ;;  %v3146_v16 = vpop.f32.mrf.mxu1  ;;  %v3186_v52 = vpop.f32.mrf.mxu2 }
 0x26a   :  { %v8314_v0 = vor.u32 %v9429_v58, %v8311_v47  ;;  %v3160_v23 = vpop.f32.mrf.mxu3  ;;  %v3147_v3 = vadd.f32 %v3146_v16, %v573_v12  ;;  %v9361_v12 = vld [vmem:[#allocation8 + $0x3a4] sm:$0xf]  ;;  %v8039_v58 = vld [vmem:[#allocation8 + $0x3b0] sm:$0xf0] }
 0x26b   :  { %5048 = vmatpush.bf16.msra.mxu3 %v7642_v35  ;;  %v9397_v35 = vld [vmem:[#allocation8 + $0x4c4] sm:$0xf] }
 0x26c   :  { %5062 = vmatpush.bf16.msra.mxu1 %v7770_v21  ;;  %v8330_v21 = vor.u32 %v9433_v34, %v8327_v56  ;;  %v8186_v59 = vor.u32 %v9397_v35, %v8183_v15  ;;  %v9417_v34 = vld [vmem:[#allocation8 + $0x564] sm:$0xf]  ;;  %v3173_v56 = vadd.f32 %v10229_v19, %v3159_v46  ;;  %v3161_v35 = vadd.f32 %v3160_v23, %v3147_v3  ;;  %v9308_v23 = vld [vmem:[#allocation8 + $0x1f4] sm:$0xf0] }
 0x26d   :  { %5076 = vmatpush.bf16.msra.mxu2 %v7898_v49  ;;  %5035 = vmatpush.bf16.msrb.mxu0 %v8518_v63  ;;  %v7831_v49 = vld [vmem:[#allocation8 + $0x210] sm:$0xf0]  ;;  %v8138_v15 = vor.u32 %v9385_v51, %v8135_v45  ;;  %v8042_v19 = vor.u32 %v9361_v12, %v8039_v58  ;;  %v9377_v16 = vld [vmem:[#allocation8 + $0x424] sm:$0xf]  ;;  %v9272_v45 = vld [vmem:[#allocation8 + $0xd4] sm:$0xf0] }
 0x26e   :  { %v7834_v7 = vor.u32 %v9309_v32, %v7831_v49  ;;  %v8263_v63 = vld [vmem:[#allocation8 + $0x570] sm:$0xf0]  ;;  %v9409_v49 = vld [vmem:[#allocation8 + $0x524] sm:$0xf]  ;;  %v9268_v12 = vld [vmem:[#allocation8 + $0xb4] sm:$0xf0] }
 0x26f   :  { %5049 = vmatpush.bf16.msra.mxu3 %v7626_v53  ;;  %v8502_v53 = vor.u32 %v9479_v25, %v8501_v38  ;;  %v8266_v61 = vor.u32 %v9417_v34, %v8263_v63  ;;  %v3187_v38 = vadd.f32 %v3186_v52, %v3173_v56  ;;  %v8247_v25 = vld [vmem:[#allocation8 + $0x550] sm:$0xf0]  ;;  %v9276_v52 = vld [vmem:[#allocation8 + $0xf4] sm:$0xf0]  ;;  %v7805_v34 = vld [vmem:[#allocation8 + $0x1c8] sm:$0xf] }
 0x270   :  { %5063 = vmatpush.bf16.msra.mxu1 %v7754_v11  ;;  %v9393_v11 = vld [vmem:[#allocation8 + $0x4a4] sm:$0xf]  ;;  %v8250_v32 = vor.u32 %v9413_v6, %v8247_v25  ;;  %v9304_v56 = vld [vmem:[#allocation8 + $0x1d4] sm:$0xf0]  ;;  %v7661_v25 = vld [vmem:[#allocation8 + $0xa8] sm:$0xf] }
 0x271   :  { %5077 = vmatpush.bf16.msra.mxu2 %v7882_v43  ;;  %5036 = vmatpush.bf16.msrb.mxu0 %v8502_v53  ;;  %v8170_v41 = vor.u32 %v9393_v11, %v8167_v24  ;;  %v9421_v43 = vld [vmem:[#allocation8 + $0x584] sm:$0xf]  ;;  %v3200_v48 = vpop.f32.mrf.mxu1  ;;  %v3188_v11 = vpop.f32.mrf.mxu2 }
 0x272   :  { %v3214_v47 = vpop.f32.mrf.mxu3  ;;  %v3201_v53 = vadd.f32 %v3200_v48, %v3187_v38  ;;  %v7677_v48 = vld [vmem:[#allocation8 + $0xc8] sm:$0xf] }
 0x273   :  { %5050 = vmatpush.bf16.msra.mxu3 %v7610_v36  ;;  %v9425_v36 = vld [vmem:[#allocation8 + $0x5a4] sm:$0xf]  ;;  %v7678_v38 = vor.u32 %v9272_v45, %v7677_v48 }
 0x274   :  { %5064 = vmatpush.bf16.msra.mxu1 %v7738_v18  ;;  %v8486_v18 = vor.u32 %v9475_v30, %v8485_v10  ;;  %v8298_v50 = vor.u32 %v9425_v36, %v8295_v27  ;;  %v3215_v10 = vadd.f32 %v3214_v47, %v3201_v53  ;;  %v8231_v30 = vld [vmem:[#allocation8 + $0x530] sm:$0xf0]  ;;  %v7789_v53 = vld [vmem:[#allocation8 + $0x1a8] sm:$0xf] }
 0x275   :  { %5078 = vmatpush.bf16.msra.mxu2 %v7866_v20  ;;  %v8282_v20 = vor.u32 %v9421_v43, %v8279_v31  ;;  %v8023_v36 = vld [vmem:[#allocation8 + $0x390] sm:$0xf0]  ;;  %v8234_v5 = vor.u32 %v9409_v49, %v8231_v30  ;;  %v9353_v31 = vld [vmem:[#allocation8 + $0x364] sm:$0xf]  ;;  %v574_v49 = vperm.slane %v10231_v37, 7  ;;  %v7662_v30 = vor.u32 %v9268_v12, %v7661_v25 }
 0x276   :  { %5037 = vmatpush.bf16.msrb.mxu0 %v8486_v18  ;;  %v8215_v43 = vld [vmem:[#allocation8 + $0x510] sm:$0xf0]  ;;  %v7597_v12 = vld [vmem:[#allocation8 + $0x28] sm:$0xf] }
 0x277   :  { %5051 = vmatpush.bf16.msra.mxu3 %v7594_v26  ;;  %v8470_v26 = vor.u32 %v9471_v13, %v8469_v40  ;;  %v7693_v40 = vld [vmem:[#allocation8 + $0xe8] sm:$0xf] }
 0x278   :  { %5065 = vmatpush.bf16.msra.mxu1 %v7722_v54  ;;  %v3228_v54 = vpop.f32.mrf.mxu0  ;;  %v7694_v51 = vor.u32 %v9276_v52, %v7693_v40 }
 0x279   :  { %5079 = vmatpush.bf16.msra.mxu2 %v7850_v39  ;;  %v3175_v39 = vadd.f32 %v10234_v2, %v3161_v35  ;;  %v3202_v27 = vpop.f32.mrf.mxu1  ;;  %v3229_v46 = vadd.f32 %v3228_v54, %v3215_v10  ;;  %v3242_v6 = vpop.f32.mrf.mxu2 }
 0x27a   :  { %5038 = vmatpush.bf16.msrb.mxu0 %v8470_v26  ;;  %v8007_v26 = vld [vmem:[#allocation8 + $0x370] sm:$0xf0]  ;;  %v3216_v8 = vpop.f32.mrf.mxu3 }
 0x27b   :  { %5052 = vmatpush.bf16.msra.mxu3 %v7578_v44  ;;  %v9365_v44 = vld [vmem:[#allocation8 + $0x3c4] sm:$0xf]  ;;  %v3189_v18 = vadd.f32 %v3188_v11, %v3175_v39  ;;  %v3353_v63 = vmul.f32 0.2, %v3229_v46  ;;  %vm3337_vm13 = vcmp.gt.f32.partialorder %v3229_v46, 0.0 }
 0x27c   :  { %5066 = vmatpush.bf16.msra.mxu1 %v7706_v17  ;;  %v8055_v17 = vld [vmem:[#allocation8 + $0x3d0] sm:$0xf0]  ;;  %v9345_v11 = vld [vmem:[#allocation8 + $0x324] sm:$0xf] }
 0x27d   :  { %5080 = vmatpush.bf16.msra.mxu2 %v7834_v7  ;;  %v8026_v7 = vor.u32 %v9357_v62, %v8023_v36  ;;  %v3203_v13 = vadd.f32 %v3202_v27, %v3189_v18  ;;  %v3369_v58 = vsel %vm3337_vm13, %v3229_v46, %v3353_v63  ;;  %v7645_v62 = vld [vmem:[#allocation8 + $0x88] sm:$0xf]  ;;  %v9264_v36 = vld [vmem:[#allocation8 + $0x94] sm:$0xf0] }
 0x27e   :  { %5053 = vmatmul.bf16.vlgmr.msra.gmra.mxu3 %v10187_v29  ;;  %5087 = vmatpush.bf16.msra.mxu0 %v8074_v33  ;;  %v8010_v33 = vor.u32 %v9353_v31, %v8007_v26  ;;  %v7773_v18 = vld [vmem:[#allocation8 + $0x188] sm:$0xf]  ;;  %v7646_v46 = vor.u32 %v9264_v36, %v7645_v62  ;;  %v9280_v36 = vld [vmem:[#allocation8 + $0x114] sm:$0xf0] }
 0x27f   :  { %5101 = vmatpush.bf16.msrb.mxu3 %v8202_v1  ;;  %5067 = vmatmul.bf16.vlgmr.msra.gmra.mxu1 %v10195_v42  ;;  %v8058_v1 = vor.u32 %v9365_v44, %v8055_v17  ;;  %v3217_v3 = vadd.f32 %v3216_v8, %v3203_v13  ;;  %v7822_v44 = vor.u32 %v9308_v23, %v7821_v57  ;;  %v9349_v17 = vld [vmem:[#allocation8 + $0x344] sm:$0xf]  ;;  %v7629_v8 = vld [vmem:[#allocation8 + $0x68] sm:$0xf]  ;;  %v9260_v57 = vld [vmem:[#allocation8 + $0x74] sm:$0xf0] }
 0x280   :  { %5115 = vmatpush.bf16.msrb.mxu1 %v8330_v21  ;;  %v8119_v21 = vld [vmem:[#allocation8 + $0x450] sm:$0xf0]  ;;  %v3230_v24 = vpop.f32.mrf.mxu0  ;;  %v7757_v23 = vld [vmem:[#allocation8 + $0x168] sm:$0xf] }
 0x281   :  { %v3231_v54 = vadd.f32 %v3230_v24, %v3217_v3  ;;  %v3244_v52 = vpop.f32.mrf.mxu2  ;;  %v9453_v3 = vld [vmem:[#allocation8 + $0x684] sm:$0xf]  ;;  %v7741_v63 = vld [vmem:[#allocation8 + $0x148] sm:$0xf] }
 0x282   :  { %5088 = vmatpush.bf16.msra.mxu0 %v8058_v1  ;;  %v7991_v1 = vld [vmem:[#allocation8 + $0x350] sm:$0xf0]  ;;  %v7709_v62 = vld [vmem:[#allocation8 + $0x108] sm:$0xf] }
 0x283   :  { %5102 = vmatpush.bf16.msrb.mxu3 %v8186_v59  ;;  %v8122_v59 = vor.u32 %v9381_v28, %v8119_v21  ;;  %v7994_v28 = vor.u32 %v9349_v17, %v7991_v1  ;;  %vm3345_vm14 = vcmp.gt.f32.partialorder %v3231_v54, 0.0  ;;  %v3361_v21 = vmul.f32 0.2, %v3231_v54  ;;  %v8391_v17 = vld [vmem:[#allocation8 + $0x670] sm:$0xf0] }
 0x284   :  { %5116 = vmatpush.bf16.msrb.mxu1 %v8314_v0  ;;  %v8103_v0 = vld [vmem:[#allocation8 + $0x430] sm:$0xf0] }
 0x285   :  { %v8106_v2 = vor.u32 %v9377_v16, %v8103_v0  ;;  %v3377_v47 = vsel %vm3345_vm14, %v3231_v54, %v3361_v21  ;;  %v8439_v16 = vld [vmem:[#allocation8 + $0x6d0] sm:$0xf0]  ;;  %v9288_v54 = vld [vmem:[#allocation8 + $0x154] sm:$0xf0] }
 0x286   :  { %5089 = vmatpush.bf16.msra.mxu0 %v8042_v19  ;;  %v7806_v19 = vor.u32 %v9304_v56, %v7805_v34  ;;  %v10242_v24 = vpack.c.bf16 %v3377_v47, %v3369_v58  ;;  %v7975_v0 = vld [vmem:[#allocation8 + $0x330] sm:$0xf0]  ;;  %v9256_v56 = vld [vmem:[#allocation8 + $0x54] sm:$0xf0]  ;;  %v7742_v21 = vor.u32 %v9288_v54, %v7741_v63  ;;  %v7725_v47 = vld [vmem:[#allocation8 + $0x128] sm:$0xf] }
 0x287   :  { %5103 = vmatpush.bf16.msrb.mxu3 %v8170_v41  ;;  %v9373_v41 = vld [vmem:[#allocation8 + $0x404] sm:$0xf]  ;;  %v7978_v10 = vor.u32 %v9345_v11, %v7975_v0  ;;  %v9252_v58 = vld [vmem:[#allocation8 + $0x34] sm:$0xf0] }
 0x288   :  { %5117 = vmatpush.bf16.msrb.mxu1 %v8298_v50  ;;  %v9405_v50 = vld [vmem:[#allocation8 + $0x504] sm:$0xf]  ;;  %v10240_v35 = vpop.f32.mrf.mxu0  ;;  %5025 = vmatmul.bf16.vlgmr.msrb.gmra.mxu2 %v10242_v24 }
 0x28a   :  { %5090 = vmatpush.bf16.msra.mxu0 %v8026_v7 }
 0x28b   :  { %5104 = vmatpush.bf16.msrb.mxu3 %v8154_v55  ;;  %v8090_v55 = vor.u32 %v9373_v41, %v8087_v22  ;;  %v7959_v41 = vld [vmem:[#allocation8 + $0x310] sm:$0xf0]  ;;  %v9296_v22 = vld [vmem:[#allocation8 + $0x194] sm:$0xf0] }
 0x28c   :  { %5118 = vmatpush.bf16.msrb.mxu1 %v8282_v20  ;;  %v8218_v20 = vor.u32 %v9405_v50, %v8215_v43  ;;  %v8423_v50 = vld [vmem:[#allocation8 + $0x6b0] sm:$0xf0]  ;;  %v3243_v43 = vadd.f32 %v3242_v6, %v574_v49  ;;  %v7774_v31 = vor.u32 %v9296_v22, %v7773_v18  ;;  %v3245_v6 = vadd.f32 %v3244_v52, %v574_v49  ;;  %v8333_v18 = vld [vmem:[#allocation8 + $0x5e8] sm:$0xf]  ;;  %v9436_v22 = vld [vmem:[#allocation8 + $0x5f4] sm:$0xf0] }
 0x28e   :  { %5091 = vmatpush.bf16.msra.mxu0 %v8010_v33  ;;  %v9292_v33 = vld [vmem:[#allocation8 + $0x174] sm:$0xf0]  ;;  %v3257_v48 = vadd.f32 %v10240_v35, %v3243_v43 }
 0x28f   :  { %5105 = vmatpush.bf16.msrb.mxu3 %v8138_v15  ;;  %v9465_v15 = vld [vmem:[#allocation8 + $0x6e4] sm:$0xf]  ;;  %v7758_v45 = vor.u32 %v9292_v33, %v7757_v23  ;;  %v9400_v23 = vld [vmem:[#allocation8 + $0x4d4] sm:$0xf0]  ;;  %v8317_v33 = vld [vmem:[#allocation8 + $0x5c8] sm:$0xf] }
 0x290   :  { %5119 = vmatpush.bf16.msrb.mxu1 %v8266_v61  ;;  %v8455_v61 = vld [vmem:[#allocation8 + $0x6f0] sm:$0xf0]  ;;  %v3258_v13 = vpop.f32.mrf.mxu0 }
 0x291   :  { %v8458_v39 = vor.u32 %v9465_v15, %v8455_v61  ;;  %v3259_v0 = vadd.f32 %v3258_v13, %v3245_v6  ;;  %v9428_v6 = vld [vmem:[#allocation8 + $0x5b4] sm:$0xf0] }
 0x292   :  { %5092 = vmatpush.bf16.msra.mxu0 %v7994_v28 }
 0x293   :  { %5106 = vmatpush.bf16.msrb.mxu3 %v8122_v59  ;;  %v9300_v59 = vld [vmem:[#allocation8 + $0x1b4] sm:$0xf0]  ;;  %5129 = vmatpush.bf16.msrb.mxu2 %v8458_v39 }
 0x294   :  { %5120 = vmatpush.bf16.msrb.mxu1 %v8250_v32  ;;  %v9461_v32 = vld [vmem:[#allocation8 + $0x6c4] sm:$0xf]  ;;  %v7790_v27 = vor.u32 %v9300_v59, %v7789_v53  ;;  %v9284_v39 = vld [vmem:[#allocation8 + $0x134] sm:$0xf0]  ;;  %v8375_v59 = vld [vmem:[#allocation8 + $0x650] sm:$0xf0] }
 0x295   :  { %v8442_v7 = vor.u32 %v9461_v32, %v8439_v16  ;;  %v9445_v53 = vld [vmem:[#allocation8 + $0x644] sm:$0xf]  ;;  %v7598_v32 = vor.u32 %v9252_v58, %v7597_v12  ;;  %v7581_v16 = vld [vmem:[#allocation8 + $0x8] sm:$0xf]  ;;  %v7726_v49 = vor.u32 %v9284_v39, %v7725_v47  ;;  %v9336_v12 = vld [vmem:[#allocation8 + $0x2d4] sm:$0xf0] }
 0x296   :  { %5093 = vmatpush.bf16.msra.mxu0 %v7978_v10  ;;  %v8378_v10 = vor.u32 %v9445_v53, %v8375_v59  ;;  %v9497_v58 = vld [vmem:[#allocation8 + $0x7e4] sm:$0xf]  ;;  %v8157_v39 = vld [vmem:[#allocation8 + $0x488] sm:$0xf] }
 0x297   :  { %5107 = vmatpush.bf16.msrb.mxu3 %v8106_v2  ;;  %v9341_v2 = vld [vmem:[#allocation8 + $0x304] sm:$0xf]  ;;  %v3270_v40 = vpop.f32.mrf.mxu1  ;;  %5130 = vmatpush.bf16.msrb.mxu2 %v8442_v7  ;;  %v9404_v7 = vld [vmem:[#allocation8 + $0x4f4] sm:$0xf0] }
 0x298   :  { %5121 = vmatpush.bf16.msrb.mxu1 %v8234_v5  ;;  %v9457_v5 = vld [vmem:[#allocation8 + $0x6a4] sm:$0xf]  ;;  %v7962_v37 = vor.u32 %v9341_v2, %v7959_v41  ;;  %v3271_v1 = vadd.f32 %v3270_v40, %v3257_v48  ;;  %5081 = vmatmul.bf16.vlgmr.msra.gmra.mxu2 %v10202_v60 }
 0x299   :  { %v8426_v26 = vor.u32 %v9457_v5, %v8423_v50  ;;  %v9441_v5 = vld [vmem:[#allocation8 + $0x624] sm:$0xf]  ;;  %v8359_v50 = vld [vmem:[#allocation8 + $0x630] sm:$0xf0] }
 0x29a   :  { %5094 = vmatpush.bf16.msra.mxu0 %v7962_v37  ;;  %v9437_v48 = vld [vmem:[#allocation8 + $0x604] sm:$0xf] }
 0x29b   :  { %5108 = vmatpush.bf16.msrb.mxu3 %v8090_v55  ;;  %v8407_v55 = vld [vmem:[#allocation8 + $0x690] sm:$0xf0]  ;;  %5131 = vmatpush.bf16.msrb.mxu2 %v8426_v26  ;;  %v8334_v26 = vor.u32 %v9436_v22, %v8333_v18  ;;  %v9493_v18 = vld [vmem:[#allocation8 + $0x7c4] sm:$0xf]  ;;  %v8141_v22 = vld [vmem:[#allocation8 + $0x468] sm:$0xf] }
 0x29c   :  { %5122 = vmatpush.bf16.msrb.mxu1 %v8218_v20  ;;  %v7630_v20 = vor.u32 %v9260_v57, %v7629_v8  ;;  %v8410_v34 = vor.u32 %v9453_v3, %v8407_v55  ;;  %v8362_v8 = vor.u32 %v9441_v5, %v8359_v50  ;;  %v8189_v57 = vld [vmem:[#allocation8 + $0x4c8] sm:$0xf]  ;;  %v9432_v55 = vld [vmem:[#allocation8 + $0x5d4] sm:$0xf0] }
 0x29d   :  { %v8190_v54 = vor.u32 %v9400_v23, %v8189_v57  ;;  %v9388_v5 = vld [vmem:[#allocation8 + $0x474] sm:$0xf0]  ;;  %v8125_v57 = vld [vmem:[#allocation8 + $0x448] sm:$0xf] }
 0x29e   :  { %5109 = vmatmul.bf16.vlgmr.msrb.gmra.mxu3 %v10223_v14  ;;  %v9384_v23 = vld [vmem:[#allocation8 + $0x454] sm:$0xf0] }
 0x29f   :  { %5157 = vmatpush.bf16.msra.mxu3 %v7694_v51  ;;  %5123 = vmatmul.bf16.vlgmr.msrb.gmra.mxu1 %v10226_v9  ;;  %v7613_v51 = vld [vmem:[#allocation8 + $0x48] sm:$0xf]  ;;  %v3272_v15 = vpop.f32.mrf.mxu1 }
 0x2a0   :  { %5171 = vmatpush.bf16.msra.mxu1 %v7822_v44  ;;  %v9449_v44 = vld [vmem:[#allocation8 + $0x664] sm:$0xf]  ;;  %v7614_v28 = vor.u32 %v9256_v56, %v7613_v51  ;;  %5132 = vmatpush.bf16.msrb.mxu2 %v8410_v34  ;;  %v3273_v2 = vadd.f32 %v3272_v15, %v3259_v0  ;;  %v7949_v34 = vld [vmem:[#allocation8 + $0x2e8] sm:$0xf]  ;;  %v9340_v56 = vld [vmem:[#allocation8 + $0x2f4] sm:$0xf0] }
 0x2a1   :  { %v3284_v61 = vpop.f32.mrf.mxu3  ;;  %v8394_v25 = vor.u32 %v9449_v44, %v8391_v17  ;;  %v8318_v44 = vor.u32 %v9432_v55, %v8317_v33  ;;  %v9396_v15 = vld [vmem:[#allocation8 + $0x4b4] sm:$0xf0] }
 0x2a2   :  { %v3285_v35 = vadd.f32 %v3284_v61, %v3271_v1  ;;  %v8173_v1 = vld [vmem:[#allocation8 + $0x4a8] sm:$0xf]  ;;  %v9424_v0 = vld [vmem:[#allocation8 + $0x594] sm:$0xf0] }
 0x2a3   :  { %5158 = vmatpush.bf16.msra.mxu3 %v7678_v38  ;;  %v3298_v38 = vpop.f32.mrf.mxu2  ;;  %v8174_v47 = vor.u32 %v9396_v15, %v8173_v1  ;;  %v9416_v55 = vld [vmem:[#allocation8 + $0x554] sm:$0xf0]  ;;  %v8237_v1 = vld [vmem:[#allocation8 + $0x528] sm:$0xf] }
 0x2a4   :  { %5172 = vmatpush.bf16.msra.mxu1 %v7806_v19  ;;  %v3312_v19 = vpop.f32.mrf.mxu0  ;;  %v3299_v11 = vadd.f32 %v3298_v38, %v3285_v35  ;;  %5133 = vmatpush.bf16.msrb.mxu2 %v8394_v25  ;;  %v7933_v35 = vld [vmem:[#allocation8 + $0x2c8] sm:$0xf]  ;;  %v9412_v15 = vld [vmem:[#allocation8 + $0x534] sm:$0xf0] }
 0x2a6   :  { %v3313_v37 = vadd.f32 %v3312_v19, %v3299_v11  ;;  %v8583_v19 = vld [vmem:[#allocation8 + $0x7f0] sm:$0xf0]  ;;  %v9392_v11 = vld [vmem:[#allocation8 + $0x494] sm:$0xf0] }
 0x2a7   :  { %5159 = vmatpush.bf16.msra.mxu3 %v7662_v30  ;;  %v9248_v30 = vld [vmem:[#allocation8 + $0x14] sm:$0xf0]  ;;  %v3326_v41 = vpop.f32.mrf.mxu1 }
 0x2a8   :  { %5173 = vmatpush.bf16.msra.mxu1 %v7790_v27  ;;  %v8205_v27 = vld [vmem:[#allocation8 + $0x4e8] sm:$0xf]  ;;  %v7582_v40 = vor.u32 %v9248_v30, %v7581_v16  ;;  %5134 = vmatpush.bf16.msrb.mxu2 %v8378_v10  ;;  %v8586_v30 = vor.u32 %v9497_v58, %v8583_v19  ;;  %v9376_v58 = vld [vmem:[#allocation8 + $0x414] sm:$0xf0] }
 0x2a9   :  { %v3286_v43 = vpop.f32.mrf.mxu3  ;;  %v8206_v52 = vor.u32 %v9404_v7, %v8205_v27  ;;  %v8285_v16 = vld [vmem:[#allocation8 + $0x588] sm:$0xf]  ;;  %v8158_v7 = vor.u32 %v9392_v11, %v8157_v39  ;;  %v9408_v19 = vld [vmem:[#allocation8 + $0x514] sm:$0xf0]  ;;  %v9306_v11 = vld [vmem:[#allocation8 + $0x1ec] sm:$0xf] }
 0x2aa   :  { %v3287_v13 = vadd.f32 %v3286_v43, %v3273_v2  ;;  %v8567_v2 = vld [vmem:[#allocation8 + $0x7d0] sm:$0xf0]  ;;  %v9420_v43 = vld [vmem:[#allocation8 + $0x574] sm:$0xf0] }
 0x2ab   :  { %5160 = vmatpush.bf16.msra.mxu3 %v7646_v46  ;;  %v7710_v46 = vor.u32 %v9280_v36, %v7709_v62  ;;  %v7917_v62 = vld [vmem:[#allocation8 + $0x2a8] sm:$0xf]  ;;  %v9332_v36 = vld [vmem:[#allocation8 + $0x2b4] sm:$0xf0] }
 0x2ac   :  { %5174 = vmatpush.bf16.msra.mxu1 %v7774_v31  ;;  %v3300_v31 = vpop.f32.mrf.mxu2  ;;  %v3314_v51 = vpop.f32.mrf.mxu0  ;;  %5135 = vmatpush.bf16.msrb.mxu2 %v8362_v8  ;;  %v7918_v50 = vor.u32 %v9332_v36, %v7917_v62  ;;  %v8503_v62 = vld [vmem:[#allocation8 + $0x750] sm:$0xf0] }
 0x2ad   :  { %v3301_v3 = vadd.f32 %v3300_v31, %v3287_v13  ;;  %v7901_v13 = vld [vmem:[#allocation8 + $0x288] sm:$0xf]  ;;  %v9489_v31 = vld [vmem:[#allocation8 + $0x7a4] sm:$0xf] }
 0x2af   :  { %5161 = vmatpush.bf16.msra.mxu3 %v7630_v20  ;;  %v8343_v20 = vld [vmem:[#allocation8 + $0x610] sm:$0xf0]  ;;  %v3315_v63 = vadd.f32 %v3314_v51, %v3301_v3  ;;  %v3328_v61 = vpop.f32.mrf.mxu1  ;;  %v8253_v3 = vld [vmem:[#allocation8 + $0x548] sm:$0xf]  ;;  %v9324_v51 = vld [vmem:[#allocation8 + $0x274] sm:$0xf0] }
 0x2b0   :  { %5175 = vmatpush.bf16.msra.mxu1 %v7758_v45  ;;  %v3327_v45 = vadd.f32 %v3326_v41, %v3313_v37  ;;  %v8346_v17 = vor.u32 %v9437_v48, %v8343_v20  ;;  %v8286_v41 = vor.u32 %v9424_v0, %v8285_v16  ;;  %v8269_v37 = vld [vmem:[#allocation8 + $0x568] sm:$0xf]  ;;  %v7823_v16 = vld [vmem:[#allocation8 + $0x1f8] sm:$0xf0] }
 0x2b1   :  { %v3329_v25 = vadd.f32 %v3328_v61, %v3315_v63  ;;  %v8270_v8 = vor.u32 %v9420_v43, %v8269_v37  ;;  %v7885_v20 = vld [vmem:[#allocation8 + $0x268] sm:$0xf]  ;;  %v8254_v63 = vor.u32 %v9416_v55, %v8253_v3 }
 0x2b2   :  { %v3354_v38 = vmul.f32 0.2, %v3327_v45  ;;  %vm3338_vm15 = vcmp.gt.f32.partialorder %v3327_v45, 0.0  ;;  %5136 = vmatpush.bf16.msrb.mxu2 %v8346_v17  ;;  %v7886_v17 = vor.u32 %v9324_v51, %v7885_v20  ;;  %v7853_v0 = vld [vmem:[#allocation8 + $0x228] sm:$0xf] }
 0x2b3   :  { %5162 = vmatpush.bf16.msra.mxu3 %v7614_v28  ;;  %v7950_v28 = vor.u32 %v9340_v56, %v7949_v34  ;;  %vm3346_vm0 = vcmp.gt.f32.partialorder %v3329_v25, 0.0  ;;  %v3362_v53 = vmul.f32 0.2, %v3329_v25  ;;  %v9485_v34 = vld [vmem:[#allocation8 + $0x784] sm:$0xf] }
 0x2b4   :  { %5176 = vmatpush.bf16.msra.mxu1 %v7742_v21  ;;  %v8301_v21 = vld [vmem:[#allocation8 + $0x5a8] sm:$0xf]  ;;  %v8535_v56 = vld [vmem:[#allocation8 + $0x790] sm:$0xf0]  ;;  %v7791_v20 = vld [vmem:[#allocation8 + $0x1b8] sm:$0xf0] }
 0x2b5   :  { %v8302_v59 = vor.u32 %v9428_v6, %v8301_v21  ;;  %v3378_v10 = vsel %vm3346_vm0, %v3329_v25, %v3362_v53  ;;  %5137 = vmatmul.bf16.vlgmr.msrb.gmra.mxu2 %v10242_v24  ;;  %v8538_v61 = vor.u32 %v9485_v34, %v8535_v56  ;;  %v9320_v21 = vld [vmem:[#allocation8 + $0x254] sm:$0xf0]  ;;  %v8093_v25 = vld [vmem:[#allocation8 + $0x408] sm:$0xf]  ;;  %v9274_v53 = vld [vmem:[#allocation8 + $0xec] sm:$0xf] }
 0x2b6   :  { %5185 = vmatpush.bf16.msra.mxu2 %v7950_v28  ;;  %v7869_v28 = vld [vmem:[#allocation8 + $0x248] sm:$0xf]  ;;  %v9469_v51 = vld [vmem:[#allocation8 + $0x704] sm:$0xf]  ;;  %v9464_v56 = vld [vmem:[#allocation8 + $0x6d4] sm:$0xf0] }
 0x2b7   :  { %5163 = vmatpush.bf16.msra.mxu3 %v7598_v32  ;;  %v7934_v32 = vor.u32 %v9336_v12, %v7933_v35  ;;  %v9481_v35 = vld [vmem:[#allocation8 + $0x764] sm:$0xf]  ;;  %v8238_v12 = vor.u32 %v9412_v15, %v8237_v1  ;;  %v7870_v39 = vor.u32 %v9320_v21, %v7869_v28  ;;  %v7837_v43 = vld [vmem:[#allocation8 + $0x208] sm:$0xf]  ;;  %v9262_v1 = vld [vmem:[#allocation8 + $0x8c] sm:$0xf] }
 0x2b8   :  { %5177 = vmatpush.bf16.msra.mxu1 %v7726_v49  ;;  %v3370_v49 = vsel %vm3338_vm15, %v3327_v45, %v3354_v38  ;;  %v8126_v45 = vor.u32 %v9384_v23, %v8125_v57  ;;  %v8519_v38 = vld [vmem:[#allocation8 + $0x770] sm:$0xf0]  ;;  %v9266_v23 = vld [vmem:[#allocation8 + $0xac] sm:$0xf]  ;;  %v8445_v34 = vld [vmem:[#allocation8 + $0x6c8] sm:$0xf] }
 0x2b9   :  { %v10252_v27 = vpack.c.bf16 %v3378_v10, %v3370_v49  ;;  %v9316_v49 = vld [vmem:[#allocation8 + $0x234] sm:$0xf0]  ;;  %v8094_v10 = vor.u32 %v9376_v58, %v8093_v25  ;;  %v7647_v15 = vld [vmem:[#allocation8 + $0x98] sm:$0xf0]  ;;  %v8446_v28 = vor.u32 %v9464_v56, %v8445_v34  ;;  %v9294_v21 = vld [vmem:[#allocation8 + $0x18c] sm:$0xf] }
 0x2ba   :  { %5186 = vmatpush.bf16.msra.mxu2 %v7934_v32  ;;  %v8522_v32 = vor.u32 %v9481_v35, %v8519_v38  ;;  %v8429_v38 = vld [vmem:[#allocation8 + $0x6a8] sm:$0xf]  ;;  %v9460_v25 = vld [vmem:[#allocation8 + $0x6b4] sm:$0xf0]  ;;  %v7583_v34 = vld [vmem:[#allocation8 + $0x18] sm:$0xf0] }
 0x2bb   :  { %5164 = vmatpush.bf16.msra.mxu3 %v7582_v40  ;;  %5039 = vmatmul.bf16.vlgmr.msrb.gmra.mxu0 %v10252_v27  ;;  %v8570_v40 = vor.u32 %v9493_v18, %v8567_v2  ;;  %v9270_v18 = vld [vmem:[#allocation8 + $0xcc] sm:$0xf]  ;;  %v7826_v2 = vor.u32 %v9306_v11, %v7823_v16  ;;  %v8061_v58 = vld [vmem:[#allocation8 + $0x3c8] sm:$0xf]  ;;  %vm5983_vm15 = vcmask 7168  }
 0x2bc   :  { %5178 = vmatpush.bf16.msra.mxu1 %v7710_v46  ;;  %5143 = vmatpush.bf16.msrb.mxu0 %v8586_v30  ;;  %v9328_v46 = vld [vmem:[#allocation8 + $0x294] sm:$0xf0]  ;;  %v9477_v30 = vld [vmem:[#allocation8 + $0x744] sm:$0xf]  ;;  %v9290_v11 = vld [vmem:[#allocation8 + $0x16c] sm:$0xf] }
 0x2bd   :  { %v7902_v33 = vor.u32 %v9328_v46, %v7901_v13  ;;  %v8506_v37 = vor.u32 %v9477_v30, %v8503_v62  ;;  %v9473_v13 = vld [vmem:[#allocation8 + $0x724] sm:$0xf]  ;;  %v8487_v46 = vld [vmem:[#allocation8 + $0x730] sm:$0xf0]  ;;  %v8045_v30 = vld [vmem:[#allocation8 + $0x3a8] sm:$0xf] }
 0x2be   :  { %5165 = vmatmul.bf16.vlgmr.msra.gmra.mxu3 %v10187_v29  ;;  %5187 = vmatpush.bf16.msra.mxu2 %v7918_v50  ;;  %v7807_v50 = vld [vmem:[#allocation8 + $0x1d8] sm:$0xf0]  ;;  %v8490_v3 = vor.u32 %v9473_v13, %v8487_v46  ;;  %v9364_v62 = vld [vmem:[#allocation8 + $0x3b4] sm:$0xf0]  ;;  %v9278_v56 = vld [vmem:[#allocation8 + $0x10c] sm:$0xf] }
 0x2bf   :  { %5213 = vmatpush.bf16.msrb.mxu3 %v8206_v52  ;;  %5179 = vmatmul.bf16.vlgmr.msra.gmra.mxu1 %v10195_v42  ;;  %v8142_v52 = vor.u32 %v9388_v5, %v8141_v22  ;;  %v7679_v22 = vld [vmem:[#allocation8 + $0xd8] sm:$0xf0]  ;;  %v9302_v5 = vld [vmem:[#allocation8 + $0x1cc] sm:$0xf]  ;;  %v9360_v13 = vld [vmem:[#allocation8 + $0x394] sm:$0xf0] }
 0x2c0   :  { %5227 = vmatpush.bf16.msrb.mxu1 %v8334_v26  ;;  %v8551_v26 = vld [vmem:[#allocation8 + $0x7b0] sm:$0xf0]  ;;  %5144 = vmatpush.bf16.msrb.mxu0 %v8570_v40  ;;  %v9312_v40 = vld [vmem:[#allocation8 + $0x214] sm:$0xf0] }
 0x2c1   :  { %v8554_v48 = vor.u32 %v9489_v31, %v8551_v26  ;;  %v9468_v31 = vld [vmem:[#allocation8 + $0x6f4] sm:$0xf0]  ;;  %v7682_v26 = vor.u32 %v9270_v18, %v7679_v22  ;;  %v7838_v57 = vor.u32 %v9312_v40, %v7837_v43  ;;  %v7615_v18 = vld [vmem:[#allocation8 + $0x58] sm:$0xf0]  ;;  %v8029_v40 = vld [vmem:[#allocation8 + $0x388] sm:$0xf] }
 0x2c2   :  { %5188 = vmatpush.bf16.msra.mxu2 %v7902_v33  ;;  %v7663_v33 = vld [vmem:[#allocation8 + $0xb8] sm:$0xf0] }
 0x2c3   :  { %5214 = vmatpush.bf16.msrb.mxu3 %v8190_v54  ;;  %v8109_v54 = vld [vmem:[#allocation8 + $0x428] sm:$0xf]  ;;  %v7743_v22 = vld [vmem:[#allocation8 + $0x158] sm:$0xf0] }
 0x2c4   :  { %5228 = vmatpush.bf16.msrb.mxu1 %v8318_v44  ;;  %v9380_v44 = vld [vmem:[#allocation8 + $0x434] sm:$0xf0]  ;;  %5145 = vmatpush.bf16.msrb.mxu0 %v8554_v48  ;;  %v9298_v48 = vld [vmem:[#allocation8 + $0x1ac] sm:$0xf] }
 0x2c5   :  { %v8110_v6 = vor.u32 %v9380_v44, %v8109_v54  ;;  %v8077_v54 = vld [vmem:[#allocation8 + $0x3e8] sm:$0xf]  ;;  %v9372_v44 = vld [vmem:[#allocation8 + $0x3f4] sm:$0xf0] }
 0x2c6   :  { %5189 = vmatpush.bf16.msra.mxu2 %v7886_v17  ;;  %v7794_v17 = vor.u32 %v9298_v48, %v7791_v20  ;;  %v8078_v35 = vor.u32 %v9372_v44, %v8077_v54  ;;  %v8013_v48 = vld [vmem:[#allocation8 + $0x368] sm:$0xf]  ;;  %v9356_v20 = vld [vmem:[#allocation8 + $0x374] sm:$0xf0]  ;;  %v9402_v44 = vld [vmem:[#allocation8 + $0x4ec] sm:$0xf] }
 0x2c7   :  { %5215 = vmatpush.bf16.msrb.mxu3 %v8174_v47  ;;  %v8221_v47 = vld [vmem:[#allocation8 + $0x508] sm:$0xf] }
 0x2c8   :  { %5229 = vmatpush.bf16.msrb.mxu1 %v8302_v59  ;;  %v7695_v59 = vld [vmem:[#allocation8 + $0xf8] sm:$0xf0]  ;;  %5146 = vmatpush.bf16.msrb.mxu0 %v8538_v61  ;;  %v8222_v36 = vor.u32 %v9408_v19, %v8221_v47  ;;  %v9368_v47 = vld [vmem:[#allocation8 + $0x3d4] sm:$0xf0] }
 0x2c9   :  { %v8062_v16 = vor.u32 %v9368_v47, %v8061_v58  ;;  %v9398_v58 = vld [vmem:[#allocation8 + $0x4cc] sm:$0xf] }
 0x2ca   :  { %5190 = vmatpush.bf16.msra.mxu2 %v7870_v39  ;;  %v9258_v39 = vld [vmem:[#allocation8 + $0x6c] sm:$0xf] }
 0x2cb   :  { %5216 = vmatpush.bf16.msrb.mxu3 %v8158_v7  ;;  %v7698_v7 = vor.u32 %v9274_v53, %v7695_v59  ;;  %5095 = vmatmul.bf16.vlgmr.msra.gmra.mxu0 %v10205_v4  ;;  %v7631_v53 = vld [vmem:[#allocation8 + $0x78] sm:$0xf0]  ;;  %v8430_v59 = vor.u32 %v9460_v25, %v8429_v38  ;;  %v9352_v38 = vld [vmem:[#allocation8 + $0x354] sm:$0xf0] }
 0x2cc   :  { %5230 = vmatpush.bf16.msrb.mxu1 %v8286_v41  ;;  %v7854_v41 = vor.u32 %v9316_v49, %v7853_v0  ;;  %5147 = vmatpush.bf16.msrb.mxu0 %v8522_v32  ;;  %v7759_v32 = vld [vmem:[#allocation8 + $0x178] sm:$0xf0]  ;;  %v8413_v0 = vld [vmem:[#allocation8 + $0x688] sm:$0xf]  ;;  %v9456_v49 = vld [vmem:[#allocation8 + $0x694] sm:$0xf0] }
 0x2ce   :  { %5191 = vmatpush.bf16.msra.mxu2 %v7854_v41  ;;  %v9286_v41 = vld [vmem:[#allocation8 + $0x14c] sm:$0xf] }
 0x2cf   :  { %5217 = vmatpush.bf16.msrb.mxu3 %v8142_v52  ;;  %v8461_v52 = vld [vmem:[#allocation8 + $0x6e8] sm:$0xf]  ;;  %v7746_v46 = vor.u32 %v9286_v41, %v7743_v22 }
 0x2d0   :  { %5231 = vmatpush.bf16.msrb.mxu1 %v8270_v8  ;;  %v7810_v8 = vor.u32 %v9302_v5, %v7807_v50  ;;  %5148 = vmatpush.bf16.msrb.mxu0 %v8506_v37  ;;  %v8462_v55 = vor.u32 %v9468_v31, %v8461_v52  ;;  %v8046_v5 = vor.u32 %v9364_v62, %v8045_v30  ;;  %v8397_v50 = vld [vmem:[#allocation8 + $0x668] sm:$0xf]  ;;  %v9452_v37 = vld [vmem:[#allocation8 + $0x674] sm:$0xf0]  ;;  %v9250_v52 = vld [vmem:[#allocation8 + $0x2c] sm:$0xf] }
 0x2d1   :  { %v7599_v31 = vld [vmem:[#allocation8 + $0x38] sm:$0xf0] }
 0x2d2   :  { %5192 = vmatpush.bf16.msra.mxu2 %v7838_v57  ;;  %v7727_v57 = vld [vmem:[#allocation8 + $0x138] sm:$0xf0] }
 0x2d3   :  { %5218 = vmatpush.bf16.msrb.mxu3 %v8126_v45  ;;  %v8471_v45 = vld [vmem:[#allocation8 + $0x710] sm:$0xf0]  ;;  %v7951_v30 = vld [vmem:[#allocation8 + $0x2f8] sm:$0xf0] }
 0x2d4   :  { %5232 = vmatpush.bf16.msrb.mxu1 %v8254_v63  ;;  %v7666_v63 = vor.u32 %v9266_v23, %v7663_v33  ;;  %5149 = vmatpush.bf16.msrb.mxu0 %v8490_v3  ;;  %v8474_v61 = vor.u32 %v9469_v51, %v8471_v45  ;;  %v8030_v23 = vor.u32 %v9360_v13, %v8029_v40  ;;  %v8381_v33 = vld [vmem:[#allocation8 + $0x648] sm:$0xf]  ;;  %v9448_v3 = vld [vmem:[#allocation8 + $0x654] sm:$0xf0]  ;;  %v9246_v51 = vld [vmem:[#allocation8 + $0xc] sm:$0xf] }
 0x2d5   :  { %5193 = vmatmul.bf16.vlgmr.msra.gmra.mxu2 %v10202_v60  ;;  %v8382_v54 = vor.u32 %v9448_v3, %v8381_v33  ;;  %v9334_v40 = vld [vmem:[#allocation8 + $0x2cc] sm:$0xf]  ;;  %v7935_v13 = vld [vmem:[#allocation8 + $0x2d8] sm:$0xf0] }
 0x2d6   :  { %5241 = vmatpush.bf16.msrb.mxu2 %v8462_v55  ;;  %v7602_v55 = vor.u32 %v9250_v52, %v7599_v31  ;;  %v8589_v52 = vld [vmem:[#allocation8 + $0x7e8] sm:$0xf]  ;;  %v9500_v31 = vld [vmem:[#allocation8 + $0x7f4] sm:$0xf0]  ;;  %v9422_v33 = vld [vmem:[#allocation8 + $0x58c] sm:$0xf] }
 0x2d7   :  { %5219 = vmatpush.bf16.msrb.mxu3 %v8110_v6  ;;  %v7775_v6 = vld [vmem:[#allocation8 + $0x198] sm:$0xf0] }
 0x2d8   :  { %5233 = vmatpush.bf16.msrb.mxu1 %v8238_v12  ;;  %v7650_v12 = vor.u32 %v9262_v1, %v7647_v15  ;;  %v7778_v19 = vor.u32 %v9294_v21, %v7775_v6  ;;  %5150 = vmatpush.bf16.msrb.mxu0 %v8474_v61  ;;  %v9434_v1 = vld [vmem:[#allocation8 + $0x5ec] sm:$0xf]  ;;  %v8014_v15 = vor.u32 %v9356_v20, %v8013_v48  ;;  %v8335_v61 = vld [vmem:[#allocation8 + $0x5f8] sm:$0xf0]  ;;  %v9444_v21 = vld [vmem:[#allocation8 + $0x634] sm:$0xf0] }
 0x2d9   :  { %v7586_v6 = vor.u32 %v9246_v51, %v7583_v34  ;;  %v8338_v47 = vor.u32 %v9434_v1, %v8335_v61  ;;  %v8287_v3 = vld [vmem:[#allocation8 + $0x598] sm:$0xf0]  ;;  %v8573_v51 = vld [vmem:[#allocation8 + $0x7c8] sm:$0xf] }
 0x2da   :  { %5242 = vmatpush.bf16.msrb.mxu2 %v8446_v28  ;;  %v8365_v28 = vld [vmem:[#allocation8 + $0x628] sm:$0xf]  ;;  %v7919_v48 = vld [vmem:[#allocation8 + $0x2b8] sm:$0xf0]  ;;  %v8290_v34 = vor.u32 %v9422_v33, %v8287_v3 }
 0x2db   :  { %5220 = vmatpush.bf16.msrb.mxu3 %v8094_v10  ;;  %v7634_v10 = vor.u32 %v9258_v39, %v7631_v53  ;;  %5151 = vmatmul.bf16.vlgmr.msrb.gmra.mxu0 %v10252_v27  ;;  %v8191_v39 = vld [vmem:[#allocation8 + $0x4d8] sm:$0xf0]  ;;  %v9430_v53 = vld [vmem:[#allocation8 + $0x5cc] sm:$0xf] }
 0x2dc   :  { %5234 = vmatpush.bf16.msrb.mxu1 %v8222_v36  ;;  %5199 = vmatpush.bf16.msra.mxu0 %v8078_v35  ;;  %v7762_v36 = vor.u32 %v9290_v11, %v7759_v32  ;;  %v7997_v35 = vld [vmem:[#allocation8 + $0x348] sm:$0xf]  ;;  %v8194_v62 = vor.u32 %v9398_v58, %v8191_v39  ;;  %v7903_v61 = vld [vmem:[#allocation8 + $0x298] sm:$0xf0]  ;;  %v9414_v58 = vld [vmem:[#allocation8 + $0x54c] sm:$0xf] }
 0x2dd   :  { %v7998_v11 = vor.u32 %v9352_v38, %v7997_v35  ;;  %v8349_v32 = vld [vmem:[#allocation8 + $0x608] sm:$0xf]  ;;  %v9382_v38 = vld [vmem:[#allocation8 + $0x44c] sm:$0xf] }
 0x2de   :  { %5221 = vmatmul.bf16.vlgmr.msrb.gmra.mxu3 %v10223_v14  ;;  %5243 = vmatpush.bf16.msrb.mxu2 %v8430_v59  ;;  %v8319_v59 = vld [vmem:[#allocation8 + $0x5d8] sm:$0xf0]  ;;  %v9322_v39 = vld [vmem:[#allocation8 + $0x26c] sm:$0xf] }
 0x2df   :  { %5269 = vmatpush.bf16.msra.mxu3 %v7698_v7  ;;  %5235 = vmatmul.bf16.vlgmr.msrb.gmra.mxu1 %v10226_v9  ;;  %v9254_v7 = vld [vmem:[#allocation8 + $0x4c] sm:$0xf] }
 0x2e0   :  { %5283 = vmatpush.bf16.msra.mxu1 %v7826_v2  ;;  %v8414_v2 = vor.u32 %v9456_v49, %v8413_v0  ;;  %5200 = vmatpush.bf16.msra.mxu0 %v8062_v16  ;;  %v7618_v43 = vor.u32 %v9254_v7, %v7615_v18  ;;  %v9440_v16 = vld [vmem:[#allocation8 + $0x614] sm:$0xf0]  ;;  %v7981_v0 = vld [vmem:[#allocation8 + $0x328] sm:$0xf]  ;;  %v9394_v18 = vld [vmem:[#allocation8 + $0x4ac] sm:$0xf] }
 0x2e1   :  { %v9348_v49 = vld [vmem:[#allocation8 + $0x334] sm:$0xf0]  ;;  %v8350_v7 = vor.u32 %v9440_v16, %v8349_v32 }
 0x2e2   :  { %5244 = vmatpush.bf16.msrb.mxu2 %v8414_v2  ;;  %v8175_v2 = vld [vmem:[#allocation8 + $0x4b8] sm:$0xf0]  ;;  %v7982_v41 = vor.u32 %v9348_v49, %v7981_v0  ;;  %v9488_v32 = vld [vmem:[#allocation8 + $0x794] sm:$0xf0]  ;;  %v9378_v0 = vld [vmem:[#allocation8 + $0x42c] sm:$0xf] }
 0x2e3   :  { %5270 = vmatpush.bf16.msra.mxu3 %v7682_v26  ;;  %v8398_v26 = vor.u32 %v9452_v37, %v8397_v50  ;;  %v8303_v50 = vld [vmem:[#allocation8 + $0x5b8] sm:$0xf0]  ;;  %v7965_v37 = vld [vmem:[#allocation8 + $0x308] sm:$0xf] }
 0x2e4   :  { %5284 = vmatpush.bf16.msra.mxu1 %v7810_v8  ;;  %v9282_v8 = vld [vmem:[#allocation8 + $0x12c] sm:$0xf]  ;;  %5201 = vmatpush.bf16.msra.mxu0 %v8046_v5  ;;  %v8111_v49 = vld [vmem:[#allocation8 + $0x438] sm:$0xf0] }
 0x2e5   :  { %v7730_v45 = vor.u32 %v9282_v8, %v7727_v57  ;;  %v9426_v5 = vld [vmem:[#allocation8 + $0x5ac] sm:$0xf]  ;;  %v8159_v57 = vld [vmem:[#allocation8 + $0x498] sm:$0xf0] }
 0x2e6   :  { %5245 = vmatpush.bf16.msrb.mxu2 %v8398_v26  ;;  %v8306_v26 = vor.u32 %v9426_v5, %v8303_v50  ;;  %v9390_v8 = vld [vmem:[#allocation8 + $0x48c] sm:$0xf] }
 0x2e7   :  { %5271 = vmatpush.bf16.msra.mxu3 %v7666_v63  ;;  %v7711_v63 = vld [vmem:[#allocation8 + $0x118] sm:$0xf0]  ;;  %v8162_v20 = vor.u32 %v9390_v8, %v8159_v57  ;;  %v9374_v50 = vld [vmem:[#allocation8 + $0x40c] sm:$0xf] }
 0x2e8   :  { %5285 = vmatpush.bf16.msra.mxu1 %v7794_v17  ;;  %v8207_v17 = vld [vmem:[#allocation8 + $0x4f8] sm:$0xf0]  ;;  %5202 = vmatpush.bf16.msra.mxu0 %v8030_v23  ;;  %v7714_v25 = vor.u32 %v9278_v56, %v7711_v63  ;;  %v7938_v23 = vor.u32 %v9334_v40, %v7935_v13  ;;  %v9386_v56 = vld [vmem:[#allocation8 + $0x46c] sm:$0xf] }
 0x2e9   :  { %v8143_v63 = vld [vmem:[#allocation8 + $0x478] sm:$0xf0] }
 0x2ea   :  { %5246 = vmatpush.bf16.msrb.mxu2 %v8382_v54  ;;  %v8223_v13 = vld [vmem:[#allocation8 + $0x518] sm:$0xf0] }
 0x2eb   :  { %5272 = vmatpush.bf16.msra.mxu3 %v7650_v12  ;;  %v8210_v12 = vor.u32 %v9402_v44, %v8207_v17  ;;  %v9418_v44 = vld [vmem:[#allocation8 + $0x56c] sm:$0xf]  ;;  %v8271_v17 = vld [vmem:[#allocation8 + $0x578] sm:$0xf0] }
 0x2ec   :  { %5286 = vmatpush.bf16.msra.mxu1 %v7778_v19  ;;  %v8366_v19 = vor.u32 %v9444_v21, %v8365_v28  ;;  %5203 = vmatpush.bf16.msra.mxu0 %v8014_v15  ;;  %v9326_v15 = vld [vmem:[#allocation8 + $0x28c] sm:$0xf]  ;;  %v8146_v28 = vor.u32 %v9386_v56, %v8143_v63  ;;  %v8557_v21 = vld [vmem:[#allocation8 + $0x7a8] sm:$0xf]  ;;  %v8274_v35 = vor.u32 %v9418_v44, %v8271_v17  ;;  %v7855_v8 = vld [vmem:[#allocation8 + $0x238] sm:$0xf0] }
 0x2ed   :  { %v9476_v56 = vld [vmem:[#allocation8 + $0x734] sm:$0xf0]  ;;  %v9466_v63 = vld [vmem:[#allocation8 + $0x6ec] sm:$0xf] }
 0x2ee   :  { %5247 = vmatpush.bf16.msrb.mxu2 %v8366_v19 }
 0x2ef   :  { %5273 = vmatpush.bf16.msra.mxu3 %v7634_v10  ;;  %v9338_v10 = vld [vmem:[#allocation8 + $0x2ec] sm:$0xf] }
 0x2f0   :  { %5287 = vmatpush.bf16.msra.mxu1 %v7762_v36  ;;  %v8322_v36 = vor.u32 %v9430_v53, %v8319_v59  ;;  %5204 = vmatpush.bf16.msra.mxu0 %v7998_v11  ;;  %v7954_v22 = vor.u32 %v9338_v10, %v7951_v30  ;;  %v7887_v53 = vld [vmem:[#allocation8 + $0x278] sm:$0xf0]  ;;  %v8541_v11 = vld [vmem:[#allocation8 + $0x788] sm:$0xf]  ;;  %v9410_v30 = vld [vmem:[#allocation8 + $0x52c] sm:$0xf] }
 0x2f1   :  { %v7890_v10 = vor.u32 %v9322_v39, %v7887_v53 }
 0x2f2   :  { %5248 = vmatpush.bf16.msrb.mxu2 %v8350_v7  ;;  %v9318_v7 = vld [vmem:[#allocation8 + $0x24c] sm:$0xf] }
 0x2f3   :  { %5274 = vmatpush.bf16.msra.mxu3 %v7618_v43  ;;  %v9344_v43 = vld [vmem:[#allocation8 + $0x314] sm:$0xf0] }
 0x2f4   :  { %5288 = vmatpush.bf16.msra.mxu1 %v7746_v46  ;;  %v8178_v46 = vor.u32 %v9394_v18, %v8175_v2  ;;  %5205 = vmatpush.bf16.msra.mxu0 %v7982_v41  ;;  %v7871_v18 = vld [vmem:[#allocation8 + $0x258] sm:$0xf0]  ;;  %v8114_v2 = vor.u32 %v9378_v0, %v8111_v49  ;;  %v8525_v41 = vld [vmem:[#allocation8 + $0x768] sm:$0xf]  ;;  %v8621_v0 = vld [vmem:[#allocation11 + $0x30] sm:$0xf] }
 0x2f5   :  { %5249 = vmatmul.bf16.vlgmr.msrb.gmra.mxu2 %v10242_v24  ;;  %v7874_v40 = vor.u32 %v9318_v7, %v7871_v18  ;;  %v9508_v49 = vld [vmem:[#allocation11 + $0x34] sm:$0xf0]  ;;  %v9362_v7 = vld [vmem:[#allocation8 + $0x3ac] sm:$0xf] }
 0x2f6   :  { %5297 = vmatpush.bf16.msra.mxu2 %v7954_v22  ;;  %v9484_v22 = vld [vmem:[#allocation8 + $0x774] sm:$0xf0]  ;;  %v8047_v18 = vld [vmem:[#allocation8 + $0x3b8] sm:$0xf0] }
 0x2f7   :  { %5275 = vmatpush.bf16.msra.mxu3 %v7602_v55  ;;  %v8590_v55 = vor.u32 %v9500_v31, %v8589_v52  ;;  %v9516_v52 = vld [vmem:[#allocation11 + $0x74] sm:$0xf0]  ;;  %v8526_v31 = vor.u32 %v9484_v22, %v8525_v41  ;;  %v9506_v41 = vld [vmem:[#allocation11 + $0x24] sm:$0xf0]  ;;  %v10269_v22 = vpop.f32.mrf.mxu3 }
 0x2f8   :  { %5289 = vmatpush.bf16.msra.mxu1 %v7730_v45  ;;  %v9496_v45 = vld [vmem:[#allocation8 + $0x7d4] sm:$0xf0] }
 0x2f9   :  { %v8574_v1 = vor.u32 %v9496_v45, %v8573_v51  ;;  %v9310_v51 = vld [vmem:[#allocation8 + $0x20c] sm:$0xf]  ;;  %v7839_v45 = vld [vmem:[#allocation8 + $0x218] sm:$0xf0] }
 0x2fa   :  { %5298 = vmatpush.bf16.msra.mxu2 %v7938_v23  ;;  %v9480_v23 = vld [vmem:[#allocation8 + $0x754] sm:$0xf0]  ;;  %v7842_v17 = vor.u32 %v9310_v51, %v7839_v45  ;;  %v8597_v45 = vld [vmem:[#allocation11] sm:$0xf] }
 0x2fb   :  { %5276 = vmatpush.bf16.msra.mxu3 %v7586_v6  ;;  %v9492_v6 = vld [vmem:[#allocation8 + $0x7b4] sm:$0xf0] }
 0x2fc   :  { %5290 = vmatpush.bf16.msra.mxu1 %v7714_v25  ;;  %v8127_v25 = vld [vmem:[#allocation8 + $0x458] sm:$0xf0]  ;;  %v8558_v19 = vor.u32 %v9492_v6, %v8557_v21  ;;  %v8477_v21 = vld [vmem:[#allocation8 + $0x708] sm:$0xf]  ;;  %v9472_v6 = vld [vmem:[#allocation8 + $0x714] sm:$0xf0] }
 0x2fd   :  { %v8130_v59 = vor.u32 %v9382_v38, %v8127_v25  ;;  %v8447_v38 = vld [vmem:[#allocation8 + $0x6d8] sm:$0xf0]  ;;  %v9370_v25 = vld [vmem:[#allocation8 + $0x3ec] sm:$0xf]  ;;  %v8478_v39 = vor.u32 %v9472_v6, %v8477_v21 }
 0x2fe   :  { %5277 = vmatmul.bf16.vlgmr.msra.gmra.mxu3 %v10187_v29  ;;  %v7966_v29 = vor.u32 %v9344_v43, %v7965_v37  ;;  %v8095_v37 = vld [vmem:[#allocation8 + $0x418] sm:$0xf0]  ;;  %v9406_v43 = vld [vmem:[#allocation8 + $0x50c] sm:$0xf] }
 0x2ff   :  { %5325 = vmatpush.bf16.msrb.mxu3 %v8210_v12  ;;  %5291 = vmatmul.bf16.vlgmr.msra.gmra.mxu1 %v10195_v42  ;;  %v9330_v42 = vld [vmem:[#allocation8 + $0x2ac] sm:$0xf]  ;;  %v7906_v12 = vor.u32 %v9326_v15, %v7903_v61  ;;  %v8098_v57 = vor.u32 %v9374_v50, %v8095_v37  ;;  %v8226_v33 = vor.u32 %v9406_v43, %v8223_v13  ;;  %v9512_v15 = vld [vmem:[#allocation11 + $0x54] sm:$0xf0] }
 0x300   :  { %5339 = vmatpush.bf16.msrb.mxu1 %v8338_v47  ;;  %5206 = vmatpush.bf16.msra.mxu0 %v7966_v29  ;;  %v7922_v54 = vor.u32 %v9330_v42, %v7919_v48  ;;  %v8255_v47 = vld [vmem:[#allocation8 + $0x558] sm:$0xf0]  ;;  %v8509_v29 = vld [vmem:[#allocation8 + $0x748] sm:$0xf]  ;;  %v8645_v42 = vld [vmem:[#allocation11 + $0x60] sm:$0xf]  ;;  %v8050_v50 = vor.u32 %v9362_v7, %v8047_v18 }
 0x301   :  { %v8258_v16 = vor.u32 %v9414_v58, %v8255_v47  ;;  %v9514_v48 = vld [vmem:[#allocation11 + $0x64] sm:$0xf0]  ;;  %v8629_v47 = vld [vmem:[#allocation11 + $0x40] sm:$0xf]  ;;  %v8399_v43 = vld [vmem:[#allocation8 + $0x678] sm:$0xf0] }
 0x302   :  { %5299 = vmatpush.bf16.msra.mxu2 %v7922_v54  ;;  %v8463_v54 = vld [vmem:[#allocation8 + $0x6f8] sm:$0xf0]  ;;  %v8646_v44 = vor.u32 %v9514_v48, %v8645_v42  ;;  %v9450_v37 = vld [vmem:[#allocation8 + $0x66c] sm:$0xf]  ;;  %v9511_v7 = vld [vmem:[#allocation11 + $0x54] sm:$0xf] }
 0x303   :  { %5326 = vmatpush.bf16.msrb.mxu3 %v8194_v62  ;;  %5207 = vmatmul.bf16.vlgmr.msra.gmra.mxu0 %v10205_v4  ;;  %v8239_v62 = vld [vmem:[#allocation8 + $0x538] sm:$0xf0]  ;;  %v9358_v13 = vld [vmem:[#allocation8 + $0x38c] sm:$0xf]  ;;  %v8639_v18 = vld [vmem:[#allocation11 + $0x58] sm:$0xf0] }
 0x304   :  { %5340 = vmatpush.bf16.msrb.mxu1 %v8322_v36  ;;  %5255 = vmatpush.bf16.msrb.mxu0 %v8590_v55  ;;  %v8542_v36 = vor.u32 %v9488_v32, %v8541_v11  ;;  %v8242_v5 = vor.u32 %v9410_v30, %v8239_v62  ;;  %v8431_v11 = vld [vmem:[#allocation8 + $0x6b8] sm:$0xf0]  ;;  %v9454_v62 = vld [vmem:[#allocation8 + $0x68c] sm:$0xf] }
 0x305   :  { %v8063_v32 = vld [vmem:[#allocation8 + $0x3d8] sm:$0xf0]  ;;  %v9354_v42 = vld [vmem:[#allocation8 + $0x36c] sm:$0xf] }
 0x306   :  { %5300 = vmatpush.bf16.msra.mxu2 %v7906_v12  ;;  %v8079_v12 = vld [vmem:[#allocation8 + $0x3f8] sm:$0xf0]  ;;  %v9350_v21 = vld [vmem:[#allocation8 + $0x34c] sm:$0xf] }
 0x307   :  { %5327 = vmatpush.bf16.msrb.mxu3 %v8178_v46  ;;  %v8653_v46 = vld [vmem:[#allocation11 + $0x70] sm:$0xf]  ;;  %v8015_v48 = vld [vmem:[#allocation8 + $0x378] sm:$0xf0] }
 0x308   :  { %5341 = vmatpush.bf16.msrb.mxu1 %v8306_v26  ;;  %5256 = vmatpush.bf16.msrb.mxu0 %v8574_v1  ;;  %v9314_v26 = vld [vmem:[#allocation8 + $0x22c] sm:$0xf]  ;;  %v8654_v3 = vor.u32 %v9516_v52, %v8653_v46  ;;  %v8637_v1 = vld [vmem:[#allocation11 + $0x50] sm:$0xf]  ;;  %v8031_v46 = vld [vmem:[#allocation8 + $0x398] sm:$0xf0] }
 0x309   :  { %v7858_v55 = vor.u32 %v9314_v26, %v7855_v8  ;;  %v8638_v58 = vor.u32 %v9512_v15, %v8637_v1  ;;  %v9504_v26 = vld [vmem:[#allocation11 + $0x14] sm:$0xf0]  ;;  %v10273_v8 = vpop.f32.mrf.mxu2  ;;  %v8709_v15 = vld [vmem:[#allocation11 + $0xe0] sm:$0xf] }
 0x30a   :  { %5301 = vmatpush.bf16.msra.mxu2 %v7890_v10  ;;  %v8367_v1 = vld [vmem:[#allocation8 + $0x638] sm:$0xf0] }
 0x30b   :  { %5328 = vmatpush.bf16.msrb.mxu3 %v8162_v20  ;;  %v8510_v20 = vor.u32 %v9480_v23, %v8509_v29  ;;  %v9446_v29 = vld [vmem:[#allocation8 + $0x64c] sm:$0xf]  ;;  %v8034_v23 = vor.u32 %v9358_v13, %v8031_v46  ;;  %v7999_v6 = vld [vmem:[#allocation8 + $0x358] sm:$0xf0] }
 0x30c   :  { %5342 = vmatpush.bf16.msrb.mxu1 %v8290_v34  ;;  %5257 = vmatpush.bf16.msrb.mxu0 %v8558_v19  ;;  %v8493_v34 = vld [vmem:[#allocation8 + $0x728] sm:$0xf]  ;;  %v9510_v19 = vld [vmem:[#allocation11 + $0x44] sm:$0xf0] }
 0x30d   :  { %v8494_v61 = vor.u32 %v9476_v56, %v8493_v34  ;;  %v9502_v34 = vld [vmem:[#allocation11 + $0x4] sm:$0xf0] }
 0x30e   :  { %5302 = vmatpush.bf16.msra.mxu2 %v7874_v40  ;;  %v10271_v40 = vpop.f32.mrf.mxu1  ;;  %v9498_v46 = vld [vmem:[#allocation8 + $0x7ec] sm:$0xf] }
 0x30f   :  { %5329 = vmatpush.bf16.msrb.mxu3 %v8146_v28  ;;  %v8466_v28 = vor.u32 %v9466_v63, %v8463_v54  ;;  %v9442_v63 = vld [vmem:[#allocation8 + $0x62c] sm:$0xf]  ;;  %v9515_v54 = vld [vmem:[#allocation11 + $0x74] sm:$0xf] }
 0x310   :  { %5343 = vmatpush.bf16.msrb.mxu1 %v8274_v35  ;;  %5258 = vmatpush.bf16.msrb.mxu0 %v8542_v36  ;;  %v9462_v35 = vld [vmem:[#allocation8 + $0x6cc] sm:$0xf]  ;;  %v8415_v36 = vld [vmem:[#allocation8 + $0x698] sm:$0xf0] }
 0x311   :  { %v8450_v53 = vor.u32 %v9462_v35, %v8447_v38  ;;  %v8598_v35 = vor.u32 %v9502_v34, %v8597_v45  ;;  %v8575_v45 = vld [vmem:[#allocation8 + $0x7d8] sm:$0xf0] }
 0x312   :  { %5303 = vmatpush.bf16.msra.mxu2 %v7858_v55  ;;  %v9532_v55 = vld [vmem:[#allocation11 + $0xf4] sm:$0xf0] }
 0x313   :  { %5330 = vmatpush.bf16.msrb.mxu3 %v8130_v59  ;;  %v9458_v59 = vld [vmem:[#allocation8 + $0x6ac] sm:$0xf] }
 0x314   :  { %5344 = vmatpush.bf16.msrb.mxu1 %v8258_v16  ;;  %5259 = vmatpush.bf16.msrb.mxu0 %v8526_v31  ;;  %v8630_v16 = vor.u32 %v9510_v19, %v8629_v47  ;;  %v8434_v10 = vor.u32 %v9458_v59, %v8431_v11  ;;  %v8605_v31 = vld [vmem:[#allocation11 + $0x10] sm:$0xf]  ;;  %v8370_v47 = vor.u32 %v9442_v63, %v8367_v1  ;;  %v9438_v19 = vld [vmem:[#allocation8 + $0x60c] sm:$0xf]  ;;  %v8351_v59 = vld [vmem:[#allocation8 + $0x618] sm:$0xf0] }
 0x315   :  { %v8701_v11 = vld [vmem:[#allocation11 + $0xd0] sm:$0xf]  ;;  %v8623_v63 = vld [vmem:[#allocation11 + $0x38] sm:$0xf0] }
 0x316   :  { %5304 = vmatpush.bf16.msra.mxu2 %v7842_v17  ;;  %v8018_v17 = vor.u32 %v9354_v42, %v8015_v48 }
 0x317   :  { %5331 = vmatpush.bf16.msrb.mxu3 %v8114_v2  ;;  %v8622_v2 = vor.u32 %v9508_v49, %v8621_v0  ;;  %v7983_v0 = vld [vmem:[#allocation8 + $0x338] sm:$0xf0] }
 0x318   :  { %5345 = vmatpush.bf16.msrb.mxu1 %v8242_v5  ;;  %5260 = vmatpush.bf16.msrb.mxu0 %v8510_v20  ;;  %v8418_v5 = vor.u32 %v9454_v62, %v8415_v36  ;;  %v8606_v20 = vor.u32 %v9504_v26, %v8605_v31  ;;  %v10282_v62 = vpop.f32.mrf.mxu0  ;;  %v8354_v36 = vor.u32 %v9438_v19, %v8351_v59  ;;  %v8543_v59 = vld [vmem:[#allocation8 + $0x798] sm:$0xf0] }
 0x319   :  { %5305 = vmatmul.bf16.vlgmr.msra.gmra.mxu2 %v10202_v60  ;;  %v8613_v60 = vld [vmem:[#allocation11 + $0x20] sm:$0xf]  ;;  %v8642_v31 = vor.u32 %v9511_v7, %v8639_v18  ;;  %v9531_v18 = vld [vmem:[#allocation11 + $0xf4] sm:$0xf] }
 0x31a   :  { %5353 = vmatpush.bf16.msrb.mxu2 %v8466_v28  ;;  %v8614_v52 = vor.u32 %v9506_v41, %v8613_v60  ;;  %v4944_v28 = vpop.f32.mrf.mxu3  ;;  %v8693_v60 = vld [vmem:[#allocation11 + $0xc0] sm:$0xf]  ;;  %v9526_v41 = vld [vmem:[#allocation11 + $0xc4] sm:$0xf0] }
 0x31b   :  { %5332 = vmatpush.bf16.msrb.mxu3 %v8098_v57  ;;  %v8402_v57 = vor.u32 %v9450_v37, %v8399_v43  ;;  %v7967_v37 = vld [vmem:[#allocation8 + $0x318] sm:$0xf0]  ;;  %v8694_v43 = vor.u32 %v9526_v41, %v8693_v60  ;;  %v9482_v60 = vld [vmem:[#allocation8 + $0x76c] sm:$0xf] }
 0x31c   :  { %5346 = vmatpush.bf16.msrb.mxu1 %v8226_v33  ;;  %5261 = vmatpush.bf16.msrb.mxu0 %v8494_v61  ;;  %v8383_v33 = vld [vmem:[#allocation8 + $0x658] sm:$0xf0]  ;;  %v9530_v61 = vld [vmem:[#allocation11 + $0xe4] sm:$0xf0] }
 0x31d   :  { %v8386_v56 = vor.u32 %v9446_v29, %v8383_v33  ;;  %v8710_v38 = vor.u32 %v9530_v61, %v8709_v15  ;;  %v8631_v29 = vld [vmem:[#allocation11 + $0x48] sm:$0xf0]  ;;  %v8685_v33 = vld [vmem:[#allocation11 + $0xb0] sm:$0xf]  ;;  %v8527_v41 = vld [vmem:[#allocation8 + $0x778] sm:$0xf0] }
 0x31e   :  { %5333 = vmatmul.bf16.vlgmr.msrb.gmra.mxu3 %v10223_v14  ;;  %v8082_v14 = vor.u32 %v9370_v25, %v8079_v12  ;;  %5354 = vmatpush.bf16.msrb.mxu2 %v8450_v53  ;;  %v10275_v25 = vld [vmem:[#allocation10] sm:$0xf]  ;;  %v8647_v53 = vld [vmem:[#allocation11 + $0x68] sm:$0xf0] }
 0x31f   :  { %5799 = vmatpush.bf16.msra.mxu3 %v8654_v3  ;;  %5347 = vmatmul.bf16.vlgmr.msrb.gmra.mxu1 %v10226_v9  ;;  %v9366_v9 = vld [vmem:[#allocation8 + $0x3cc] sm:$0xf]  ;;  %v8717_v3 = vld [vmem:[#allocation11 + $0xf0] sm:$0xf] }
 0x320   :  { %5262 = vmatpush.bf16.msrb.mxu0 %v8478_v39  ;;  %v8066_v30 = vor.u32 %v9366_v9, %v8063_v32  ;;  %v8718_v51 = vor.u32 %v9532_v55, %v8717_v3  ;;  %v9513_v39 = vld [vmem:[#allocation11 + $0x64] sm:$0xf]  ;;  %v9528_v9 = vld [vmem:[#allocation11 + $0xd4] sm:$0xf0]  ;;  %v10279_v32 = vpop.f32.mrf.mxu2 }
 0x321   :  { %v8702_v49 = vor.u32 %v9528_v9, %v8701_v11  ;;  %v9524_v3 = vld [vmem:[#allocation11 + $0xb4] sm:$0xf0] }
 0x322   :  { %5355 = vmatpush.bf16.msrb.mxu2 %v8434_v10  ;;  %5813 = vmatpush.bf16.msra.mxu1 %v8718_v51  ;;  %v3645_v10 = vperm.slane %v10275_v25, 0  ;;  %v8686_v48 = vor.u32 %v9524_v3, %v8685_v33  ;;  %v9494_v51 = vld [vmem:[#allocation8 + $0x7cc] sm:$0xf]  ;;  %v8511_v3 = vld [vmem:[#allocation8 + $0x758] sm:$0xf0] }
 0x323   :  { %5800 = vmatpush.bf16.msra.mxu3 %v8646_v44  ;;  %5263 = vmatmul.bf16.vlgmr.msrb.gmra.mxu0 %v10252_v27  ;;  %v8655_v44 = vld [vmem:[#allocation11 + $0x78] sm:$0xf0]  ;;  %v8578_v1 = vor.u32 %v9494_v51, %v8575_v45 }
 0x324   :  { %5311 = vmatpush.bf16.msra.mxu0 %v8082_v14  ;;  %v8658_v12 = vor.u32 %v9515_v54, %v8655_v44  ;;  %v8002_v14 = vor.u32 %v9350_v21, %v7999_v6  ;;  %v4943_v13 = vadd.f32 %v10269_v22, %v3645_v10  ;;  %v8677_v54 = vld [vmem:[#allocation11 + $0xa0] sm:$0xf]  ;;  %v9522_v44 = vld [vmem:[#allocation11 + $0xa4] sm:$0xf0] }
 0x325   :  { %v8678_v15 = vor.u32 %v9522_v44, %v8677_v54  ;;  %v9474_v44 = vld [vmem:[#allocation8 + $0x72c] sm:$0xf] }
 0x326   :  { %5356 = vmatpush.bf16.msrb.mxu2 %v8418_v5  ;;  %5814 = vmatpush.bf16.msra.mxu1 %v8710_v38  ;;  %v10284_v5 = vpop.f32.mrf.mxu3  ;;  %v4957_v22 = vadd.f32 %v10271_v40, %v4943_v13  ;;  %v8615_v38 = vld [vmem:[#allocation11 + $0x28] sm:$0xf0]  ;;  %v9501_v13 = vld [vmem:[#allocation11 + $0x4] sm:$0xf] }
 0x327   :  { %5801 = vmatpush.bf16.msra.mxu3 %v8638_v58  ;;  %v10277_v58 = vpop.f32.mrf.mxu1 }
 0x328   :  { %5312 = vmatpush.bf16.msra.mxu0 %v8066_v30  ;;  %v8650_v30 = vor.u32 %v9513_v39, %v8647_v53  ;;  %v10289_v55 = vpop.f32.mrf.mxu2  ;;  %v4971_v61 = vadd.f32 %v10273_v8, %v4957_v22 }
 0x32a   :  { %5357 = vmatpush.bf16.msrb.mxu2 %v8402_v57  ;;  %5815 = vmatpush.bf16.msra.mxu1 %v8702_v49  ;;  %v9509_v57 = vld [vmem:[#allocation11 + $0x44] sm:$0xf]  ;;  %v8661_v49 = vld [vmem:[#allocation11 + $0x80] sm:$0xf] }
 0x32b   :  { %5802 = vmatpush.bf16.msra.mxu3 %v8630_v16  ;;  %v9346_v16 = vld [vmem:[#allocation8 + $0x32c] sm:$0xf]  ;;  %v8634_v34 = vor.u32 %v9509_v57, %v8631_v29  ;;  %v9529_v57 = vld [vmem:[#allocation11 + $0xe4] sm:$0xf]  ;;  %v8711_v29 = vld [vmem:[#allocation11 + $0xe8] sm:$0xf0] }
 0x32c   :  { %5313 = vmatpush.bf16.msra.mxu0 %v8050_v50  ;;  %v9342_v50 = vld [vmem:[#allocation8 + $0x30c] sm:$0xf] }
 0x32e   :  { %5358 = vmatpush.bf16.msrb.mxu2 %v8386_v56  ;;  %5816 = vmatpush.bf16.msra.mxu1 %v8694_v43  ;;  %v9507_v56 = vld [vmem:[#allocation11 + $0x34] sm:$0xf]  ;;  %v5000_v6 = vpop.f32.mrf.mxu3 }
 0x32f   :  { %5803 = vmatpush.bf16.msra.mxu3 %v8622_v2  ;;  %v7986_v2 = vor.u32 %v9346_v16, %v7983_v0  ;;  %v10287_v26 = vpop.f32.mrf.mxu1  ;;  %v8626_v21 = vor.u32 %v9507_v56, %v8623_v63  ;;  %v9503_v16 = vld [vmem:[#allocation11 + $0x14] sm:$0xf]  ;;  %v8703_v56 = vld [vmem:[#allocation11 + $0xd8] sm:$0xf0] }
 0x330   :  { %5314 = vmatpush.bf16.msra.mxu0 %v8034_v23  ;;  %v7970_v23 = vor.u32 %v9342_v50, %v7967_v37  ;;  %v5028_v9 = vpop.f32.mrf.mxu2 }
 0x332   :  { %5359 = vmatpush.bf16.msrb.mxu2 %v8370_v47  ;;  %5817 = vmatpush.bf16.msra.mxu1 %v8686_v48  ;;  %v9520_v47 = vld [vmem:[#allocation11 + $0x94] sm:$0xf0]  ;;  %v8714_v48 = vor.u32 %v9529_v57, %v8711_v29  ;;  %v8663_v57 = vld [vmem:[#allocation11 + $0x88] sm:$0xf0] }
 0x333   :  { %5804 = vmatpush.bf16.msra.mxu3 %v8614_v52  ;;  %v8591_v52 = vld [vmem:[#allocation8 + $0x7f8] sm:$0xf0] }
 0x334   :  { %5315 = vmatpush.bf16.msra.mxu0 %v8018_v17  ;;  %v8594_v42 = vor.u32 %v9498_v46, %v8591_v52  ;;  %v4986_v17 = vpop.f32.mrf.mxu0  ;;  %v8599_v46 = vld [vmem:[#allocation11 + $0x8] sm:$0xf0] }
 0x336   :  { %5360 = vmatpush.bf16.msrb.mxu2 %v8354_v36  ;;  %5818 = vmatpush.bf16.msra.mxu1 %v8678_v15  ;;  %v5054_v43 = vpop.f32.mrf.mxu3  ;;  %v3646_v15 = vperm.slane %v10275_v25, 1 }
 0x337   :  { %5805 = vmatpush.bf16.msra.mxu3 %v8606_v20  ;;  %v4945_v20 = vadd.f32 %v4944_v28, %v3645_v10  ;;  %v9490_v28 = vld [vmem:[#allocation8 + $0x7ac] sm:$0xf]  ;;  %v5014_v19 = vpop.f32.mrf.mxu1 }
 0x338   :  { %5316 = vmatpush.bf16.msra.mxu0 %v8002_v14  ;;  %v9486_v14 = vld [vmem:[#allocation8 + $0x78c] sm:$0xf]  ;;  %v5082_v51 = vpop.f32.mrf.mxu2 }
 0x339   :  { %5361 = vmatmul.bf16.vlgmr.msrb.gmra.mxu2 %v10242_v24  ;;  %v4959_v40 = vadd.f32 %v10277_v58, %v4945_v20  ;;  %v8559_v24 = vld [vmem:[#allocation8 + $0x7b8] sm:$0xf0]  ;;  %v4985_v58 = vadd.f32 %v10282_v62, %v4971_v61  ;;  %v9518_v10 = vld [vmem:[#allocation11 + $0x84] sm:$0xf0]  ;;  %v8546_v36 = vor.u32 %v9486_v14, %v8543_v59  ;;  %v9523_v14 = vld [vmem:[#allocation11 + $0xb4] sm:$0xf] }
 0x33a   :  { %v8562_v39 = vor.u32 %v9490_v28, %v8559_v24  ;;  %v8662_v7 = vor.u32 %v9518_v10, %v8661_v49  ;;  %v9525_v24 = vld [vmem:[#allocation11 + $0xc4] sm:$0xf]  ;;  %v8687_v59 = vld [vmem:[#allocation11 + $0xb8] sm:$0xf0]  ;;  %v8679_v49 = vld [vmem:[#allocation11 + $0xa8] sm:$0xf0] }
 0x33b   :  { %5806 = vmatpush.bf16.msra.mxu3 %v8598_v35  ;;  %v9505_v35 = vld [vmem:[#allocation11 + $0x24] sm:$0xf]  ;;  %v4973_v8 = vadd.f32 %v10279_v32, %v4959_v40  ;;  %v4999_v0 = vadd.f32 %v10284_v5, %v4985_v58  ;;  %v8719_v32 = vld [vmem:[#allocation11 + $0xf8] sm:$0xf0] }
 0x33c   :  { %5317 = vmatpush.bf16.msra.mxu0 %v7986_v2  ;;  %v8618_v11 = vor.u32 %v9505_v35, %v8615_v38  ;;  %v8722_v37 = vor.u32 %v9531_v18, %v8719_v32  ;;  %v9470_v38 = vld [vmem:[#allocation8 + $0x70c] sm:$0xf] }
 0x33d   :  { %v4987_v2 = vadd.f32 %v4986_v17, %v4973_v8  ;;  %v5013_v62 = vadd.f32 %v10287_v26, %v4999_v0  ;;  %v9478_v26 = vld [vmem:[#allocation8 + $0x74c] sm:$0xf]  ;;  %v8495_v17 = vld [vmem:[#allocation8 + $0x738] sm:$0xf0]  ;;  %v9521_v0 = vld [vmem:[#allocation11 + $0xa4] sm:$0xf] }
 0x33e   :  { %v5056_v40 = vpop.f32.mrf.mxu3  ;;  %v8498_v28 = vor.u32 %v9474_v44, %v8495_v17  ;;  %v8757_v17 = vld [vmem:[#allocation11 + $0x140] sm:$0xf] }
 0x33f   :  { %5855 = vmatpush.bf16.msrb.mxu3 %v8658_v12  ;;  %v8669_v12 = vld [vmem:[#allocation11 + $0x90] sm:$0xf]  ;;  %v5001_v5 = vadd.f32 %v5000_v6, %v4987_v2  ;;  %v5027_v52 = vadd.f32 %v10289_v55, %v5013_v62  ;;  %v5068_v22 = vpop.f32.mrf.mxu1  ;;  %v9527_v55 = vld [vmem:[#allocation11 + $0xd4] sm:$0xf] }
 0x340   :  { %5318 = vmatpush.bf16.msra.mxu0 %v7970_v23  ;;  %v8670_v53 = vor.u32 %v9520_v47, %v8669_v12  ;;  %v8479_v12 = vld [vmem:[#allocation8 + $0x718] sm:$0xf0]  ;;  %v9519_v62 = vld [vmem:[#allocation11 + $0x94] sm:$0xf] }
 0x341   :  { %v5015_v23 = vadd.f32 %v5014_v19, %v5001_v5  ;;  %v8482_v58 = vor.u32 %v9470_v38, %v8479_v12  ;;  %v9548_v5 = vld [vmem:[#allocation11 + $0x174] sm:$0xf0] }
 0x342   :  { %5819 = vmatpush.bf16.msra.mxu1 %v8670_v53 }
 0x343   :  { %5856 = vmatpush.bf16.msrb.mxu3 %v8650_v30  ;;  %5319 = vmatmul.bf16.vlgmr.msra.gmra.mxu0 %v10205_v4  ;;  %v8607_v4 = vld [vmem:[#allocation11 + $0x18] sm:$0xf0]  ;;  %v5040_v30 = vpop.f32.mrf.mxu0  ;;  %v5029_v20 = vadd.f32 %v5028_v9, %v5015_v23  ;;  %v5084_v9 = vpop.f32.mrf.mxu2 }
 0x344   :  { %5367 = vmatpush.bf16.msrb.mxu0 %v8594_v42  ;;  %v8610_v50 = vor.u32 %v9503_v16, %v8607_v4  ;;  %v5041_v33 = vadd.f32 %v5040_v30, %v5027_v52  ;;  %v8602_v42 = vor.u32 %v9501_v13, %v8599_v46  ;;  %v5057_v16 = vadd.f32 %v5056_v40, %v3646_v15  ;;  %v8781_v46 = vld [vmem:[#allocation11 + $0x170] sm:$0xf]  ;;  %v9517_v52 = vld [vmem:[#allocation11 + $0x84] sm:$0xf] }
 0x345   :  { %v8682_v30 = vor.u32 %v9521_v0, %v8679_v49  ;;  %v8666_v23 = vor.u32 %v9517_v52, %v8663_v57  ;;  %v9545_v49 = vld [vmem:[#allocation11 + $0x164] sm:$0xf] }
 0x346   :  { %5820 = vmatpush.bf16.msra.mxu1 %v8662_v7  ;;  %v5389_v63 = vmul.f32 0.2, %v5041_v33  ;;  %vm5381_vm1 = vcmp.gt.f32.partialorder %v5041_v33, 0.0  ;;  %v5110_v10 = vpop.f32.mrf.mxu3  ;;  %v9537_v57 = vld [vmem:[#allocation11 + $0x124] sm:$0xf] }
 0x347   :  { %5857 = vmatpush.bf16.msrb.mxu3 %v8642_v31  ;;  %v8530_v31 = vor.u32 %v9482_v60, %v8527_v41  ;;  %v5070_v53 = vpop.f32.mrf.mxu1  ;;  %v8671_v60 = vld [vmem:[#allocation11 + $0x98] sm:$0xf0] }
 0x348   :  { %5368 = vmatpush.bf16.msrb.mxu0 %v8578_v1  ;;  %v8706_v1 = vor.u32 %v9527_v55, %v8703_v56  ;;  %v5397_v6 = vsel %vm5381_vm1, %v5041_v33, %v5389_v63  ;;  %v5071_v7 = vadd.f32 %v5070_v53, %v5057_v16  ;;  %v8733_v53 = vld [vmem:[#allocation11 + $0x110] sm:$0xf]  ;;  %v8783_v16 = vld [vmem:[#allocation11 + $0x178] sm:$0xf0] }
 0x34a   :  { %5869 = vmatpush.bf16.msrb.mxu1 %v8722_v37  ;;  %v5085_v41 = vadd.f32 %v5084_v9, %v5071_v7  ;;  %v9547_v9 = vld [vmem:[#allocation11 + $0x174] sm:$0xf] }
 0x34b   :  { %5858 = vmatpush.bf16.msrb.mxu3 %v8634_v34  ;;  %v5042_v45 = vpop.f32.mrf.mxu0  ;;  %v8514_v34 = vor.u32 %v9478_v26, %v8511_v3  ;;  %v5138_v13 = vpop.f32.mrf.mxu2  ;;  %v8773_v3 = vld [vmem:[#allocation11 + $0x160] sm:$0xf]  ;;  %v9543_v7 = vld [vmem:[#allocation11 + $0x154] sm:$0xf] }
 0x34c   :  { %5369 = vmatpush.bf16.msrb.mxu0 %v8562_v39  ;;  %v5043_v54 = vadd.f32 %v5042_v45, %v5029_v20  ;;  %v5055_v39 = vadd.f32 %v5054_v43, %v3646_v15  ;;  %v8765_v45 = vld [vmem:[#allocation11 + $0x150] sm:$0xf] }
 0x34e   :  { %5870 = vmatpush.bf16.msrb.mxu1 %v8714_v48  ;;  %vm5385_vm2 = vcmp.gt.f32.partialorder %v5043_v54, 0.0  ;;  %v5393_v61 = vmul.f32 0.2, %v5043_v54  ;;  %v5069_v4 = vadd.f32 %v5068_v22, %v5055_v39  ;;  %v5112_v29 = vpop.f32.mrf.mxu3 }
 0x34f   :  { %5859 = vmatpush.bf16.msrb.mxu3 %v8626_v21  ;;  %v8695_v21 = vld [vmem:[#allocation11 + $0xc8] sm:$0xf0]  ;;  %v5124_v32 = vpop.f32.mrf.mxu1 }
 0x350   :  { %5370 = vmatpush.bf16.msrb.mxu0 %v8546_v36  ;;  %v5401_v35 = vsel %vm5385_vm2, %v5043_v54, %v5393_v61  ;;  %v8698_v47 = vor.u32 %v9525_v24, %v8695_v21  ;;  %v5083_v36 = vadd.f32 %v5082_v51, %v5069_v4  ;;  %v8749_v24 = vld [vmem:[#allocation11 + $0x130] sm:$0xf]  ;;  %v9540_v21 = vld [vmem:[#allocation11 + $0x134] sm:$0xf0]  ;;  %v8786_v4 = vor.u32 %v9547_v9, %v8783_v16 }
 0x351   :  { %v5405_v19 = vpack.c.bf16 %v5401_v35, %v5397_v6  ;;  %v8750_v38 = vor.u32 %v9540_v21, %v8749_v24 }
 0x352   :  { %5871 = vmatpush.bf16.msrb.mxu1 %v8706_v1  ;;  %v9542_v1 = vld [vmem:[#allocation11 + $0x144] sm:$0xf0] }
 0x353   :  { %5860 = vmatpush.bf16.msrb.mxu3 %v8618_v11  ;;  %v5096_v8 = vpop.f32.mrf.mxu0  ;;  %v8690_v11 = vor.u32 %v9523_v14, %v8687_v59  ;;  %v5140_v63 = vpop.f32.mrf.mxu2  ;;  %v8758_v40 = vor.u32 %v9542_v1, %v8757_v17  ;;  %v8725_v14 = vld [vmem:[#allocation11 + $0x100] sm:$0xf]  ;;  %v9534_v59 = vld [vmem:[#allocation11 + $0x104] sm:$0xf0]  ;;  %v8727_v17 = vld [vmem:[#allocation11 + $0x108] sm:$0xf0] }
 0x354   :  { %5371 = vmatpush.bf16.msrb.mxu0 %v8530_v31  ;;  %5807 = vmatmul.bf16.vlgmr.msra.gmra.mxu3 %v5405_v19  ;;  %v5097_v18 = vadd.f32 %v5096_v8, %v5083_v36  ;;  %v8782_v31 = vor.u32 %v9548_v5, %v8781_v46  ;;  %v9536_v8 = vld [vmem:[#allocation11 + $0x114] sm:$0xf0]  ;;  %v9539_v46 = vld [vmem:[#allocation11 + $0x134] sm:$0xf]  ;;  %v8751_v5 = vld [vmem:[#allocation11 + $0x138] sm:$0xf0] }
 0x356   :  { %5872 = vmatpush.bf16.msrb.mxu1 %v8698_v47  ;;  %v5111_v37 = vadd.f32 %v5110_v10, %v5097_v18  ;;  %5827 = vmatpush.bf16.msra.mxu2 %v8782_v31  ;;  %v8741_v47 = vld [vmem:[#allocation11 + $0x120] sm:$0xf]  ;;  %v5166_v0 = vpop.f32.mrf.mxu3  ;;  %v8775_v10 = vld [vmem:[#allocation11 + $0x168] sm:$0xf0]  ;;  %v8767_v18 = vld [vmem:[#allocation11 + $0x158] sm:$0xf0]  ;;  %v8754_v31 = vor.u32 %v9539_v46, %v8751_v5 }
 0x357   :  { %5861 = vmatpush.bf16.msrb.mxu3 %v8610_v50  ;;  %v8674_v50 = vor.u32 %v9519_v62, %v8671_v60  ;;  %v5126_v22 = vpop.f32.mrf.mxu1  ;;  %v3647_v62 = vperm.slane %v10275_v25, 2  ;;  %v9541_v60 = vld [vmem:[#allocation11 + $0x144] sm:$0xf]  ;;  %v8789_v5 = vld [vmem:[#allocation11 + $0x180] sm:$0xf] }
 0x358   :  { %5372 = vmatpush.bf16.msrb.mxu0 %v8514_v34  ;;  %v9544_v34 = vld [vmem:[#allocation11 + $0x154] sm:$0xf0] }
 0x359   :  { %v8766_v56 = vor.u32 %v9544_v34, %v8765_v45 }
 0x35a   :  { %5873 = vmatpush.bf16.msrb.mxu1 %v8690_v11  ;;  %v8726_v11 = vor.u32 %v9534_v59, %v8725_v14 }
 0x35b   :  { %5862 = vmatpush.bf16.msrb.mxu3 %v8602_v42  ;;  %v5098_v2 = vpop.f32.mrf.mxu0  ;;  %v9546_v42 = vld [vmem:[#allocation11 + $0x164] sm:$0xf0] }
 0x35c   :  { %5373 = vmatpush.bf16.msrb.mxu0 %v8498_v28  ;;  %v5099_v43 = vadd.f32 %v5098_v2, %v5085_v41  ;;  %v8774_v48 = vor.u32 %v9546_v42, %v8773_v3  ;;  %v5194_v2 = vpop.f32.mrf.mxu2  ;;  %v8759_v41 = vld [vmem:[#allocation11 + $0x148] sm:$0xf0]  ;;  %v8735_v3 = vld [vmem:[#allocation11 + $0x118] sm:$0xf0] }
 0x35e   :  { %5874 = vmatpush.bf16.msrb.mxu1 %v8682_v30  ;;  %v5113_v33 = vadd.f32 %v5112_v29, %v5099_v43  ;;  %5828 = vmatpush.bf16.msra.mxu2 %v8774_v48  ;;  %v8778_v30 = vor.u32 %v9545_v49, %v8775_v10  ;;  %v8743_v29 = vld [vmem:[#allocation11 + $0x128] sm:$0xf0] }
 0x35f   :  { %v5180_v36 = vpop.f32.mrf.mxu1 }
 0x360   :  { %5374 = vmatpush.bf16.msrb.mxu0 %v8482_v58  ;;  %v5127_v51 = vadd.f32 %v5126_v22, %v5113_v33  ;;  %v8734_v58 = vor.u32 %v9536_v8, %v8733_v53  ;;  %v8829_v8 = vld [vmem:[#allocation11 + $0x1d0] sm:$0xf] }
 0x362   :  { %5875 = vmatpush.bf16.msrb.mxu1 %v8674_v50  ;;  %v5141_v54 = vadd.f32 %v5140_v63, %v5127_v51  ;;  %5829 = vmatpush.bf16.msra.mxu2 %v8766_v56  ;;  %v5168_v50 = vpop.f32.mrf.mxu3 }
 0x363   :  { %5375 = vmatmul.bf16.vlgmr.msrb.gmra.mxu0 %v10252_v27  ;;  %v5125_v27 = vadd.f32 %v5124_v32, %v5111_v37  ;;  %v5152_v26 = vpop.f32.mrf.mxu0  ;;  %v8770_v32 = vor.u32 %v9543_v7, %v8767_v18  ;;  %v8762_v37 = vor.u32 %v9541_v60, %v8759_v41  ;;  %v5169_v33 = vadd.f32 %v5168_v50, %v3647_v62  ;;  %v8813_v7 = vld [vmem:[#allocation11 + $0x1b0] sm:$0xf]  ;;  %v9556_v18 = vld [vmem:[#allocation11 + $0x1b4] sm:$0xf0]  ;;  %v9554_v41 = vld [vmem:[#allocation11 + $0x1a4] sm:$0xf0] }
 0x364   :  { %5863 = vmatmul.bf16.vlgmr.msrb.gmra.mxu3 %v5405_v19  ;;  %v9538_v19 = vld [vmem:[#allocation11 + $0x124] sm:$0xf0]  ;;  %v5196_v48 = vpop.f32.mrf.mxu2  ;;  %v8814_v60 = vor.u32 %v9556_v18, %v8813_v7 }
 0x365   :  { %v5139_v20 = vadd.f32 %v5138_v13, %v5125_v27  ;;  %v8742_v39 = vor.u32 %v9538_v19, %v8741_v47  ;;  %v5167_v13 = vadd.f32 %v5166_v0, %v3647_v62  ;;  %v9558_v0 = vld [vmem:[#allocation11 + $0x1c4] sm:$0xf0] }
 0x366   :  { %5876 = vmatpush.bf16.msrb.mxu1 %v8666_v23  ;;  %5830 = vmatpush.bf16.msra.mxu2 %v8758_v40  ;;  %v8746_v23 = vor.u32 %v9537_v57, %v8743_v29  ;;  %v9564_v40 = vld [vmem:[#allocation11 + $0x1f4] sm:$0xf0]  ;;  %v9563_v57 = vld [vmem:[#allocation11 + $0x1f4] sm:$0xf]  ;;  %v8847_v29 = vld [vmem:[#allocation11 + $0x1f8] sm:$0xf0] }
 0x367   :  { %v5153_v55 = vadd.f32 %v5152_v26, %v5139_v20  ;;  %v5182_v52 = vpop.f32.mrf.mxu1  ;;  %v5181_v27 = vadd.f32 %v5180_v36, %v5167_v13  ;;  %v9535_v26 = vld [vmem:[#allocation11 + $0x114] sm:$0xf]  ;;  %v9552_v13 = vld [vmem:[#allocation11 + $0x194] sm:$0xf0] }
 0x368   :  { %v8738_v20 = vor.u32 %v9535_v26, %v8735_v3  ;;  %v5183_v51 = vadd.f32 %v5182_v52, %v5169_v33  ;;  %v9550_v52 = vld [vmem:[#allocation11 + $0x184] sm:$0xf0]  ;;  %v8839_v26 = vld [vmem:[#allocation11 + $0x1e8] sm:$0xf0] }
 0x369   :  { %v5390_v15 = vmul.f32 0.2, %v5153_v55  ;;  %vm5382_vm3 = vcmp.gt.f32.partialorder %v5153_v55, 0.0  ;;  %v5195_v22 = vadd.f32 %v5194_v2, %v5181_v27  ;;  %v9561_v27 = vld [vmem:[#allocation11 + $0x1e4] sm:$0xf] }
 0x36a   :  { %5831 = vmatpush.bf16.msra.mxu2 %v8750_v38  ;;  %v5222_v42 = vpop.f32.mrf.mxu3  ;;  %v5197_v56 = vadd.f32 %v5196_v48, %v5183_v51  ;;  %v8837_v38 = vld [vmem:[#allocation11 + $0x1e0] sm:$0xf]  ;;  %v8842_v3 = vor.u32 %v9561_v27, %v8839_v26  ;;  %v9559_v48 = vld [vmem:[#allocation11 + $0x1d4] sm:$0xf] }
 0x36b   :  { %v5154_v44 = vpop.f32.mrf.mxu0  ;;  %v5398_v6 = vsel %vm5382_vm3, %v5153_v55, %v5390_v15 }
 0x36c   :  { %v5155_v61 = vadd.f32 %v5154_v44, %v5141_v54  ;;  %v9533_v44 = vld [vmem:[#allocation11 + $0x104] sm:$0xf] }
 0x36d   :  { %v8730_v15 = vor.u32 %v9533_v44, %v8727_v17  ;;  %v9555_v17 = vld [vmem:[#allocation11 + $0x1b4] sm:$0xf] }
 0x36e   :  { %vm5386_vm4 = vcmp.gt.f32.partialorder %v5155_v61, 0.0  ;;  %v5394_v28 = vmul.f32 0.2, %v5155_v61  ;;  %5832 = vmatpush.bf16.msra.mxu2 %v8742_v39 }
 0x36f   :  { %v5236_v34 = vpop.f32.mrf.mxu1 }
 0x370   :  { %v5402_v35 = vsel %vm5386_vm4, %v5155_v61, %v5394_v28  ;;  %v8845_v61 = vld [vmem:[#allocation11 + $0x1f0] sm:$0xf] }
 0x371   :  { %v5406_v12 = vpack.c.bf16 %v5402_v35, %v5398_v6  ;;  %v8846_v28 = vor.u32 %v9564_v40, %v8845_v61  ;;  %v9553_v40 = vld [vmem:[#allocation11 + $0x1a4] sm:$0xf] }
 0x372   :  { %5833 = vmatpush.bf16.msra.mxu2 %v8734_v58  ;;  %v5224_v24 = vpop.f32.mrf.mxu3  ;;  %v9560_v58 = vld [vmem:[#allocation11 + $0x1d4] sm:$0xf0] }
 0x373   :  { %5821 = vmatmul.bf16.vlgmr.msra.gmra.mxu1 %v5406_v12  ;;  %5841 = vmatpush.bf16.msra.mxu0 %v8846_v28  ;;  %v8830_v59 = vor.u32 %v9560_v58, %v8829_v8  ;;  %v8807_v28 = vld [vmem:[#allocation11 + $0x1a8] sm:$0xf0] }
 0x376   :  { %5834 = vmatpush.bf16.msra.mxu2 %v8726_v11 }
 0x377   :  { %v5238_v19 = vpop.f32.mrf.mxu1 }
 0x378   :  { %v5250_v1 = vpop.f32.mrf.mxu2 }
 0x37a   :  { %5883 = vmatpush.bf16.msrb.mxu2 %v8786_v4  ;;  %v8821_v4 = vld [vmem:[#allocation11 + $0x1c0] sm:$0xf] }
 0x37e   :  { %5884 = vmatpush.bf16.msrb.mxu2 %v8778_v30  ;;  %v8822_v30 = vor.u32 %v9558_v0, %v8821_v4 }
 0x380   :  { %v5208_v43 = vpop.f32.mrf.mxu0  ;;  %v5252_v11 = vpop.f32.mrf.mxu2 }
 0x381   :  { %v5209_v45 = vadd.f32 %v5208_v43, %v5195_v22  ;;  %v8797_v43 = vld [vmem:[#allocation11 + $0x190] sm:$0xf]  ;;  %v5278_v33 = vpop.f32.mrf.mxu3  ;;  %v8831_v22 = vld [vmem:[#allocation11 + $0x1d8] sm:$0xf0] }
 0x382   :  { %5885 = vmatpush.bf16.msrb.mxu2 %v8770_v32  ;;  %v8805_v32 = vld [vmem:[#allocation11 + $0x1a0] sm:$0xf]  ;;  %v8798_v46 = vor.u32 %v9552_v13, %v8797_v43 }
 0x383   :  { %5877 = vmatmul.bf16.vlgmr.msrb.gmra.mxu1 %v5406_v12  ;;  %v5223_v63 = vadd.f32 %v5222_v42, %v5209_v45  ;;  %v9562_v12 = vld [vmem:[#allocation11 + $0x1e4] sm:$0xf0]  ;;  %v5292_v42 = vpop.f32.mrf.mxu1  ;;  %v3648_v45 = vperm.slane %v10275_v25, 3 }
 0x384   :  { %v8838_v47 = vor.u32 %v9562_v12, %v8837_v38 }
 0x385   :  { %v5237_v21 = vadd.f32 %v5236_v34, %v5223_v63  ;;  %v9557_v34 = vld [vmem:[#allocation11 + $0x1c4] sm:$0xf]  ;;  %v5279_v44 = vadd.f32 %v5278_v33, %v3648_v45 }
 0x386   :  { %5886 = vmatpush.bf16.msrb.mxu2 %v8762_v37  ;;  %5842 = vmatpush.bf16.msra.mxu0 %v8838_v47  ;;  %v8806_v37 = vor.u32 %v9554_v41, %v8805_v32 }
 0x387   :  { %v5251_v39 = vadd.f32 %v5250_v1, %v5237_v21  ;;  %v8815_v1 = vld [vmem:[#allocation11 + $0x1b8] sm:$0xf0] }
 0x388   :  { %v5210_v55 = vpop.f32.mrf.mxu0  ;;  %v8818_v61 = vor.u32 %v9555_v17, %v8815_v1 }
 0x389   :  { %v5211_v54 = vadd.f32 %v5210_v55, %v5197_v56  ;;  %v8823_v55 = vld [vmem:[#allocation11 + $0x1c8] sm:$0xf0]  ;;  %v5280_v56 = vpop.f32.mrf.mxu3 }
 0x38a   :  { %5887 = vmatpush.bf16.msrb.mxu2 %v8754_v31  ;;  %5843 = vmatpush.bf16.msra.mxu0 %v8830_v59  ;;  %v8790_v31 = vor.u32 %v9550_v52, %v8789_v5  ;;  %v8826_v63 = vor.u32 %v9557_v34, %v8823_v55  ;;  %v5281_v21 = vadd.f32 %v5280_v56, %v3648_v45  ;;  %v9549_v59 = vld [vmem:[#allocation11 + $0x184] sm:$0xf] }
 0x38b   :  { %v5225_v6 = vadd.f32 %v5224_v24, %v5211_v54  ;;  %v8810_v24 = vor.u32 %v9553_v40, %v8807_v28  ;;  %v5923_v40 = vld [vmem:[#allocation14] sm:$0x3] }
 0x38d   :  { %v5239_v53 = vadd.f32 %v5238_v19, %v5225_v6  ;;  %v5293_v6 = vadd.f32 %v5292_v42, %v5279_v44  ;;  %v9551_v19 = vld [vmem:[#allocation11 + $0x194] sm:$0xf] }
 0x38e   :  { %5888 = vmatpush.bf16.msrb.mxu2 %v8746_v23  ;;  %5844 = vmatpush.bf16.msra.mxu0 %v8822_v30  ;;  %v8850_v23 = vor.u32 %v9563_v57, %v8847_v29 }
 0x38f   :  { %v5253_v9 = vadd.f32 %v5252_v11, %v5239_v53  ;;  %v8791_v11 = vld [vmem:[#allocation11 + $0x188] sm:$0xf0] }
 0x390   :  { %v8794_v4 = vor.u32 %v9549_v59, %v8791_v11 }
 0x392   :  { %5889 = vmatpush.bf16.msrb.mxu2 %v8738_v20  ;;  %5845 = vmatpush.bf16.msra.mxu0 %v8814_v60  ;;  %v8834_v20 = vor.u32 %v9559_v48, %v8831_v22 }
 0x396   :  { %5890 = vmatpush.bf16.msrb.mxu2 %v8730_v15  ;;  %5846 = vmatpush.bf16.msra.mxu0 %v8806_v37  ;;  %v5294_v15 = vpop.f32.mrf.mxu1 }
 0x397   :  { %v5295_v12 = vadd.f32 %v5294_v15, %v5281_v21 }
 0x39a   :  { %5847 = vmatpush.bf16.msra.mxu0 %v8798_v46 }
 0x39c   :  { %v5306_v51 = vpop.f32.mrf.mxu2 }
 0x39d   :  { %v5307_v25 = vadd.f32 %v5306_v51, %v5293_v6 }
 0x39e   :  { %5848 = vmatpush.bf16.msra.mxu0 %v8790_v31  ;;  %v5348_v53 = vpop.f32.mrf.mxu1 }
 0x3a0   :  { %v5264_v35 = vpop.f32.mrf.mxu0 }
 0x3a1   :  { %v5265_v14 = vadd.f32 %v5264_v35, %v5251_v39  ;;  %v5334_v35 = vpop.f32.mrf.mxu3  ;;  %v8799_v39 = vld [vmem:[#allocation11 + $0x198] sm:$0xf0] }
 0x3a2   :  { %5897 = vmatpush.bf16.msrb.mxu0 %v8850_v23  ;;  %v8802_v58 = vor.u32 %v9551_v19, %v8799_v39  ;;  %v5473_v23 = vld [vmem:[#allocation13] sm:$0x3] }
 0x3a3   :  { %v5391_v49 = vmul.f32 0.2, %v5265_v14  ;;  %vm5383_vm5 = vcmp.gt.f32.partialorder %v5265_v14, 0.0  ;;  %v5476_v22 = vperm.slane %v5473_v23, 1 }
 0x3a4   :  { %v5308_v38 = vpop.f32.mrf.mxu2 }
 0x3a5   :  { %v5399_v2 = vsel %vm5383_vm5, %v5265_v14, %v5391_v49  ;;  %v5309_v14 = vadd.f32 %v5308_v38, %v5295_v12  ;;  %v5925_v38 = vperm.slane %v5923_v40, 0 }
 0x3a6   :  { %5898 = vmatpush.bf16.msrb.mxu0 %v8842_v3  ;;  %v5350_v7 = vpop.f32.mrf.mxu1  ;;  %v5475_v3 = vperm.slane %v5473_v23, 0 }
 0x3a8   :  { %v5266_v16 = vpop.f32.mrf.mxu0 }
 0x3a9   :  { %v5267_v10 = vadd.f32 %v5266_v16, %v5253_v9  ;;  %v5336_v49 = vpop.f32.mrf.mxu3 }
 0x3aa   :  { %5899 = vmatpush.bf16.msrb.mxu0 %v8834_v20 }
 0x3ab   :  { %vm5387_vm6 = vcmp.gt.f32.partialorder %v5267_v10, 0.0  ;;  %v5395_v36 = vmul.f32 0.2, %v5267_v10 }
 0x3ad   :  { %v5403_v62 = vsel %vm5387_vm6, %v5267_v10, %v5395_v36 }
 0x3ae   :  { %v5407_v50 = vpack.c.bf16 %v5403_v62, %v5399_v2  ;;  %5900 = vmatpush.bf16.msrb.mxu0 %v8826_v63 }
 0x3b0   :  { %5835 = vmatmul.bf16.vlgmr.msra.gmra.mxu2 %v5407_v50 }
 0x3b2   :  { %5901 = vmatpush.bf16.msrb.mxu0 %v8818_v61 }
 0x3b6   :  { %5902 = vmatpush.bf16.msrb.mxu0 %v8810_v24 }
 0x3ba   :  { %5903 = vmatpush.bf16.msrb.mxu0 %v8802_v58 }
 0x3bc   :  { %v5362_v0 = vpop.f32.mrf.mxu2 }
 0x3be   :  { %5904 = vmatpush.bf16.msrb.mxu0 %v8794_v4 }
 0x3c0   :  { %5891 = vmatmul.bf16.vlgmr.msrb.gmra.mxu2 %v5407_v50  ;;  %v5320_v54 = vpop.f32.mrf.mxu0 }
 0x3c1   :  { %v5321_v47 = vadd.f32 %v5320_v54, %v5307_v25  ;;  %v5926_v25 = vperm.slane %v5923_v40, 1 }
 0x3c3   :  { %v5335_v9 = vadd.f32 %v5334_v35, %v5321_v47 }
 0x3c4   :  { %v5364_v62 = vpop.f32.mrf.mxu2 }
 0x3c5   :  { %v5349_v10 = vadd.f32 %v5348_v53, %v5335_v9 }
 0x3c7   :  { %v5363_v18 = vadd.f32 %v5362_v0, %v5349_v10 }
 0x3c8   :  { %v5322_v8 = vpop.f32.mrf.mxu0 }
 0x3c9   :  { %v5323_v16 = vadd.f32 %v5322_v8, %v5309_v14 }
 0x3cb   :  { %v5337_v30 = vadd.f32 %v5336_v49, %v5323_v16 }
 0x3cd   :  { %v5351_v32 = vadd.f32 %v5350_v7, %v5337_v30 }
 0x3cf   :  { %v5365_v60 = vadd.f32 %v5364_v62, %v5351_v32 }
 0x3d7   :  { %v5808_v52 = vpop.f32.mrf.mxu3 }
 0x3d8   :  { %v5809_v42 = vadd.f32 %v5808_v52, %v5475_v3 }
 0x3df   :  { %v5810_v29 = vpop.f32.mrf.mxu3 }
 0x3e0   :  { %v5376_v36 = vpop.f32.mrf.mxu0  ;;  %v5811_v54 = vadd.f32 %v5810_v29, %v5475_v3 }
 0x3e1   :  { %v5377_v2 = vadd.f32 %v5376_v36, %v5363_v18  ;;  %v9581_v18 = vld [vmem:[#allocation2] ss:$0 sm:$0xff] }
 0x3e3   :  { %v5392_v50 = vmul.f32 0.2, %v5377_v2  ;;  %vm5384_vm7 = vcmp.gt.f32.partialorder %v5377_v2, 0.0 }
 0x3e5   :  { %v5400_v13 = vsel %vm5384_vm7, %v5377_v2, %v5392_v50 }
 0x3e7   :  { %v5864_v48 = vpop.f32.mrf.mxu3 }
 0x3e8   :  { %v5378_v41 = vpop.f32.mrf.mxu0  ;;  %v5865_v56 = vadd.f32 %v5864_v48, %v5476_v22 }
 0x3e9   :  { %v5379_v37 = vadd.f32 %v5378_v41, %v5365_v60 }
 0x3eb   :  { %vm5388_vm8 = vcmp.gt.f32.partialorder %v5379_v37, 0.0  ;;  %v5396_v43 = vmul.f32 0.2, %v5379_v37 }
 0x3ed   :  { %v5404_v46 = vsel %vm5388_vm8, %v5379_v37, %v5396_v43 }
 0x3ee   :  { %v5408_v5 = vpack.c.bf16 %v5404_v46, %v5400_v13 }
 0x3ef   :  { %v5866_v17 = vpop.f32.mrf.mxu3 }
 0x3f0   :  { %5849 = vmatmul.bf16.vlgmr.msra.gmra.mxu0 %v5408_v5  ;;  %v5822_v31 = vpop.f32.mrf.mxu1  ;;  %v5867_v6 = vadd.f32 %v5866_v17, %v5476_v22 }
 0x3f1   :  { %v5823_v20 = vadd.f32 %v5822_v31, %v5809_v42 }
 0x3f8   :  { %v5824_v33 = vpop.f32.mrf.mxu1 }
 0x3f9   :  { %v5825_v1 = vadd.f32 %v5824_v33, %v5811_v54 }
 0x400   :  { %5905 = vmatmul.bf16.vlgmr.msrb.gmra.mxu0 %v5408_v5  ;;  %v5878_v51 = vpop.f32.mrf.mxu1 }
 0x401   :  { %v5879_v44 = vadd.f32 %v5878_v51, %v5865_v56 }
 0x408   :  { %v5880_v35 = vpop.f32.mrf.mxu1 }
 0x409   :  { %v5881_v53 = vadd.f32 %v5880_v35, %v5867_v6 }
 0x433   :  { %v5836_v57 = vpop.f32.mrf.mxu2 }
 0x434   :  { %v5837_v34 = vadd.f32 %v5836_v57, %v5823_v20 }
 0x43b   :  { %v5838_v27 = vpop.f32.mrf.mxu2 }
 0x43c   :  { %v5839_v24 = vadd.f32 %v5838_v27, %v5825_v1 }
 0x443   :  { %v5892_v55 = vpop.f32.mrf.mxu2 }
 0x444   :  { %v5893_v15 = vadd.f32 %v5892_v55, %v5879_v44 }
 0x44b   :  { %v5894_v39 = vpop.f32.mrf.mxu2 }
 0x44c   :  { %v5895_v59 = vadd.f32 %v5894_v39, %v5881_v53 }
 0x46d   :  { %v5850_v26 = vpop.f32.mrf.mxu0 }
 0x46e   :  { %v5851_v63 = vadd.f32 %v5850_v26, %v5837_v34 }
 0x470   :  { %v5915_v61 = vmul.f32 0.2, %v5851_v63  ;;  %vm5911_vm9 = vcmp.gt.f32.partialorder %v5851_v63, 0.0 }
 0x472   :  { %v5919_v19 = vsel %vm5911_vm9, %v5851_v63, %v5915_v61 }
 0x473   :  { %v5929_v58 = vmul.f32 %v5925_v38, %v5919_v19 }
 0x475   :  { %v5852_v45 = vpop.f32.mrf.mxu0 }
 0x476   :  { %v5853_v12 = vadd.f32 %v5852_v45, %v5839_v24 }
 0x478   :  { %v5917_v11 = vmul.f32 0.2, %v5853_v12  ;;  %vm5913_vm11 = vcmp.gt.f32.partialorder %v5853_v12, 0.0 }
 0x47a   :  { %v5921_v49 = vsel %vm5913_vm11, %v5853_v12, %v5917_v11 }
 0x47b   :  { %v5931_v30 = vmul.f32 %v5925_v38, %v5921_v49 }
 0x47d   :  { %v5906_v28 = vpop.f32.mrf.mxu0 }
 0x47e   :  { %v5907_v21 = vadd.f32 %v5906_v28, %v5893_v15 }
 0x480   :  { %vm5912_vm10 = vcmp.gt.f32.partialorder %v5907_v21, 0.0  ;;  %v5916_v47 = vmul.f32 0.2, %v5907_v21 }
 0x482   :  { %v5920_v8 = vsel %vm5912_vm10, %v5907_v21, %v5916_v47 }
 0x483   :  { %v5930_v14 = vmul.f32 %v5926_v25, %v5920_v8 }
 0x485   :  { %v5908_v9 = vpop.f32.mrf.mxu0  ;;  %v5933_v16 = vadd.f32 %v5930_v14, %v5929_v58 }
 0x486   :  { %v5909_v4 = vadd.f32 %v5908_v9, %v5895_v59 }
 0x487   :  { %5934 = vadd.xlane.f32.xlu0 %v5933_v16 }
 0x488   :  { %vm5914_vm12 = vcmp.gt.f32.partialorder %v5909_v4, 0.0  ;;  %v5918_v0 = vmul.f32 0.2, %v5909_v4 }
 0x48a   :  { %v5922_v10 = vsel %vm5914_vm12, %v5909_v4, %v5918_v0 }
 0x48b   :  { %v5932_v36 = vmul.f32 %v5926_v25, %v5922_v10 }
 0x48d   :  { %v5936_v7 = vadd.f32 %v5932_v36, %v5931_v30 }
 0x48f   :  { %5937 = vadd.xlane.f32.xlu0 %v5936_v7 }
 0x4fa   :  { %v5935_v32 = vpop.xlane.xlu0 %5934 }
 0x4fb   :  { %v5943_v2 = vadd.f32 %v9581_v18, %v5935_v32 }
 0x4fd   :  { %v8851_v62 = vmul.f32 -1.442695, %v5943_v2 }
 0x4ff   :  { %9582 = vpow2.f32 %v8851_v62 }
 0x502   :  { %v5938_v60 = vpop.xlane.xlu0 %5937 }
 0x503   :  { %v5944_v41 = vadd.f32 %v9581_v18, %v5938_v60 }
 0x505   :  { %v9583_v50 = vpop.eup %9582  ;;  %v8852_v37 = vmul.f32 -1.442695, %v5944_v41 }
 0x506   :  { %v5951_v43 = vadd.f32 1.0, %v9583_v50 }
 0x507   :  { %9584 = vpow2.f32 %v8852_v37 }
 0x508   :  { %9586 = vrcp.f32 %v5951_v43  ;;  %v5964_v57 = vand.u32 2147483648, %v5951_v43  ;;  %v5962_v23 = vand.u32 2147483647, %v5951_v43  ;;  %vm5958_vm14 = vweird.f32 %v5951_v43 }
 0x50a   :  { %v5965_v26 = vor.u32 1.1754944e-38, %v5964_v57  ;;  %vm5963_vm1 = vcmp.eq.f32.partialorder %v5962_v23, 8.507059e+37 }
 0x50d   :  { %v9585_v13 = vpop.eup %9584 }
 0x50e   :  { %v9587_v46 = vpop.eup %9586  ;;  %v5952_v5 = vadd.f32 1.0, %v9585_v13 }
 0x50f   :  { %v5954_v52 = vmul.f32 %v9587_v46, %v5951_v43  ;;  %vm5959_vm13 = vweird.f32 %v9587_v46 }
 0x510   :  { %9588 = vrcp.f32 %v5952_v5  ;;  %vm5960_vm0 = vmor %vm5958_vm14, %vm5959_vm13  ;;  %v5979_v20 = vand.u32 2147483648, %v5952_v5  ;;  %v5977_v45 = vand.u32 2147483647, %v5952_v5  ;;  %vm5973_vm3 = vweird.f32 %v5952_v5 }
 0x511   :  { %v5955_v31 = vsub.f32 1.0, %v5954_v52 }
 0x512   :  { %v5980_v55 = vor.u32 1.1754944e-38, %v5979_v20  ;;  %vm5978_vm5 = vcmp.eq.f32.partialorder %v5977_v45, 8.507059e+37 }
 0x513   :  { %v5956_v29 = vmul.f32 %v9587_v46, %v5955_v31 }
 0x515   :  { %v5957_v33 = vadd.f32 %v9587_v46, %v5956_v29 }
 0x516   :  { %v9589_v27 = vpop.eup %9588 }
 0x517   :  { %v5961_v3 = vsel %vm5960_vm0, %v9587_v46, %v5957_v33  ;;  %v5969_v42 = vmul.f32 %v9589_v27, %v5952_v5  ;;  %vm5974_vm2 = vweird.f32 %v9589_v27 }
 0x518   :  { %v5966_v48 = vsel %vm5963_vm1, %v5965_v26, %v5961_v3  ;;  %vm5975_vm4 = vmor %vm5973_vm3, %vm5974_vm2 }
 0x519   :  { %5984 = vst.msk [vmem:[%s10322_s9] sm:$0xff] %vm5983_vm15, %v5966_v48  ;;  %v5970_v22 = vsub.f32 1.0, %v5969_v42 }
 0x51b   :  { %v5971_v51 = vmul.f32 %v9589_v27, %v5970_v22 }
 0x51d   :  { %v5972_v34 = vadd.f32 %v9589_v27, %v5971_v51 }
 0x51f   :  { %v5976_v56 = vsel %vm5975_vm4, %v9589_v27, %v5972_v34 }
 0x520   :  { %v5981_v63 = vsel %vm5978_vm5, %v5980_v55, %v5976_v56 }
 0x521   :  { %5985 = vst.msk [vmem:[%s10322_s9 + $0x8] sm:$0xff] %vm5983_vm15, %v5981_v63 }
 0x522   :  { %5990 = vsyncpa [#allocation4], 1 }
 0x523   :  { %5991 = vsyncpa [#allocation6], 1 }
 0x524   :  { %5992 = vsyncpa [#allocation9], 1 }
 0x525   :  { %5993 = vsyncpa [#allocation12], 1 }
 0x526   :  { %5994 = vsyncpa [#allocation15], 1 }

</bundles_post_ra>
